<compile_context>
chip_gen: v5e
topology: v5e:2x2
jax: 0.10.0
libtpu: 0.0.40
codegen_flags: <defaults>
</compile_context>

<pallas_src>
import functools

import jax
import jax.numpy as jnp
from jax import lax
from jax.experimental import pallas as pl
from jax.experimental.pallas import tpu as pltpu


def _round_up(v, m):
    return ((v + m - 1) // m) * m


def _attention_kernel(x_ref, wqkv_ref, wp_ref, o_ref,
                      q_s, k_s, v_s, ctx_s,
                      *, num_heads, n_valid, block_q):
    # x_ref   : (1, N_pad, C)  full (padded) sequence for this batch element
    # wqkv_ref: (C, 3C)        [Wq*scale | Wk | Wv], (in, out) layout
    # wp_ref  : (C, C)         output projection, (in, out) layout
    # o_ref   : (1, tq, C)
    # q_s     : (N_pad, C)  scaled Q, whole sequence   (persistent scratch)
    # k_s     : (C, N_pad)  K^T, whole sequence        (persistent scratch)
    # v_s     : (N_pad, C)  V, whole sequence          (persistent scratch)
    # ctx_s   : (tq, C)     concatenated per-head contexts for this tile
    qi = pl.program_id(1)
    dt = x_ref.dtype                      # caller/compute dtype (bf16 or f32)
    n_pad = x_ref.shape[1]
    C = x_ref.shape[2]
    hd = C // num_heads

    # --- Fused QKV projection for the whole sequence, once per batch elem. ---
    @pl.when(qi == 0)
    def _():
        xf = x_ref[0]                                               # (N_pad, C)
        qkv = jnp.dot(xf, wqkv_ref[...],
                      preferred_element_type=jnp.float32)           # (N_pad, 3C)
        q_s[...] = qkv[:, :C].astype(dt)           # softmax scale folded in Wq
        k_s[...] = jnp.transpose(qkv[:, C:2 * C]).astype(dt)        # (C, N_pad)
        v_s[...] = qkv[:, 2 * C:].astype(dt)                        # (N_pad, C)

    row0 = pl.multiple_of(qi * block_q, 8)
    q = q_s[pl.ds(row0, block_q), :]                                # (tq, C)

    # Mask out zero-padded key positions (only emitted when padding exists).
    if n_pad > n_valid:
        col = lax.broadcasted_iota(jnp.int32, (block_q, n_pad), 1)
        key_bias = jnp.where(col < n_valid, 0.0, -1e30).astype(jnp.float32)
    else:
        key_bias = None

    # --- Per-head attention; contexts land in ctx_s lane slices. ---
    for h in range(num_heads):                       # static, unrolled
        lo = h * hd
        qh = q[:, lo:lo + hd]                                       # (tq, hd)
        kt = k_s[lo:lo + hd, :]                                     # (hd, N_pad)
        logits = jnp.dot(qh, kt, preferred_element_type=jnp.float32)
        if key_bias is not None:
            logits = logits + key_bias
        m = jnp.max(logits, axis=-1, keepdims=True)
        p = jnp.exp(logits - m)                                     # unnormalized
        s = jnp.sum(p, axis=-1, keepdims=True)
        vh = v_s[:, lo:lo + hd]                                     # (N_pad, hd)
        ctx = jnp.dot(p.astype(dt), vh,
                      preferred_element_type=jnp.float32)           # (tq, hd)
        # Normalize after PV: tq*hd multiplies instead of tq*N (EUP reciprocal).
        ctx = ctx * pl.reciprocal(s, approx=True)
        ctx_s[:, lo:lo + hd] = ctx.astype(dt)

    # --- Single fused output projection over all heads (full-C contraction). --
    o_ref[0] = jnp.dot(ctx_s[...], wp_ref[...],
                       preferred_element_type=jnp.float32).astype(o_ref.dtype)


def attention(x, wq, wk, wv, wp, *, num_heads, qk_scale=None, block_q=128):
    """x: (B, N, C); weights: (C, C) laid out as (in_features, out_features).

    block_q=128 is a good default; use 256 on v6e/v7x for large N (256-wide MXU).
    """
    B, N, C = x.shape
    assert C % num_heads == 0, "dim should be divisible by num_heads"
    head_dim = C // num_heads
    scale = float(qk_scale) if qk_scale is not None else head_dim ** (-0.5)

    # Query tile (multiple of 8); pad the sequence rather than falling back to
    # tq = N so tiling stays active for ragged N (e.g. ViT's N = 197).
    tq = _round_up(min(block_q, _round_up(N, 8)), 8)
    n_pad = _round_up(N, tq)
    n_q = n_pad // tq
    x_in = jnp.pad(x, ((0, 0), (0, n_pad - N), (0, 0))) if n_pad != N else x

    # Fold the softmax scale into Wq and fuse Q/K/V weights so the whole-
    # sequence QKV projection is a single (N, C) @ (C, 3C) matmul.
    wq_scaled = (wq.astype(jnp.float32) * scale).astype(wq.dtype)
    w_qkv = jnp.concatenate([wq_scaled, wk, wv], axis=1)            # (C, 3C)

    kernel = functools.partial(_attention_kernel, num_heads=num_heads,
                               n_valid=N, block_q=tq)

    # VMEM budget: pipelined blocks (double-buffered) + persistent scratch +
    # f32 intermediates, with headroom, capped below physical per-core VMEM.
    itemsize = jnp.dtype(x.dtype).itemsize
    pipelined = 2 * (n_pad * C + 4 * C * C + tq * C) * itemsize
    persistent = (3 * n_pad * C + tq * C) * itemsize
    intermediates = 4 * (n_pad * 3 * C + tq * n_pad + tq * C)       # f32 temps
    need = int(1.25 * (pipelined + persistent + intermediates)) + (4 << 20)
    try:
        cap = int(pltpu.get_tpu_info().vmem_capacity_bytes)
    except Exception:
        cap = 64 << 20
    vmem_limit = max(16 << 20, min(need, int(0.75 * cap)))

    out = pl.pallas_call(
        kernel,
        out_shape=jax.ShapeDtypeStruct((B, n_pad, C), x.dtype),
        grid_spec=pltpu.PrefetchScalarGridSpec(
            num_scalar_prefetch=0,
            grid=(B, n_q),
            in_specs=[
                # Full-sequence x block per batch element; block index is
                # constant along the query-tile axis so it stays resident.
                pl.BlockSpec((1, n_pad, C), lambda b, qi: (b, 0, 0)),
                # Weight blocks are constant across the whole grid.
                # (Optional v7x VMEM saving: pipeline_mode=pl.Buffered(1).)
                pl.BlockSpec((C, 3 * C), lambda b, qi: (0, 0)),
                pl.BlockSpec((C, C), lambda b, qi: (0, 0)),
            ],
            out_specs=pl.BlockSpec((1, tq, C), lambda b, qi: (b, qi, 0)),
            scratch_shapes=[
                pltpu.VMEM((n_pad, C), x.dtype),   # Q (pre-scaled), whole seq
                pltpu.VMEM((C, n_pad), x.dtype),   # K^T, whole sequence
                pltpu.VMEM((n_pad, C), x.dtype),   # V, whole sequence
                pltpu.VMEM((tq, C), x.dtype),      # concatenated head contexts
            ],
        ),
        compiler_params=pltpu.CompilerParams(
            # Batch axis is independent (megacore-shardable); the qi axis
            # carries the Q/K/V scratch (filled at qi == 0), so "arbitrary".
            dimension_semantics=("parallel", "arbitrary"),
            vmem_limit_bytes=vmem_limit,
        ),
    )(x_in, w_qkv, wp)

    return out[:, :N, :] if n_pad != N else out


def _reference(x, wq, wk, wv, wp, *, num_heads, qk_scale=None):
    """Pure-JAX f32 reference mirroring the PyTorch forward exactly."""
    B, N, C = x.shape
    head_dim = C // num_heads
    scale = qk_scale if qk_scale is not None else head_dim ** (-0.5)
    xf = x.astype(jnp.float32)

    def split(y):  # (B, N, C) -> (B, H, N, hd)
        return y.reshape(B, N, num_heads, head_dim).transpose(0, 2, 1, 3)

    q = split(xf @ wq.astype(jnp.float32))
    k = split(xf @ wk.astype(jnp.float32))
    v = split(xf @ wv.astype(jnp.float32))

    attn = jnp.einsum("bhnd,bhmd->bhnm", q, k) * scale
    attn = jax.nn.softmax(attn, axis=-1)
    ctx = jnp.einsum("bhnm,bhmd->bhnd", attn, v)
    ctx = ctx.transpose(0, 2, 1, 3).reshape(B, N, C)
    return ctx @ wp.astype(jnp.float32)


if __name__ == "__main__":
    # Small shapes consistent with the module (dim divisible by num_heads).
    B, N, C = 2, 128, 64
    num_heads = 8

    key = jax.random.PRNGKey(0)
    kx, kq, kk, kv, kp = jax.random.split(key, 5)

    x = jax.random.normal(kx, (B, N, C), dtype=jnp.float32)
    # Deterministic synthetic weights (in_features, out_features), no bias
    # (qkv_bias=False in the module's defaults).
    wq = jax.random.normal(kq, (C, C), dtype=jnp.float32) * 0.05
    wk = jax.random.normal(kk, (C, C), dtype=jnp.float32) * 0.05
    wv = jax.random.normal(kv, (C, C), dtype=jnp.float32) * 0.05
    wp = jax.random.normal(kp, (C, C), dtype=jnp.float32) * 0.05

    # f32 path, block_q=64 -> two query tiles per batch element.
    out = jax.block_until_ready(
        attention(x, wq, wk, wv, wp, num_heads=num_heads, block_q=64))
    ref = _reference(x, wq, wk, wv, wp, num_heads=num_heads)
    assert out.shape == (B, N, C)
    assert jnp.allclose(out, ref, atol=5e-3, rtol=5e-3), "f32 mismatch"

    # Ragged N (ViT-style, e.g. 197): exercises host padding + key masking.
    N2 = 100
    x2 = x[:, :N2, :]
    out2 = jax.block_until_ready(
        attention(x2, wq, wk, wv, wp, num_heads=num_heads, block_q=64))
    ref2 = _reference(x2, wq, wk, wv, wp, num_heads=num_heads)
    assert out2.shape == (B, N2, C)
    assert jnp.allclose(out2, ref2, atol=5e-3, rtol=5e-3), "padded-N mismatch"

    # bf16 operand path (MXU-native inputs, f32 accumulation).
    xb, wqb, wkb, wvb, wpb = (a.astype(jnp.bfloat16) for a in (x, wq, wk, wv, wp))
    out_b = jax.block_until_ready(
        attention(xb, wqb, wkb, wvb, wpb, num_heads=num_heads, block_q=64))
    ref_b = _reference(xb, wqb, wkb, wvb, wpb, num_heads=num_heads)
    assert jnp.allclose(out_b.astype(jnp.float32), ref_b, atol=1e-1, rtol=1e-1), \
        "bf16 mismatch"

    # attn_drop / proj_drop are 0.0 (identity at inference) -> no-op here.
    print("KERNEL_OK")
</pallas_src>

<mosaic_0001>
module attributes {stable_mosaic.version = 11 : i64} {
  func.func @_attention_kernel(%arg0: i32, %arg1: i32, %arg2: memref<1x128x64xf32, #tpu.memory_space<vmem>>, %arg3: memref<64x192xf32, #tpu.memory_space<vmem>>, %arg4: memref<64x64xf32, #tpu.memory_space<vmem>>, %arg5: memref<1x64x64xf32, #tpu.memory_space<vmem>>, %arg6: memref<128x64xf32, #tpu.memory_space<vmem>>, %arg7: memref<64x128xf32, #tpu.memory_space<vmem>>, %arg8: memref<128x64xf32, #tpu.memory_space<vmem>>, %arg9: memref<64x64xf32, #tpu.memory_space<vmem>>) attributes {dimension_semantics = [#tpu.dimension_semantics<parallel>, #tpu.dimension_semantics<arbitrary>], iteration_bounds = array<i64: 2, 2>, scalar_prefetch = 0 : i64, scratch_operands = 4 : i64, tpu.core_type = #tpu.core_type<tc>, window_params = [{transform_indices = @transform_0, window_bounds = array<i64: 1, 128, 64>}, {pipeline_mode = #tpu.pipeline_mode<synchronous>, transform_indices = @transform_1, window_bounds = array<i64: 64, 192>}, {pipeline_mode = #tpu.pipeline_mode<synchronous>, transform_indices = @transform_2, window_bounds = array<i64: 64, 64>}, {transform_indices = @transform_3, window_bounds = array<i64: 1, 64, 64>}]} {
    %c0_i32 = arith.constant 0 : i32
    %0 = arith.cmpi eq, %arg1, %c0_i32 : i32
    %1 = arith.extui %0 : i1 to i32
    %c0_i32_0 = arith.constant 0 : i32
    %2 = arith.cmpi ne, %1, %c0_i32_0 : i32
    scf.if %2 {
      %c0_81 = arith.constant 0 : index
      %c0_82 = arith.constant 0 : index
      %c0_83 = arith.constant 0 : index
      %141 = vector.load %arg2[%c0_81, %c0_82, %c0_83] : memref<1x128x64xf32, #tpu.memory_space<vmem>>, vector<1x128x64xf32>
      %142 = vector.shape_cast %141 : vector<1x128x64xf32> to vector<128x64xf32>
      %c0_84 = arith.constant 0 : index
      %c0_85 = arith.constant 0 : index
      %143 = vector.load %arg3[%c0_84, %c0_85] : memref<64x192xf32, #tpu.memory_space<vmem>>, vector<64x192xf32>
      %cst_86 = arith.constant dense<0.000000e+00> : vector<128x192xf32>
      %144 = tpu.matmul %142, %143, %cst_86 {dimension_numbers = #tpu.dot_dimension_numbers<[1], [0], [0], [1], [0, 0, 1, 1], [], []>} : vector<128x64xf32>, vector<64x192xf32>, vector<128x192xf32> -> vector<128x192xf32>
      %145 = vector.extract_strided_slice %144 {offsets = [0, 0], sizes = [128, 64], strides = [1, 1]} : vector<128x192xf32> to vector<128x64xf32>
      %c0_87 = arith.constant 0 : index
      %c0_88 = arith.constant 0 : index
      %146 = vector.load %arg6[%c0_87, %c0_88] : memref<128x64xf32, #tpu.memory_space<vmem>>, vector<128x64xf32>
      tpu.vector_store %arg6[%c0_87, %c0_88], %145 {strides = array<i32>} : memref<128x64xf32, #tpu.memory_space<vmem>>, vector<128x64xf32>,
      %147 = vector.extract_strided_slice %144 {offsets = [0, 64], sizes = [128, 64], strides = [1, 1]} : vector<128x192xf32> to vector<128x64xf32>
      %148 = tpu.transpose %147, [1, 0] : vector<128x64xf32> -> vector<64x128xf32>
      %c0_89 = arith.constant 0 : index
      %c0_90 = arith.constant 0 : index
      %149 = vector.load %arg7[%c0_89, %c0_90] : memref<64x128xf32, #tpu.memory_space<vmem>>, vector<64x128xf32>
      tpu.vector_store %arg7[%c0_89, %c0_90], %148 {strides = array<i32>} : memref<64x128xf32, #tpu.memory_space<vmem>>, vector<64x128xf32>,
      %150 = vector.extract_strided_slice %144 {offsets = [0, 128], sizes = [128, 64], strides = [1, 1]} : vector<128x192xf32> to vector<128x64xf32>
      %c0_91 = arith.constant 0 : index
      %c0_92 = arith.constant 0 : index
      %151 = vector.load %arg8[%c0_91, %c0_92] : memref<128x64xf32, #tpu.memory_space<vmem>>, vector<128x64xf32>
      tpu.vector_store %arg8[%c0_91, %c0_92], %150 {strides = array<i32>} : memref<128x64xf32, #tpu.memory_space<vmem>>, vector<128x64xf32>,
    } else {
    }
    %c64_i32 = arith.constant 64 : i32
    %3 = arith.muli %arg1, %c64_i32 : i32
    %4 = tpu.assume_multiple %3, 8 : i32
    %5 = arith.index_cast %4 : i32 to index
    %c0 = arith.constant 0 : index
    %6 = vector.load %arg6[%5, %c0] : memref<128x64xf32, #tpu.memory_space<vmem>>, vector<64x64xf32>
    %7 = vector.extract_strided_slice %6 {offsets = [0, 0], sizes = [64, 8], strides = [1, 1]} : vector<64x64xf32> to vector<64x8xf32>
    %c0_1 = arith.constant 0 : index
    %c0_2 = arith.constant 0 : index
    %8 = vector.load %arg7[%c0_1, %c0_2] : memref<64x128xf32, #tpu.memory_space<vmem>>, vector<8x128xf32>
    %cst = arith.constant dense<0.000000e+00> : vector<64x128xf32>
    %9 = tpu.matmul %7, %8, %cst {dimension_numbers = #tpu.dot_dimension_numbers<[1], [0], [0], [1], [0, 0, 1, 1], [], []>} : vector<64x8xf32>, vector<8x128xf32>, vector<64x128xf32> -> vector<64x128xf32>
    %cst_3 = arith.constant dense<0xFF800000> : vector<64xf32>
    %10 = vector.multi_reduction <maximumf>, %9, %cst_3 [1] : vector<64x128xf32> to vector<64xf32>
    %11 = vector.shape_cast %10 : vector<64xf32> to vector<64x1xf32>
    %12 = vector.broadcast %11 : vector<64x1xf32> to vector<64x128xf32>
    %13 = arith.subf %9, %12 : vector<64x128xf32>
    %14 = math.exp %13 : vector<64x128xf32>
    %cst_4 = arith.constant dense<0.000000e+00> : vector<64xf32>
    %15 = vector.multi_reduction <add>, %14, %cst_4 [1] : vector<64x128xf32> to vector<64xf32>
    %16 = vector.shape_cast %15 : vector<64xf32> to vector<64x1xf32>
    %c0_5 = arith.constant 0 : index
    %c0_6 = arith.constant 0 : index
    %17 = vector.load %arg8[%c0_5, %c0_6] : memref<128x64xf32, #tpu.memory_space<vmem>>, vector<128x8xf32>
    %cst_7 = arith.constant dense<0.000000e+00> : vector<64x8xf32>
    %18 = tpu.matmul %14, %17, %cst_7 {dimension_numbers = #tpu.dot_dimension_numbers<[1], [0], [0], [1], [0, 0, 1, 1], [], []>} : vector<64x128xf32>, vector<128x8xf32>, vector<64x8xf32> -> vector<64x8xf32>
    %19 = tpu.reciprocal %16 {approx = true} : vector<64x1xf32> -> vector<64x1xf32>
    %20 = vector.broadcast %19 : vector<64x1xf32> to vector<64x8xf32>
    %21 = arith.mulf %18, %20 : vector<64x8xf32>
    %c0_8 = arith.constant 0 : index
    %c0_9 = arith.constant 0 : index
    %22 = vector.load %arg9[%c0_8, %c0_9] : memref<64x64xf32, #tpu.memory_space<vmem>>, vector<64x8xf32>
    tpu.vector_store %arg9[%c0_8, %c0_9], %21 {strides = array<i32>} : memref<64x64xf32, #tpu.memory_space<vmem>>, vector<64x8xf32>,
    %23 = vector.extract_strided_slice %6 {offsets = [0, 8], sizes = [64, 8], strides = [1, 1]} : vector<64x64xf32> to vector<64x8xf32>
    %c8 = arith.constant 8 : index
    %c0_10 = arith.constant 0 : index
    %24 = vector.load %arg7[%c8, %c0_10] : memref<64x128xf32, #tpu.memory_space<vmem>>, vector<8x128xf32>
    %cst_11 = arith.constant dense<0.000000e+00> : vector<64x128xf32>
    %25 = tpu.matmul %23, %24, %cst_11 {dimension_numbers = #tpu.dot_dimension_numbers<[1], [0], [0], [1], [0, 0, 1, 1], [], []>} : vector<64x8xf32>, vector<8x128xf32>, vector<64x128xf32> -> vector<64x128xf32>
    %cst_12 = arith.constant dense<0xFF800000> : vector<64xf32>
    %26 = vector.multi_reduction <maximumf>, %25, %cst_12 [1] : vector<64x128xf32> to vector<64xf32>
    %27 = vector.shape_cast %26 : vector<64xf32> to vector<64x1xf32>
    %28 = vector.broadcast %27 : vector<64x1xf32> to vector<64x128xf32>
    %29 = arith.subf %25, %28 : vector<64x128xf32>
    %30 = math.exp %29 : vector<64x128xf32>
    %cst_13 = arith.constant dense<0.000000e+00> : vector<64xf32>
    %31 = vector.multi_reduction <add>, %30, %cst_13 [1] : vector<64x128xf32> to vector<64xf32>
    %32 = vector.shape_cast %31 : vector<64xf32> to vector<64x1xf32>
    %c0_14 = arith.constant 0 : index
    %c8_15 = arith.constant 8 : index
    %33 = vector.load %arg8[%c0_14, %c8_15] : memref<128x64xf32, #tpu.memory_space<vmem>>, vector<128x8xf32>
    %cst_16 = arith.constant dense<0.000000e+00> : vector<64x8xf32>
    %34 = tpu.matmul %30, %33, %cst_16 {dimension_numbers = #tpu.dot_dimension_numbers<[1], [0], [0], [1], [0, 0, 1, 1], [], []>} : vector<64x128xf32>, vector<128x8xf32>, vector<64x8xf32> -> vector<64x8xf32>
    %35 = tpu.reciprocal %32 {approx = true} : vector<64x1xf32> -> vector<64x1xf32>
    %36 = vector.broadcast %35 : vector<64x1xf32> to vector<64x8xf32>
    %37 = arith.mulf %34, %36 : vector<64x8xf32>
    %c0_17 = arith.constant 0 : index
    %c8_18 = arith.constant 8 : index
    %38 = vector.load %arg9[%c0_17, %c8_18] : memref<64x64xf32, #tpu.memory_space<vmem>>, vector<64x8xf32>
    tpu.vector_store %arg9[%c0_17, %c8_18], %37 {strides = array<i32>} : memref<64x64xf32, #tpu.memory_space<vmem>>, vector<64x8xf32>,
    %39 = vector.extract_strided_slice %6 {offsets = [0, 16], sizes = [64, 8], strides = [1, 1]} : vector<64x64xf32> to vector<64x8xf32>
    %c16 = arith.constant 16 : index
    %c0_19 = arith.constant 0 : index
    %40 = vector.load %arg7[%c16, %c0_19] : memref<64x128xf32, #tpu.memory_space<vmem>>, vector<8x128xf32>
    %cst_20 = arith.constant dense<0.000000e+00> : vector<64x128xf32>
    %41 = tpu.matmul %39, %40, %cst_20 {dimension_numbers = #tpu.dot_dimension_numbers<[1], [0], [0], [1], [0, 0, 1, 1], [], []>} : vector<64x8xf32>, vector<8x128xf32>, vector<64x128xf32> -> vector<64x128xf32>
    %cst_21 = arith.constant dense<0xFF800000> : vector<64xf32>
    %42 = vector.multi_reduction <maximumf>, %41, %cst_21 [1] : vector<64x128xf32> to vector<64xf32>
    %43 = vector.shape_cast %42 : vector<64xf32> to vector<64x1xf32>
    %44 = vector.broadcast %43 : vector<64x1xf32> to vector<64x128xf32>
    %45 = arith.subf %41, %44 : vector<64x128xf32>
    %46 = math.exp %45 : vector<64x128xf32>
    %cst_22 = arith.constant dense<0.000000e+00> : vector<64xf32>
    %47 = vector.multi_reduction <add>, %46, %cst_22 [1] : vector<64x128xf32> to vector<64xf32>
    %48 = vector.shape_cast %47 : vector<64xf32> to vector<64x1xf32>
    %c0_23 = arith.constant 0 : index
    %c16_24 = arith.constant 16 : index
    %49 = vector.load %arg8[%c0_23, %c16_24] : memref<128x64xf32, #tpu.memory_space<vmem>>, vector<128x8xf32>
    %cst_25 = arith.constant dense<0.000000e+00> : vector<64x8xf32>
    %50 = tpu.matmul %46, %49, %cst_25 {dimension_numbers = #tpu.dot_dimension_numbers<[1], [0], [0], [1], [0, 0, 1, 1], [], []>} : vector<64x128xf32>, vector<128x8xf32>, vector<64x8xf32> -> vector<64x8xf32>
    %51 = tpu.reciprocal %48 {approx = true} : vector<64x1xf32> -> vector<64x1xf32>
    %52 = vector.broadcast %51 : vector<64x1xf32> to vector<64x8xf32>
    %53 = arith.mulf %50, %52 : vector<64x8xf32>
    %c0_26 = arith.constant 0 : index
    %c16_27 = arith.constant 16 : index
    %54 = vector.load %arg9[%c0_26, %c16_27] : memref<64x64xf32, #tpu.memory_space<vmem>>, vector<64x8xf32>
    tpu.vector_store %arg9[%c0_26, %c16_27], %53 {strides = array<i32>} : memref<64x64xf32, #tpu.memory_space<vmem>>, vector<64x8xf32>,
    %55 = vector.extract_strided_slice %6 {offsets = [0, 24], sizes = [64, 8], strides = [1, 1]} : vector<64x64xf32> to vector<64x8xf32>
    %c24 = arith.constant 24 : index
    %c0_28 = arith.constant 0 : index
    %56 = vector.load %arg7[%c24, %c0_28] : memref<64x128xf32, #tpu.memory_space<vmem>>, vector<8x128xf32>
    %cst_29 = arith.constant dense<0.000000e+00> : vector<64x128xf32>
    %57 = tpu.matmul %55, %56, %cst_29 {dimension_numbers = #tpu.dot_dimension_numbers<[1], [0], [0], [1], [0, 0, 1, 1], [], []>} : vector<64x8xf32>, vector<8x128xf32>, vector<64x128xf32> -> vector<64x128xf32>
    %cst_30 = arith.constant dense<0xFF800000> : vector<64xf32>
    %58 = vector.multi_reduction <maximumf>, %57, %cst_30 [1] : vector<64x128xf32> to vector<64xf32>
    %59 = vector.shape_cast %58 : vector<64xf32> to vector<64x1xf32>
    %60 = vector.broadcast %59 : vector<64x1xf32> to vector<64x128xf32>
    %61 = arith.subf %57, %60 : vector<64x128xf32>
    %62 = math.exp %61 : vector<64x128xf32>
    %cst_31 = arith.constant dense<0.000000e+00> : vector<64xf32>
    %63 = vector.multi_reduction <add>, %62, %cst_31 [1] : vector<64x128xf32> to vector<64xf32>
    %64 = vector.shape_cast %63 : vector<64xf32> to vector<64x1xf32>
    %c0_32 = arith.constant 0 : index
    %c24_33 = arith.constant 24 : index
    %65 = vector.load %arg8[%c0_32, %c24_33] : memref<128x64xf32, #tpu.memory_space<vmem>>, vector<128x8xf32>
    %cst_34 = arith.constant dense<0.000000e+00> : vector<64x8xf32>
    %66 = tpu.matmul %62, %65, %cst_34 {dimension_numbers = #tpu.dot_dimension_numbers<[1], [0], [0], [1], [0, 0, 1, 1], [], []>} : vector<64x128xf32>, vector<128x8xf32>, vector<64x8xf32> -> vector<64x8xf32>
    %67 = tpu.reciprocal %64 {approx = true} : vector<64x1xf32> -> vector<64x1xf32>
    %68 = vector.broadcast %67 : vector<64x1xf32> to vector<64x8xf32>
    %69 = arith.mulf %66, %68 : vector<64x8xf32>
    %c0_35 = arith.constant 0 : index
    %c24_36 = arith.constant 24 : index
    %70 = vector.load %arg9[%c0_35, %c24_36] : memref<64x64xf32, #tpu.memory_space<vmem>>, vector<64x8xf32>
    tpu.vector_store %arg9[%c0_35, %c24_36], %69 {strides = array<i32>} : memref<64x64xf32, #tpu.memory_space<vmem>>, vector<64x8xf32>,
    %71 = vector.extract_strided_slice %6 {offsets = [0, 32], sizes = [64, 8], strides = [1, 1]} : vector<64x64xf32> to vector<64x8xf32>
    %c32 = arith.constant 32 : index
    %c0_37 = arith.constant 0 : index
    %72 = vector.load %arg7[%c32, %c0_37] : memref<64x128xf32, #tpu.memory_space<vmem>>, vector<8x128xf32>
    %cst_38 = arith.constant dense<0.000000e+00> : vector<64x128xf32>
    %73 = tpu.matmul %71, %72, %cst_38 {dimension_numbers = #tpu.dot_dimension_numbers<[1], [0], [0], [1], [0, 0, 1, 1], [], []>} : vector<64x8xf32>, vector<8x128xf32>, vector<64x128xf32> -> vector<64x128xf32>
    %cst_39 = arith.constant dense<0xFF800000> : vector<64xf32>
    %74 = vector.multi_reduction <maximumf>, %73, %cst_39 [1] : vector<64x128xf32> to vector<64xf32>
    %75 = vector.shape_cast %74 : vector<64xf32> to vector<64x1xf32>
    %76 = vector.broadcast %75 : vector<64x1xf32> to vector<64x128xf32>
    %77 = arith.subf %73, %76 : vector<64x128xf32>
    %78 = math.exp %77 : vector<64x128xf32>
    %cst_40 = arith.constant dense<0.000000e+00> : vector<64xf32>
    %79 = vector.multi_reduction <add>, %78, %cst_40 [1] : vector<64x128xf32> to vector<64xf32>
    %80 = vector.shape_cast %79 : vector<64xf32> to vector<64x1xf32>
    %c0_41 = arith.constant 0 : index
    %c32_42 = arith.constant 32 : index
    %81 = vector.load %arg8[%c0_41, %c32_42] : memref<128x64xf32, #tpu.memory_space<vmem>>, vector<128x8xf32>
    %cst_43 = arith.constant dense<0.000000e+00> : vector<64x8xf32>
    %82 = tpu.matmul %78, %81, %cst_43 {dimension_numbers = #tpu.dot_dimension_numbers<[1], [0], [0], [1], [0, 0, 1, 1], [], []>} : vector<64x128xf32>, vector<128x8xf32>, vector<64x8xf32> -> vector<64x8xf32>
    %83 = tpu.reciprocal %80 {approx = true} : vector<64x1xf32> -> vector<64x1xf32>
    %84 = vector.broadcast %83 : vector<64x1xf32> to vector<64x8xf32>
    %85 = arith.mulf %82, %84 : vector<64x8xf32>
    %c0_44 = arith.constant 0 : index
    %c32_45 = arith.constant 32 : index
    %86 = vector.load %arg9[%c0_44, %c32_45] : memref<64x64xf32, #tpu.memory_space<vmem>>, vector<64x8xf32>
    tpu.vector_store %arg9[%c0_44, %c32_45], %85 {strides = array<i32>} : memref<64x64xf32, #tpu.memory_space<vmem>>, vector<64x8xf32>,
    %87 = vector.extract_strided_slice %6 {offsets = [0, 40], sizes = [64, 8], strides = [1, 1]} : vector<64x64xf32> to vector<64x8xf32>
    %c40 = arith.constant 40 : index
    %c0_46 = arith.constant 0 : index
    %88 = vector.load %arg7[%c40, %c0_46] : memref<64x128xf32, #tpu.memory_space<vmem>>, vector<8x128xf32>
    %cst_47 = arith.constant dense<0.000000e+00> : vector<64x128xf32>
    %89 = tpu.matmul %87, %88, %cst_47 {dimension_numbers = #tpu.dot_dimension_numbers<[1], [0], [0], [1], [0, 0, 1, 1], [], []>} : vector<64x8xf32>, vector<8x128xf32>, vector<64x128xf32> -> vector<64x128xf32>
    %cst_48 = arith.constant dense<0xFF800000> : vector<64xf32>
    %90 = vector.multi_reduction <maximumf>, %89, %cst_48 [1] : vector<64x128xf32> to vector<64xf32>
    %91 = vector.shape_cast %90 : vector<64xf32> to vector<64x1xf32>
    %92 = vector.broadcast %91 : vector<64x1xf32> to vector<64x128xf32>
    %93 = arith.subf %89, %92 : vector<64x128xf32>
    %94 = math.exp %93 : vector<64x128xf32>
    %cst_49 = arith.constant dense<0.000000e+00> : vector<64xf32>
    %95 = vector.multi_reduction <add>, %94, %cst_49 [1] : vector<64x128xf32> to vector<64xf32>
    %96 = vector.shape_cast %95 : vector<64xf32> to vector<64x1xf32>
    %c0_50 = arith.constant 0 : index
    %c40_51 = arith.constant 40 : index
    %97 = vector.load %arg8[%c0_50, %c40_51] : memref<128x64xf32, #tpu.memory_space<vmem>>, vector<128x8xf32>
    %cst_52 = arith.constant dense<0.000000e+00> : vector<64x8xf32>
    %98 = tpu.matmul %94, %97, %cst_52 {dimension_numbers = #tpu.dot_dimension_numbers<[1], [0], [0], [1], [0, 0, 1, 1], [], []>} : vector<64x128xf32>, vector<128x8xf32>, vector<64x8xf32> -> vector<64x8xf32>
    %99 = tpu.reciprocal %96 {approx = true} : vector<64x1xf32> -> vector<64x1xf32>
    %100 = vector.broadcast %99 : vector<64x1xf32> to vector<64x8xf32>
    %101 = arith.mulf %98, %100 : vector<64x8xf32>
    %c0_53 = arith.constant 0 : index
    %c40_54 = arith.constant 40 : index
    %102 = vector.load %arg9[%c0_53, %c40_54] : memref<64x64xf32, #tpu.memory_space<vmem>>, vector<64x8xf32>
    tpu.vector_store %arg9[%c0_53, %c40_54], %101 {strides = array<i32>} : memref<64x64xf32, #tpu.memory_space<vmem>>, vector<64x8xf32>,
    %103 = vector.extract_strided_slice %6 {offsets = [0, 48], sizes = [64, 8], strides = [1, 1]} : vector<64x64xf32> to vector<64x8xf32>
    %c48 = arith.constant 48 : index
    %c0_55 = arith.constant 0 : index
    %104 = vector.load %arg7[%c48, %c0_55] : memref<64x128xf32, #tpu.memory_space<vmem>>, vector<8x128xf32>
    %cst_56 = arith.constant dense<0.000000e+00> : vector<64x128xf32>
    %105 = tpu.matmul %103, %104, %cst_56 {dimension_numbers = #tpu.dot_dimension_numbers<[1], [0], [0], [1], [0, 0, 1, 1], [], []>} : vector<64x8xf32>, vector<8x128xf32>, vector<64x128xf32> -> vector<64x128xf32>
    %cst_57 = arith.constant dense<0xFF800000> : vector<64xf32>
    %106 = vector.multi_reduction <maximumf>, %105, %cst_57 [1] : vector<64x128xf32> to vector<64xf32>
    %107 = vector.shape_cast %106 : vector<64xf32> to vector<64x1xf32>
    %108 = vector.broadcast %107 : vector<64x1xf32> to vector<64x128xf32>
    %109 = arith.subf %105, %108 : vector<64x128xf32>
    %110 = math.exp %109 : vector<64x128xf32>
    %cst_58 = arith.constant dense<0.000000e+00> : vector<64xf32>
    %111 = vector.multi_reduction <add>, %110, %cst_58 [1] : vector<64x128xf32> to vector<64xf32>
    %112 = vector.shape_cast %111 : vector<64xf32> to vector<64x1xf32>
    %c0_59 = arith.constant 0 : index
    %c48_60 = arith.constant 48 : index
    %113 = vector.load %arg8[%c0_59, %c48_60] : memref<128x64xf32, #tpu.memory_space<vmem>>, vector<128x8xf32>
    %cst_61 = arith.constant dense<0.000000e+00> : vector<64x8xf32>
    %114 = tpu.matmul %110, %113, %cst_61 {dimension_numbers = #tpu.dot_dimension_numbers<[1], [0], [0], [1], [0, 0, 1, 1], [], []>} : vector<64x128xf32>, vector<128x8xf32>, vector<64x8xf32> -> vector<64x8xf32>
    %115 = tpu.reciprocal %112 {approx = true} : vector<64x1xf32> -> vector<64x1xf32>
    %116 = vector.broadcast %115 : vector<64x1xf32> to vector<64x8xf32>
    %117 = arith.mulf %114, %116 : vector<64x8xf32>
    %c0_62 = arith.constant 0 : index
    %c48_63 = arith.constant 48 : index
    %118 = vector.load %arg9[%c0_62, %c48_63] : memref<64x64xf32, #tpu.memory_space<vmem>>, vector<64x8xf32>
    tpu.vector_store %arg9[%c0_62, %c48_63], %117 {strides = array<i32>} : memref<64x64xf32, #tpu.memory_space<vmem>>, vector<64x8xf32>,
    %119 = vector.extract_strided_slice %6 {offsets = [0, 56], sizes = [64, 8], strides = [1, 1]} : vector<64x64xf32> to vector<64x8xf32>
    %c56 = arith.constant 56 : index
    %c0_64 = arith.constant 0 : index
    %120 = vector.load %arg7[%c56, %c0_64] : memref<64x128xf32, #tpu.memory_space<vmem>>, vector<8x128xf32>
    %cst_65 = arith.constant dense<0.000000e+00> : vector<64x128xf32>
    %121 = tpu.matmul %119, %120, %cst_65 {dimension_numbers = #tpu.dot_dimension_numbers<[1], [0], [0], [1], [0, 0, 1, 1], [], []>} : vector<64x8xf32>, vector<8x128xf32>, vector<64x128xf32> -> vector<64x128xf32>
    %cst_66 = arith.constant dense<0xFF800000> : vector<64xf32>
    %122 = vector.multi_reduction <maximumf>, %121, %cst_66 [1] : vector<64x128xf32> to vector<64xf32>
    %123 = vector.shape_cast %122 : vector<64xf32> to vector<64x1xf32>
    %124 = vector.broadcast %123 : vector<64x1xf32> to vector<64x128xf32>
    %125 = arith.subf %121, %124 : vector<64x128xf32>
    %126 = math.exp %125 : vector<64x128xf32>
    %cst_67 = arith.constant dense<0.000000e+00> : vector<64xf32>
    %127 = vector.multi_reduction <add>, %126, %cst_67 [1] : vector<64x128xf32> to vector<64xf32>
    %128 = vector.shape_cast %127 : vector<64xf32> to vector<64x1xf32>
    %c0_68 = arith.constant 0 : index
    %c56_69 = arith.constant 56 : index
    %129 = vector.load %arg8[%c0_68, %c56_69] : memref<128x64xf32, #tpu.memory_space<vmem>>, vector<128x8xf32>
    %cst_70 = arith.constant dense<0.000000e+00> : vector<64x8xf32>
    %130 = tpu.matmul %126, %129, %cst_70 {dimension_numbers = #tpu.dot_dimension_numbers<[1], [0], [0], [1], [0, 0, 1, 1], [], []>} : vector<64x128xf32>, vector<128x8xf32>, vector<64x8xf32> -> vector<64x8xf32>
    %131 = tpu.reciprocal %128 {approx = true} : vector<64x1xf32> -> vector<64x1xf32>
    %132 = vector.broadcast %131 : vector<64x1xf32> to vector<64x8xf32>
    %133 = arith.mulf %130, %132 : vector<64x8xf32>
    %c0_71 = arith.constant 0 : index
    %c56_72 = arith.constant 56 : index
    %134 = vector.load %arg9[%c0_71, %c56_72] : memref<64x64xf32, #tpu.memory_space<vmem>>, vector<64x8xf32>
    tpu.vector_store %arg9[%c0_71, %c56_72], %133 {strides = array<i32>} : memref<64x64xf32, #tpu.memory_space<vmem>>, vector<64x8xf32>,
    %c0_73 = arith.constant 0 : index
    %c0_74 = arith.constant 0 : index
    %135 = vector.load %arg9[%c0_73, %c0_74] : memref<64x64xf32, #tpu.memory_space<vmem>>, vector<64x64xf32>
    %c0_75 = arith.constant 0 : index
    %c0_76 = arith.constant 0 : index
    %136 = vector.load %arg4[%c0_75, %c0_76] : memref<64x64xf32, #tpu.memory_space<vmem>>, vector<64x64xf32>
    %cst_77 = arith.constant dense<0.000000e+00> : vector<64x64xf32>
    %137 = tpu.matmul %135, %136, %cst_77 {dimension_numbers = #tpu.dot_dimension_numbers<[1], [0], [0], [1], [0, 0, 1, 1], [], []>} : vector<64x64xf32>, vector<64x64xf32>, vector<64x64xf32> -> vector<64x64xf32>
    %c0_78 = arith.constant 0 : index
    %c0_79 = arith.constant 0 : index
    %c0_80 = arith.constant 0 : index
    %138 = vector.load %arg5[%c0_78, %c0_79, %c0_80] : memref<1x64x64xf32, #tpu.memory_space<vmem>>, vector<1x64x64xf32>
    %139 = vector.shape_cast %138 : vector<1x64x64xf32> to vector<64x64xf32>
    %140 = vector.shape_cast %137 : vector<64x64xf32> to vector<1x64x64xf32>
    tpu.vector_store %arg5[%c0_78, %c0_79, %c0_80], %140 {strides = array<i32>} : memref<1x64x64xf32, #tpu.memory_space<vmem>>, vector<1x64x64xf32>,
    return
  }
  func.func @transform_0(%arg0: i32, %arg1: i32) -> (i32, i32, i32) {
    %c0_i32 = arith.constant 0 : i32
    %c0_i32_0 = arith.constant 0 : i32
    %c0_i32_1 = arith.constant 0 : i32
    return %arg0, %c0_i32, %c0_i32_0 : i32, i32, i32
  }
  func.func @transform_1(%arg0: i32, %arg1: i32) -> (i32, i32) {
    %c0_i32 = arith.constant 0 : i32
    %c0_i32_0 = arith.constant 0 : i32
    %c0_i32_1 = arith.constant 0 : i32
    return %c0_i32, %c0_i32_0 : i32, i32
  }
  func.func @transform_2(%arg0: i32, %arg1: i32) -> (i32, i32) {
    %c0_i32 = arith.constant 0 : i32
    %c0_i32_0 = arith.constant 0 : i32
    %c0_i32_1 = arith.constant 0 : i32
    return %c0_i32, %c0_i32_0 : i32, i32
  }
  func.func @transform_3(%arg0: i32, %arg1: i32) -> (i32, i32, i32) {
    %c0_i32 = arith.constant 0 : i32
    %c0_i32_0 = arith.constant 0 : i32
    return %arg0, %arg1, %c0_i32 : i32, i32, i32
  }
}

</mosaic_0001>

<bundles_post_ra>
// kernel: tpu_custom_call.1
= control target key start
LH: loop header
LB: loop body
LE: loop exit
PB: predicated region body
PF: predicated region fallthrough
CT: control target
= control target key end

     0   :  { %s3901_s12 = smov 0   ;;  %s3903_s13 = smov 0   ;;  %s5251_s0 = inlined_call_operand.vmem [shape: f32[2,128,64], index: 0, kind: input, shape index: {}]   ;;  %s5252_s1 = inlined_call_operand.vmem [shape: f32[64,192], index: 1, kind: input, shape index: {}]   ;;  %s5253_s2 = inlined_call_operand.vmem [shape: f32[64,64], index: 2, kind: input, shape index: {}]   ;;  %s5254_s3 = inlined_call_operand.vmem [shape: f32[2,128,64], index: 3, kind: output, shape index: {}]  }
   0x1   :  { %s3905_s14 = smov 0   ;;  %s3907_s15 = smov 0  }
   0x2   :  { %s3909_s16 = smov 0  }
   0x3 LB: > { %s22_s17 = sadd.s32 1, %s3856_s14  ;;  %s25_s18 = sadd.s32 1, %s3860_s15  ;;  %s3864_s16 = sphi %s3909_s16, %s13_s16   ;;  %s3860_s15 = sphi %s3907_s15, %s5258_s15   ;;  %s3856_s14 = sphi %s3905_s14, %s5257_s14   ;;  %s3852_s13 = sphi %s3903_s13, %s5256_s13   ;;  %s3848_s12 = sphi %s3901_s12, %s5255_s12  }
   0x4   : > { %p23_p0 = scmp.ge.s32.totalorder %s22_s17, 2  ;;  %p3095_p1 = scmp.ge.s32.totalorder %s3864_s16, 1 }
   0x5   : > { %p151_p2 = scmp.lt.s32.totalorder %s3864_s16, 5 }
   0x6   : > { %s5260_s17 = smov (%p23_p0, %s22_s17), 0  ;;  %s5262_s18 = smov (!%p23_p0, %s25_s18), %s3860_s15 }
   0x7   : > { %p152_p3 = pnand %p3095_p1, %p151_p2  ;;  %p27_p4 = scmp.ge.s32.totalorder %s5262_s18, 2 }
   0x8   : > { %p179_p5 = scmp.lt.s32.totalorder (!%p152_p3), %s3852_s13, 1  ;;  %s3098_s19 = sshll.u32 (!%p152_p3), %s3848_s12, 3 }
   0x9   : > { %s5264_s18 = smov (%p27_p4, %s5262_s18), 0  ;;  %155 = sbr.rel (%p152_p3) target bundleno = 2333 (0x91d), region = 32 }
   0xa   : > { %p187_p6 = scmp.lt.s32.totalorder (!%p152_p3), %s3098_s19, 15  ;;  %p3101_p7 = scmp.ne.s32.totalorder (!%p152_p3), %s3848_s12, 0 }
   0xe   : > { %s5266_s13 = smov (!%p179_p5, %s3852_s13), 1  ;;  %s5268_s19 = smov (!%p187_p6, %s3098_s19), 15 }
   0xf   : > { %s3209_s20 = sshll.u32 %s5266_s13, 7  ;;  %s3099_s21 = sshll.u32 %s5266_s13, 4 }
  0x10   : > { %s3937_s24 = scalar_lea.vmem %s5251_s0, %s3209_s20  ;;  %s190_s25 = sadd.s32 %s3099_s21, %s5268_s19 }
  0x11   : > { %s3100_s26 = sshll.u32 %s190_s25, 3  ;;  %197 = sbr.rel (%p3101_p7) target bundleno = 502 (0x1f6), region = 36 }
  0x12   : > { %s3942_s29 = scalar_lea.vmem %s5254_s3, %s3100_s26  ;;  %s3866_s26 = smov (!%p3101_p7), 64  }
  0x16   : > { %v228_v0 = vld [vmem:[%s5252_s1 + $0x70] sm:$0xff]  ;;  %v226_v1 = vld [vmem:[%s5252_s1 + $0x60] sm:$0xff]  ;;  %vm230_vm0 = vcmask 523264   ;;  %v3980_v10 = vld [vmem:[%s3937_s24 + $0x8] sm:$0xff] }
  0x17   : > { %287 = vmatpush.msra.mxu0 %v228_v0  ;;  %3210 = vmatpush.msra.mxu2 %v228_v0  ;;  %v224_v2 = vld [vmem:[%s5252_s1 + $0x50] sm:$0xff]  ;;  %v222_v3 = vld [vmem:[%s5252_s1 + $0x40] sm:$0xff]  ;;  %v3983_v11 = vld [vmem:[%s3937_s24 + $0x48] sm:$0xff] }
  0x18   : > { %v220_v4 = vld [vmem:[%s5252_s1 + $0x30] sm:$0xff]  ;;  %v218_v5 = vld [vmem:[%s5252_s1 + $0x20] sm:$0xff]  ;;  %v4000_v14 = vld [vmem:[%s3937_s24 + $0x18] sm:$0xff] }
  0x19   : > { %288 = vmatpush.msra.mxu0 %v226_v1  ;;  %3211 = vmatpush.msra.mxu2 %v226_v1  ;;  %v216_v6 = vld [vmem:[%s5252_s1 + $0x10] sm:$0xff]  ;;  %v214_v7 = vld [vmem:[%s5252_s1] sm:$0xff]  ;;  %v4003_v15 = vld [vmem:[%s3937_s24 + $0x58] sm:$0xff] }
  0x1a   : > { %v3970_v8 = vld [vmem:[%s3937_s24] sm:$0xff]  ;;  %v3990_v12 = vld [vmem:[%s3937_s24 + $0x10] sm:$0xff]  ;;  %v4020_v18 = vld [vmem:[%s3937_s24 + $0x28] sm:$0xff] }
  0x1b   : > { %289 = vmatpush.msra.mxu0 %v224_v2  ;;  %3212 = vmatpush.msra.mxu2 %v224_v2  ;;  %v3973_v9 = vld [vmem:[%s3937_s24 + $0x40] sm:$0xff]  ;;  %v3993_v13 = vld [vmem:[%s3937_s24 + $0x50] sm:$0xff]  ;;  %v4023_v19 = vld [vmem:[%s3937_s24 + $0x68] sm:$0xff] }
  0x1c   : > { %v4010_v16 = vld [vmem:[%s3937_s24 + $0x20] sm:$0xff]  ;;  %v4030_v20 = vld [vmem:[%s3937_s24 + $0x30] sm:$0xff]  ;;  %v4040_v22 = vld [vmem:[%s3937_s24 + $0x38] sm:$0xff] }
  0x1d   : > { %290 = vmatpush.msra.mxu0 %v222_v3  ;;  %3213 = vmatpush.msra.mxu2 %v222_v3  ;;  %v4013_v17 = vld [vmem:[%s3937_s24 + $0x60] sm:$0xff]  ;;  %v4033_v21 = vld [vmem:[%s3937_s24 + $0x70] sm:$0xff]  ;;  %v4043_v23 = vld [vmem:[%s3937_s24 + $0x78] sm:$0xff] }
  0x1e   : > { %v229_v40 = vld [vmem:[%s5252_s1 + $0x78] sm:$0xff]  ;;  %v227_v41 = vld [vmem:[%s5252_s1 + $0x68] sm:$0xff] }
  0x1f   : > { %291 = vmatpush.msra.mxu0 %v220_v4  ;;  %3214 = vmatpush.msra.mxu2 %v220_v4  ;;  %v225_v42 = vld [vmem:[%s5252_s1 + $0x58] sm:$0xff]  ;;  %v223_v43 = vld [vmem:[%s5252_s1 + $0x48] sm:$0xff] }
  0x20   : > { %3218 = vmatpush.msra.mxu3 %v229_v40  ;;  %352 = vmatpush.msra.mxu1 %v229_v40  ;;  %v221_v44 = vld [vmem:[%s5252_s1 + $0x38] sm:$0xff]  ;;  %v219_v45 = vld [vmem:[%s5252_s1 + $0x28] sm:$0xff] }
  0x21   : > { %292 = vmatpush.msra.mxu0 %v218_v5  ;;  %3215 = vmatpush.msra.mxu2 %v218_v5  ;;  %v217_v46 = vld [vmem:[%s5252_s1 + $0x18] sm:$0xff]  ;;  %v215_v48 = vld [vmem:[%s5252_s1 + $0x8] sm:$0xff] }
  0x22   : > { %3219 = vmatpush.msra.mxu3 %v227_v41  ;;  %353 = vmatpush.msra.mxu1 %v227_v41 }
  0x23   : > { %293 = vmatpush.msra.mxu0 %v216_v6  ;;  %3216 = vmatpush.msra.mxu2 %v216_v6 }
  0x24   : > { %3220 = vmatpush.msra.mxu3 %v225_v42  ;;  %354 = vmatpush.msra.mxu1 %v225_v42 }
  0x25   : > { %294 = vmatpush.msra.mxu0 %v214_v7  ;;  %3217 = vmatpush.msra.mxu2 %v214_v7 }
  0x26   : > { %3102 = vmatmul.msk.f32.vlgmr.msra.gmra.mxu0 %vm230_vm0, %v3970_v8  ;;  %3110 = vmatmul.msk.f32.vlgmr.msra.gmra.mxu2 %vm230_vm0, %v3973_v9 }
  0x27   : > { %3221 = vmatpush.msra.mxu3 %v223_v43  ;;  %355 = vmatpush.msra.mxu1 %v223_v43 }
  0x29   : > { %3222 = vmatpush.msra.mxu3 %v221_v44  ;;  %356 = vmatpush.msra.mxu1 %v221_v44 }
  0x2b   : > { %3223 = vmatpush.msra.mxu3 %v219_v45  ;;  %357 = vmatpush.msra.mxu1 %v219_v45 }
  0x2d   : > { %3224 = vmatpush.msra.mxu3 %v217_v46  ;;  %358 = vmatpush.msra.mxu1 %v217_v46 }
  0x2e   : > { %3103 = vmatmul.msk.f32.gmra.mxu0 %vm230_vm0, %v3980_v10  ;;  %3111 = vmatmul.msk.f32.gmra.mxu2 %vm230_vm0, %v3983_v11 }
  0x2f   : > { %3225 = vmatpush.msra.mxu3 %v215_v48  ;;  %359 = vmatpush.msra.mxu1 %v215_v48 }
  0x30   : > { %3126 = vmatmul.msk.f32.vlgmr.msra.gmra.mxu3 %vm230_vm0, %v3973_v9  ;;  %3118 = vmatmul.msk.f32.vlgmr.msra.gmra.mxu1 %vm230_vm0, %v3970_v8 }
  0x36   : > { %3104 = vmatmul.msk.f32.gmra.mxu0 %vm230_vm0, %v3990_v12  ;;  %3112 = vmatmul.msk.f32.gmra.mxu2 %vm230_vm0, %v3993_v13 }
  0x38   : > { %3127 = vmatmul.msk.f32.gmra.mxu3 %vm230_vm0, %v3983_v11  ;;  %3119 = vmatmul.msk.f32.gmra.mxu1 %vm230_vm0, %v3980_v10 }
  0x3e   : > { %3105 = vmatmul.msk.f32.gmra.mxu0 %vm230_vm0, %v4000_v14  ;;  %3113 = vmatmul.msk.f32.gmra.mxu2 %vm230_vm0, %v4003_v15 }
  0x40   : > { %3128 = vmatmul.msk.f32.gmra.mxu3 %vm230_vm0, %v3993_v13  ;;  %3120 = vmatmul.msk.f32.gmra.mxu1 %vm230_vm0, %v3990_v12 }
  0x46   : > { %3106 = vmatmul.msk.f32.gmra.mxu0 %vm230_vm0, %v4010_v16  ;;  %3114 = vmatmul.msk.f32.gmra.mxu2 %vm230_vm0, %v4013_v17 }
  0x48   : > { %3129 = vmatmul.msk.f32.gmra.mxu3 %vm230_vm0, %v4003_v15  ;;  %3121 = vmatmul.msk.f32.gmra.mxu1 %vm230_vm0, %v4000_v14 }
  0x4e   : > { %3107 = vmatmul.msk.f32.gmra.mxu0 %vm230_vm0, %v4020_v18  ;;  %3115 = vmatmul.msk.f32.gmra.mxu2 %vm230_vm0, %v4023_v19 }
  0x50   : > { %3130 = vmatmul.msk.f32.gmra.mxu3 %vm230_vm0, %v4013_v17  ;;  %3122 = vmatmul.msk.f32.gmra.mxu1 %vm230_vm0, %v4010_v16 }
  0x56   : > { %3108 = vmatmul.msk.f32.gmra.mxu0 %vm230_vm0, %v4030_v20  ;;  %3116 = vmatmul.msk.f32.gmra.mxu2 %vm230_vm0, %v4033_v21 }
  0x58   : > { %3131 = vmatmul.msk.f32.gmra.mxu3 %vm230_vm0, %v4023_v19  ;;  %3123 = vmatmul.msk.f32.gmra.mxu1 %vm230_vm0, %v4020_v18 }
  0x5e   : > { %3109 = vmatmul.msk.f32.gmra.mxu0 %vm230_vm0, %v4040_v22  ;;  %3117 = vmatmul.msk.f32.gmra.mxu2 %vm230_vm0, %v4043_v23 }
  0x60   : > { %3132 = vmatmul.msk.f32.gmra.mxu3 %vm230_vm0, %v4033_v21  ;;  %3124 = vmatmul.msk.f32.gmra.mxu1 %vm230_vm0, %v4030_v20 }
  0x68   : > { %3133 = vmatmul.msk.f32.gmra.mxu3 %vm230_vm0, %v4043_v23  ;;  %3125 = vmatmul.msk.f32.gmra.mxu1 %vm230_vm0, %v4040_v22 }
  0xa3   : > { %v296_v24 = vpop.f32.mrf.mxu0 }
  0xa4   : > { %409 = vst.msk [vmem:[#allocation2] sm:$0xff] %vm230_vm0, %v296_v24  ;;  %441 = vrot.lane.b32.xlu0 %v296_v24, %s3866_s26 }
  0xa9   : > { %v320_v25 = vpop.f32.mrf.mxu2 }
  0xaa   : > { %417 = vst.msk [vmem:[#allocation2 + $0x40] sm:$0xff] %vm230_vm0, %v320_v25 }
  0xab   : > { %v299_v26 = vpop.f32.mrf.mxu0 }
  0xac   : > { %410 = vst.msk [vmem:[#allocation2 + $0x8] sm:$0xff] %vm230_vm0, %v299_v26  ;;  %443 = vrot.lane.b32.xlu0 %v299_v26, %s3866_s26 }
  0xad   : > { %v361_v0 = vpop.f32.mrf.mxu1 }
  0xae   : > { %529 = vst.msk [vmem:[#allocation4] sm:$0xff] %vm230_vm0, %v361_v0 }
  0xb1   : > { %v323_v27 = vpop.f32.mrf.mxu2 }
  0xb2   : > { %418 = vst.msk [vmem:[#allocation2 + $0x48] sm:$0xff] %vm230_vm0, %v323_v27 }
  0xb3   : > { %v302_v28 = vpop.f32.mrf.mxu0  ;;  %v385_v1 = vpop.f32.mrf.mxu3 }
  0xb4   : > { %411 = vst.msk [vmem:[#allocation2 + $0x10] sm:$0xff] %vm230_vm0, %v302_v28  ;;  %445 = vrot.lane.b32.xlu1 %v302_v28, %s3866_s26 }
  0xb5   : > { %537 = vst.msk [vmem:[#allocation4 + $0x40] sm:$0xff] %vm230_vm0, %v385_v1  ;;  %v364_v2 = vpop.f32.mrf.mxu1 }
  0xb6   : > { %530 = vst.msk [vmem:[#allocation4 + $0x8] sm:$0xff] %vm230_vm0, %v364_v2 }
  0xb9   : > { %v326_v29 = vpop.f32.mrf.mxu2 }
  0xba   : > { %419 = vst.msk [vmem:[#allocation2 + $0x50] sm:$0xff] %vm230_vm0, %v326_v29 }
  0xbb   : > { %v305_v30 = vpop.f32.mrf.mxu0  ;;  %v388_v3 = vpop.f32.mrf.mxu3 }
  0xbc   : > { %412 = vst.msk [vmem:[#allocation2 + $0x18] sm:$0xff] %vm230_vm0, %v305_v30  ;;  %447 = vrot.lane.b32.xlu1 %v305_v30, %s3866_s26 }
  0xbd   : > { %538 = vst.msk [vmem:[#allocation4 + $0x48] sm:$0xff] %vm230_vm0, %v388_v3  ;;  %v367_v4 = vpop.f32.mrf.mxu1 }
  0xbe   : > { %531 = vst.msk [vmem:[#allocation4 + $0x10] sm:$0xff] %vm230_vm0, %v367_v4 }
  0xc1   : > { %v329_v31 = vpop.f32.mrf.mxu2 }
  0xc2   : > { %420 = vst.msk [vmem:[#allocation2 + $0x58] sm:$0xff] %vm230_vm0, %v329_v31 }
  0xc3   : > { %v308_v32 = vpop.f32.mrf.mxu0  ;;  %v391_v5 = vpop.f32.mrf.mxu3 }
  0xc4   : > { %413 = vst.msk [vmem:[#allocation2 + $0x20] sm:$0xff] %vm230_vm0, %v308_v32  ;;  %461 = vrot.lane.b32.xlu1 %v326_v29, %s3866_s26  ;;  %449 = vrot.lane.b32.xlu2 %v308_v32, %s3866_s26 }
  0xc5   : > { %539 = vst.msk [vmem:[#allocation4 + $0x50] sm:$0xff] %vm230_vm0, %v391_v5  ;;  %v370_v6 = vpop.f32.mrf.mxu1 }
  0xc6   : > { %532 = vst.msk [vmem:[#allocation4 + $0x18] sm:$0xff] %vm230_vm0, %v370_v6 }
  0xc9   : > { %v332_v33 = vpop.f32.mrf.mxu2 }
  0xca   : > { %421 = vst.msk [vmem:[#allocation2 + $0x60] sm:$0xff] %vm230_vm0, %v332_v33 }
  0xcb   : > { %v311_v34 = vpop.f32.mrf.mxu0  ;;  %v394_v7 = vpop.f32.mrf.mxu3 }
  0xcc   : > { %414 = vst.msk [vmem:[#allocation2 + $0x28] sm:$0xff] %vm230_vm0, %v311_v34  ;;  %451 = vrot.lane.b32.xlu2 %v311_v34, %s3866_s26 }
  0xcd   : > { %540 = vst.msk [vmem:[#allocation4 + $0x58] sm:$0xff] %vm230_vm0, %v394_v7  ;;  %v373_v8 = vpop.f32.mrf.mxu1 }
  0xce   : > { %533 = vst.msk [vmem:[#allocation4 + $0x20] sm:$0xff] %vm230_vm0, %v373_v8 }
  0xd1   : > { %v335_v35 = vpop.f32.mrf.mxu2 }
  0xd2   : > { %422 = vst.msk [vmem:[#allocation2 + $0x68] sm:$0xff] %vm230_vm0, %v335_v35  ;;  %467 = vrot.lane.b32.xlu1 %v335_v35, %s3866_s26 }
  0xd3   : > { %v314_v36 = vpop.f32.mrf.mxu0  ;;  %v397_v9 = vpop.f32.mrf.mxu3 }
  0xd4   : > { %415 = vst.msk [vmem:[#allocation2 + $0x30] sm:$0xff] %vm230_vm0, %v314_v36  ;;  %457 = vrot.lane.b32.xlu2 %v320_v25, %s3866_s26  ;;  %453 = vrot.lane.b32.xlu0 %v314_v36, %s3866_s26 }
  0xd5   : > { %541 = vst.msk [vmem:[#allocation4 + $0x60] sm:$0xff] %vm230_vm0, %v397_v9  ;;  %v376_v11 = vpop.f32.mrf.mxu1 }
  0xd6   : > { %534 = vst.msk [vmem:[#allocation4 + $0x28] sm:$0xff] %vm230_vm0, %v376_v11 }
  0xd9   : > { %v338_v37 = vpop.f32.mrf.mxu2 }
  0xda   : > { %423 = vst.msk [vmem:[#allocation2 + $0x70] sm:$0xff] %vm230_vm0, %v338_v37 }
  0xdb   : > { %v317_v38 = vpop.f32.mrf.mxu0  ;;  %v400_v12 = vpop.f32.mrf.mxu3 }
  0xdc   : > { %416 = vst.msk [vmem:[#allocation2 + $0x38] sm:$0xff] %vm230_vm0, %v317_v38  ;;  %463 = vrot.lane.b32.xlu2 %v329_v31, %s3866_s26  ;;  %459 = vrot.lane.b32.xlu0 %v323_v27, %s3866_s26 }
  0xdd   : > { %455 = vrot.lane.b32.xlu1 %v317_v38, %s3866_s26  ;;  %542 = vst.msk [vmem:[#allocation4 + $0x68] sm:$0xff] %vm230_vm0, %v400_v12  ;;  %v379_v14 = vpop.f32.mrf.mxu1 }
  0xde   : > { %535 = vst.msk [vmem:[#allocation4 + $0x30] sm:$0xff] %vm230_vm0, %v379_v14 }
  0xe1   : > { %v341_v39 = vpop.f32.mrf.mxu2 }
  0xe2   : > { %424 = vst.msk [vmem:[#allocation2 + $0x78] sm:$0xff] %vm230_vm0, %v341_v39 }
  0xe3   : > { %v403_v15 = vpop.f32.mrf.mxu3 }
  0xe4   : > { %465 = vrot.lane.b32.xlu0 %v332_v33, %s3866_s26  ;;  %469 = vrot.lane.b32.xlu2 %v338_v37, %s3866_s26  ;;  %543 = vst.msk [vmem:[#allocation4 + $0x70] sm:$0xff] %vm230_vm0, %v403_v15 }
  0xe5   : > { %v382_v17 = vpop.f32.mrf.mxu1 }
  0xe6   : > { %536 = vst.msk [vmem:[#allocation4 + $0x38] sm:$0xff] %vm230_vm0, %v382_v17 }
  0xeb   : > { %v406_v18 = vpop.f32.mrf.mxu3 }
  0xec   : > { %471 = vrot.lane.b32.xlu0 %v341_v39, %s3866_s26  ;;  %544 = vst.msk [vmem:[#allocation4 + $0x78] sm:$0xff] %vm230_vm0, %v406_v18 }
 0x116   : > { %v442_v47 = vpop.permute.xlu0 %441 }
 0x117   : > { %489 = vxpose.xlu1.b32.start [1/16] (narrow) %v442_v47, 64 }
 0x11e   : > { %v444_v49 = vpop.permute.xlu0 %443  ;;  %v450_v52 = vpop.permute.xlu2 %449 }
 0x11f   : > { %490 = vxpose.xlu1.b32.cont [2/16] (narrow) %v444_v49, 64 }
 0x126   : > { %v446_v50 = vpop.permute.xlu1 %445  ;;  %v452_v54 = vpop.permute.xlu2 %451 }
 0x127   : > { %491 = vxpose.xlu1.b32.cont [3/16] (narrow) %v446_v50, 64 }
 0x12e   : > { %v448_v51 = vpop.permute.xlu1 %447  ;;  %v458_v58 = vpop.permute.xlu2 %457 }
 0x12f   : > { %492 = vxpose.xlu1.b32.cont [4/16] (narrow) %v448_v51, 64 }
 0x136   : > { %v462_v53 = vpop.permute.xlu1 %461  ;;  %v464_v60 = vpop.permute.xlu2 %463 }
 0x137   : > { %493 = vxpose.xlu1.b32.cont [5/16] (narrow) %v450_v52, 64 }
 0x13e   : > { %v470_v62 = vpop.permute.xlu2 %469 }
 0x13f   : > { %494 = vxpose.xlu1.b32.cont [6/16] (narrow) %v452_v54, 64 }
 0x144   : > { %v468_v55 = vpop.permute.xlu1 %467 }
 0x146   : > { %v454_v56 = vpop.permute.xlu0 %453 }
 0x147   : > { %495 = vxpose.xlu1.b32.cont [7/16] (narrow) %v454_v56, 64 }
 0x14e   : > { %v460_v59 = vpop.permute.xlu0 %459 }
 0x14f   : > { %v456_v57 = vpop.permute.xlu1 %455 }
 0x150   : > { %496 = vxpose.xlu1.b32.cont [8/16] (narrow) %v456_v57, 64 }
 0x156   : > { %v466_v61 = vpop.permute.xlu0 %465 }
 0x158   : > { %497 = vxpose.xlu1.b32.cont [9/16] (narrow) %v458_v58, 64 }
 0x15e   : > { %v472_v63 = vpop.permute.xlu0 %471 }
 0x160   : > { %498 = vxpose.xlu1.b32.cont [10/16] (narrow) %v460_v59, 64 }
 0x168   : > { %499 = vxpose.xlu1.b32.cont [11/16] (narrow) %v462_v53, 64 }
 0x170   : > { %500 = vxpose.xlu1.b32.cont [12/16] (narrow) %v464_v60, 64 }
 0x178   : > { %501 = vxpose.xlu1.b32.cont [13/16] (narrow) %v466_v61, 64 }
 0x180   : > { %502 = vxpose.xlu1.b32.cont [14/16] (narrow) %v468_v55, 64 }
 0x188   : > { %503 = vxpose.xlu1.b32.cont [15/16] (narrow) %v470_v62, 64 }
 0x190   : > { %504 = vxpose.xlu1.b32.end [16/16] (narrow) %v472_v63, 64 }
 0x1bc   : > { %v505_v10 = vpop.trf.xlu1 }
 0x1bd   : > { %521 = vst [vmem:[#allocation3 + $0x30] sm:$0xff] %v505_v10 }
 0x1c4   : > { %v506_v13 = vpop.trf.xlu1 }
 0x1c5   : > { %522 = vst [vmem:[#allocation3] sm:$0xff] %v506_v13 }
 0x1cc   : > { %v507_v16 = vpop.trf.xlu1 }
 0x1cd   : > { %523 = vst [vmem:[#allocation3 + $0x18] sm:$0xff] %v507_v16 }
 0x1d4   : > { %v508_v19 = vpop.trf.xlu1 }
 0x1d5   : > { %524 = vst [vmem:[#allocation3 + $0x10] sm:$0xff] %v508_v19 }
 0x1dc   : > { %v509_v20 = vpop.trf.xlu1 }
 0x1dd   : > { %525 = vst [vmem:[#allocation3 + $0x8] sm:$0xff] %v509_v20 }
 0x1e4   : > { %v510_v21 = vpop.trf.xlu1 }
 0x1e5   : > { %526 = vst [vmem:[#allocation3 + $0x20] sm:$0xff] %v510_v21 }
 0x1ec   : > { %v511_v22 = vpop.trf.xlu1 }
 0x1ed   : > { %527 = vst [vmem:[#allocation3 + $0x28] sm:$0xff] %v511_v22 }
 0x1f4   : > { %v512_v23 = vpop.trf.xlu1 }
 0x1f5   : > { %528 = vst [vmem:[#allocation3 + $0x38] sm:$0xff] %v512_v23 }
 0x1f6 PF: > { %v555_v24 = vld [vmem:[#allocation3 + $0x30] sm:$0xff]  ;;  %s3134_s22 = sshll.u32 %s3848_s12, 6  ;;  %vm556_vm1 = vcmask 64512   ;;  %s3867_s12 = smov 120   ;;  %v904_v29 = vld [vmem:[#allocation4 + $0x78] sm:$0xff]  ;;  %v893_v32 = vld [vmem:[#allocation4 + $0x20] sm:$0xff] }
 0x1f7   : > { %596 = vmatpush.msra.mxu0 %v555_v24  ;;  %3226 = vmatpush.msra.mxu2 %v555_v24  ;;  %s4154_s23 = scalar_lea.vmem [#allocation2], %s3134_s22  ;;  %v903_v30 = vld [vmem:[#allocation4 + $0x70] sm:$0xff]  ;;  %v894_v33 = vld [vmem:[#allocation4 + $0x28] sm:$0xff]  ;;  %v897_v38 = vld [vmem:[#allocation4 + $0x40] sm:$0xff]  ;;  %s3868_s25 = smov 112   ;;  %vm1058_vm2 = vcmask 130112  }
 0x1f8   : > { %v4157_v25 = vld [vmem:[%s4154_s23 + $0x20] sm:$0xff]  ;;  %v4160_v26 = vld [vmem:[%s4154_s23 + $0x10] sm:$0xff]  ;;  %v4174_v28 = vld [vmem:[%s4154_s23 + $0x8] sm:$0xff]  ;;  %694 = vmatpush.msra.mxu1 %v904_v29  ;;  %v4194_v35 = vpack.i.bf16 %v894_v33, %v893_v32  ;;  %v4228_v53 = vpack.i.bf16 %v904_v29, %v903_v30  ;;  %s3869_s26 = smov 104   ;;  %s3870_s24 = smov 96   ;;  %vm1366_vm3 = vcmask 195712  }
 0x1f9   : > { %v4163_v27 = vld [vmem:[%s4154_s23] sm:$0xff]  ;;  %3139 = vmatmul.msk.f32.vlgmr.msra.gmra.mxu2 %vm556_vm1, %v4157_v25  ;;  %764 = vrot.lane.b32.xlu0 %v4160_v26, %s3867_s12  ;;  %v4179_v31 = vld [vmem:[%s4154_s23 + $0x28] sm:$0xff]  ;;  %v4190_v34 = vld [vmem:[%s4154_s23 + $0x18] sm:$0xff]  ;;  %s3871_s27 = smov 88   ;;  %s3872_s28 = smov 16   ;;  %vm1674_vm4 = vcmask 261312  }
 0x1fa   : > { %760 = vrot.lane.b32.xlu1 %v4163_v27, %s3867_s12  ;;  %3135 = vmatmul.msk.f32.vlgmr.msra.gmra.mxu0 %vm556_vm1, %v4163_v27  ;;  %v4197_v36 = vld [vmem:[%s4154_s23 + $0x30] sm:$0xff]  ;;  %v4200_v37 = vld [vmem:[%s4154_s23 + $0x38] sm:$0xff]  ;;  %v898_v39 = vld [vmem:[#allocation4 + $0x48] sm:$0xff]  ;;  %s3873_s30 = smov 8   ;;  %s3874_s4 = smov 80   ;;  %vm1982_vm5 = vcmask 326912  }
 0x1fb   : > { %762 = vrot.lane.b32.xlu2 %v4174_v28, %s3867_s12  ;;  %695 = vmatpush.msra.mxu1 %v903_v30  ;;  %v891_v40 = vld [vmem:[#allocation4 + $0x10] sm:$0xff]  ;;  %v892_v41 = vld [vmem:[#allocation4 + $0x18] sm:$0xff]  ;;  %v889_v42 = vld [vmem:[#allocation4] sm:$0xff]  ;;  %v4212_v44 = vpack.i.bf16 %v898_v39, %v897_v38  ;;  %s3875_s5 = smov 72   ;;  %s3876_s6 = smov 24   ;;  %vm2290_vm6 = vcmask 392512  }
 0x1fc   : > { %v890_v43 = vld [vmem:[#allocation4 + $0x8] sm:$0xff]  ;;  %v4214_v45 = vpack.i.bf16 %v892_v41, %v891_v40  ;;  %v899_v48 = vld [vmem:[#allocation4 + $0x50] sm:$0xff]  ;;  %v900_v49 = vld [vmem:[#allocation4 + $0x58] sm:$0xff]  ;;  %s3877_s7 = smov 48   ;;  %s3878_s8 = smov 32   ;;  %vm2598_vm7 = vcmask 458112  }
 0x1fd   : > { %v4216_v46 = vpack.i.bf16 %v890_v43, %v889_v42  ;;  %v902_v47 = vld [vmem:[#allocation4 + $0x68] sm:$0xff]  ;;  %v895_v50 = vld [vmem:[#allocation4 + $0x30] sm:$0xff]  ;;  %v896_v51 = vld [vmem:[#allocation4 + $0x38] sm:$0xff]  ;;  %v4230_v54 = vpack.i.bf16 %v900_v49, %v899_v48  ;;  %s3879_s9 = smov 40   ;;  %s3880_s10 = smov 56   ;;  %vm2906_vm8 = vcmask 523712  }
 0x1fe   : > { %696 = vmatpush.msra.mxu1 %v902_v47  ;;  %v901_v52 = vld [vmem:[#allocation4 + $0x60] sm:$0xff]  ;;  %v4232_v55 = vpack.i.bf16 %v896_v51, %v895_v50  ;;  %v1067_v58 = vld [vmem:[#allocation3 + $0x18] sm:$0xff]  ;;  %vm2931_vm9 = vcmask 523264  }
 0x1ff   : > { %v4240_v56 = vpack.i.bf16 %v902_v47, %v901_v52  ;;  %v759_v57 = vld [vmem:[#allocation3] sm:$0xff]  ;;  %1115 = vmatpush.msrb.mxu0 %v1067_v58 }
 0x200   : > { %697 = vmatpush.msra.mxu1 %v901_v52  ;;  %807 = vmatpush.msrb.mxu2 %v759_v57 }
 0x201   : > { %3140 = vmatmul.msk.f32.gmra.mxu2 %vm556_vm1, %v4179_v31  ;;  %770 = vrot.lane.b32.xlu0 %v4179_v31, %s3867_s12 }
 0x202   : > { %768 = vrot.lane.b32.xlu1 %v4157_v25, %s3867_s12  ;;  %3136 = vmatmul.msk.f32.gmra.mxu0 %vm556_vm1, %v4174_v28 }
 0x203   : > { %766 = vrot.lane.b32.xlu2 %v4190_v34, %s3867_s12  ;;  %698 = vmatpush.msra.mxu1 %v900_v49 }
 0x205   : > { %699 = vmatpush.msra.mxu1 %v899_v48 }
 0x207   : > { %700 = vmatpush.msra.mxu1 %v898_v39 }
 0x209   : > { %3141 = vmatmul.msk.f32.gmra.mxu2 %vm556_vm1, %v4197_v36  ;;  %3293 = vrot.lane.b32.xlu0 %v4194_v35, %s3867_s12 }
 0x20a   : > { %774 = vrot.lane.b32.xlu1 %v4200_v37, %s3867_s12  ;;  %3137 = vmatmul.msk.f32.gmra.mxu0 %vm556_vm1, %v4160_v26 }
 0x20b   : > { %772 = vrot.lane.b32.xlu2 %v4197_v36, %s3867_s12  ;;  %701 = vmatpush.msra.mxu1 %v897_v38 }
 0x20d   : > { %702 = vmatpush.msra.mxu1 %v896_v51 }
 0x20f   : > { %703 = vmatpush.msra.mxu1 %v895_v50 }
 0x211   : > { %3303 = vrot.lane.b32.xlu0 %v4212_v44, %s3867_s12  ;;  %3142 = vmatmul.msk.f32.gmra.mxu2 %vm556_vm1, %v4200_v37 }
 0x212   : > { %3288 = vrot.lane.b32.xlu1 %v4214_v45, %s3867_s12  ;;  %3138 = vmatmul.msk.f32.gmra.mxu0 %vm556_vm1, %v4190_v34 }
 0x213   : > { %3283 = vrot.lane.b32.xlu2 %v4216_v46, %s3867_s12  ;;  %704 = vmatpush.msra.mxu1 %v894_v33 }
 0x215   : > { %705 = vmatpush.msra.mxu1 %v893_v32 }
 0x217   : > { %706 = vmatpush.msra.mxu1 %v892_v41 }
 0x219   : > { %3318 = vrot.lane.b32.xlu0 %v4228_v53, %s3867_s12  ;;  %707 = vmatpush.msra.mxu1 %v891_v40 }
 0x21a   : > { %3308 = vrot.lane.b32.xlu1 %v4230_v54, %s3867_s12 }
 0x21b   : > { %3298 = vrot.lane.b32.xlu2 %v4232_v55, %s3867_s12  ;;  %708 = vmatpush.msra.mxu1 %v890_v43 }
 0x21d   : > { %709 = vmatpush.msra.mxu1 %v889_v42 }
 0x221   : > { %1068 = vrot.lane.b32.xlu0 %v4163_v27, %s3868_s25 }
 0x222   : > { %1070 = vrot.lane.b32.xlu1 %v4174_v28, %s3868_s25 }
 0x223   : > { %3313 = vrot.lane.b32.xlu2 %v4240_v56, %s3867_s12 }
 0x229   : > { %1074 = vrot.lane.b32.xlu0 %v4190_v34, %s3868_s25 }
 0x22a   : > { %1076 = vrot.lane.b32.xlu1 %v4157_v25, %s3868_s25 }
 0x22b   : > { %1072 = vrot.lane.b32.xlu2 %v4160_v26, %s3868_s25 }
 0x231   : > { %1080 = vrot.lane.b32.xlu0 %v4197_v36, %s3868_s25 }
 0x232   : > { %1082 = vrot.lane.b32.xlu1 %v4200_v37, %s3868_s25 }
 0x233   : > { %1078 = vrot.lane.b32.xlu2 %v4179_v31, %s3868_s25 }
 0x239   : > { %3323 = vrot.lane.b32.xlu0 %v4216_v46, %s3868_s25 }
 0x23a   : > { %3328 = vrot.lane.b32.xlu1 %v4214_v45, %s3868_s25 }
 0x23b   : > { %3333 = vrot.lane.b32.xlu2 %v4194_v35, %s3868_s25 }
 0x241   : > { %3338 = vrot.lane.b32.xlu0 %v4232_v55, %s3868_s25 }
 0x242   : > { %3343 = vrot.lane.b32.xlu1 %v4212_v44, %s3868_s25 }
 0x243   : > { %3353 = vrot.lane.b32.xlu2 %v4240_v56, %s3868_s25 }
 0x249   : > { %3348 = vrot.lane.b32.xlu0 %v4230_v54, %s3868_s25 }
 0x24a   : > { %3358 = vrot.lane.b32.xlu1 %v4228_v53, %s3868_s25 }
 0x255   : > { %v763_v59 = vpop.permute.xlu2 %762 }
 0x25d   : > { %v767_v60 = vpop.permute.xlu2 %766 }
 0x265   : > { %v773_v63 = vpop.permute.xlu2 %772 }
 0x26b   : > { %v765_v61 = vpop.permute.xlu0 %764 }
 0x26c   : > { %v761_v62 = vpop.permute.xlu1 %760 }
 0x26d   : > { %3143 = vmatmul.msk.f32.vlgmr.msrb.gmra.mxu2 %vm556_vm1, %v761_v62  ;;  %v4264_v3 = vpop.permute.xlu2 %3283 }
 0x26e   : > { %v3286_v52 = vunpack.i.h.bf16 %v4264_v3  ;;  %v3285_v58 = vunpack.i.l.bf16 %v4264_v3 }
 0x273   : > { %v771_v0 = vpop.permute.xlu0 %770 }
 0x274   : > { %v769_v1 = vpop.permute.xlu1 %768 }
 0x275   : > { %3144 = vmatmul.msk.f32.gmra.mxu2 %vm556_vm1, %v763_v59  ;;  %v3299_v8 = vpop.permute.xlu2 %3298 }
 0x276   : > { %v3301_v40 = vunpack.i.h.bf16 %v3299_v8  ;;  %v3300_v41 = vunpack.i.l.bf16 %v3299_v8 }
 0x277   : > { %v4262_v2 = vpop.f32.mrf.mxu0 }
 0x278   : > { %622 = vmax.xlane.f32.xlu0 %v4262_v2 }
 0x27b   : > { %v3294_v4 = vpop.permute.xlu0 %3293 }
 0x27c   : > { %v4267_v5 = vpop.permute.xlu1 %774  ;;  %v4269_v6 = vpop.f32.mrf.mxu2  ;;  %v3296_v42 = vunpack.i.h.bf16 %v3294_v4  ;;  %v3295_v47 = vunpack.i.l.bf16 %v3294_v4 }
 0x27d   : > { %3145 = vmatmul.msk.f32.gmra.mxu2 %vm556_vm1, %v765_v61  ;;  %630 = vmax.xlane.f32.xlu2 %v4269_v6  ;;  %v3314_v14 = vpop.permute.xlu2 %3313 }
 0x27e   : > { %v3316_v19 = vunpack.i.h.bf16 %v3314_v14  ;;  %v3315_v21 = vunpack.i.l.bf16 %v3314_v14 }
 0x27f   : > { %v4273_v7 = vpop.f32.mrf.mxu0 }
 0x280   : > { %624 = vmax.xlane.f32.xlu0 %v4273_v7 }
 0x283   : > { %v3304_v9 = vpop.permute.xlu0 %3303 }
 0x284   : > { %v3289_v10 = vpop.permute.xlu1 %3288  ;;  %v4276_v11 = vpop.f32.mrf.mxu2  ;;  %v3306_v32 = vunpack.i.h.bf16 %v3304_v9  ;;  %v3305_v33 = vunpack.i.l.bf16 %v3304_v9 }
 0x285   : > { %3146 = vmatmul.msk.f32.gmra.mxu2 %vm556_vm1, %v767_v60  ;;  %632 = vmax.xlane.f32.xlu2 %v4276_v11  ;;  %v1073_v43 = vpop.permute.xlu2 %1072  ;;  %v3291_v50 = vunpack.i.h.bf16 %v3289_v10  ;;  %v3290_v51 = vunpack.i.l.bf16 %v3289_v10 }
 0x287   : > { %v4280_v12 = vpop.f32.mrf.mxu0 }
 0x288   : > { %626 = vmax.xlane.f32.xlu1 %v4280_v12 }
 0x28b   : > { %v3319_v13 = vpop.permute.xlu0 %3318 }
 0x28c   : > { %v3309_v15 = vpop.permute.xlu1 %3308  ;;  %v4283_v16 = vpop.f32.mrf.mxu2  ;;  %v3321_v17 = vunpack.i.h.bf16 %v3319_v13  ;;  %v3320_v18 = vunpack.i.l.bf16 %v3319_v13 }
 0x28d   : > { %3147 = vmatmul.msk.f32.gmra.mxu2 %vm556_vm1, %v769_v1  ;;  %634 = vmax.xlane.f32.xlu0 %v4283_v16  ;;  %v3311_v22 = vunpack.i.h.bf16 %v3309_v15  ;;  %v3310_v30 = vunpack.i.l.bf16 %v3309_v15  ;;  %v1079_v57 = vpop.permute.xlu2 %1078 }
 0x28e   : > { %969 = vmatpush.msra.mxu3 %v3321_v17 }
 0x28f   : > { %v4287_v20 = vpop.f32.mrf.mxu0 }
 0x290   : > { %628 = vmax.xlane.f32.xlu1 %v4287_v20  ;;  %970 = vmatpush.msra.mxu3 %v3320_v18 }
 0x292   : > { %971 = vmatpush.msra.mxu3 %v3316_v19 }
 0x293   : > { %v1069_v23 = vpop.permute.xlu0 %1068 }
 0x294   : > { %v1071_v24 = vpop.permute.xlu1 %1070  ;;  %972 = vmatpush.msra.mxu3 %v3315_v21  ;;  %3151 = vmatmul.msk.f32.vlgmr.msrb.gmra.mxu0 %vm556_vm1, %v1069_v23  ;;  %v4292_v29 = vpop.f32.mrf.mxu2 }
 0x295   : > { %3148 = vmatmul.msk.f32.gmra.mxu2 %vm556_vm1, %v771_v0 }
 0x296   : > { %973 = vmatpush.msra.mxu3 %v3311_v22 }
 0x298   : > { %636 = vmax.xlane.f32.xlu1 %v4292_v29  ;;  %974 = vmatpush.msra.mxu3 %v3310_v30 }
 0x29a   : > { %975 = vmatpush.msra.mxu3 %v3306_v32 }
 0x29b   : > { %v1075_v38 = vpop.permute.xlu0 %1074 }
 0x29c   : > { %v1077_v39 = vpop.permute.xlu1 %1076  ;;  %976 = vmatpush.msra.mxu3 %v3305_v33  ;;  %3152 = vmatmul.msk.f32.gmra.mxu0 %vm556_vm1, %v1071_v24 }
 0x29d   : > { %3149 = vmatmul.msk.f32.gmra.mxu2 %vm556_vm1, %v773_v63  ;;  %1380 = vrot.lane.b32.xlu2 %v4160_v26, %s3869_s26 }
 0x29e   : > { %977 = vmatpush.msra.mxu3 %v3301_v40 }
 0x2a0   : > { %978 = vmatpush.msra.mxu3 %v3300_v41 }
 0x2a1   : > { %1378 = vrot.lane.b32.xlu0 %v4174_v28, %s3869_s26 }
 0x2a2   : > { %979 = vmatpush.msra.mxu3 %v3296_v42 }
 0x2a3   : > { %v1081_v48 = vpop.permute.xlu0 %1080 }
 0x2a4   : > { %v1083_v49 = vpop.permute.xlu1 %1082  ;;  %980 = vmatpush.msra.mxu3 %v3295_v47  ;;  %3153 = vmatmul.msk.f32.gmra.mxu0 %vm556_vm1, %v1073_v43 }
 0x2a5   : > { %3150 = vmatmul.msk.f32.gmra.mxu2 %vm556_vm1, %v4267_v5  ;;  %1386 = vrot.lane.b32.xlu2 %v4179_v31, %s3869_s26  ;;  %v3334_v31 = vpop.permute.xlu2 %3333 }
 0x2a6   : > { %981 = vmatpush.msra.mxu3 %v3291_v50  ;;  %v3336_v18 = vunpack.i.h.bf16 %v3334_v31  ;;  %v3335_v21 = vunpack.i.l.bf16 %v3334_v31 }
 0x2a8   : > { %982 = vmatpush.msra.mxu3 %v3290_v51 }
 0x2a9   : > { %1384 = vrot.lane.b32.xlu0 %v4157_v25, %s3869_s26 }
 0x2aa   : > { %983 = vmatpush.msra.mxu3 %v3286_v52 }
 0x2ab   : > { %v3324_v60 = vpop.permute.xlu0 %3323 }
 0x2ac   : > { %v3329_v59 = vpop.permute.xlu1 %3328  ;;  %984 = vmatpush.msra.mxu3 %v3285_v58  ;;  %3154 = vmatmul.msk.f32.gmra.mxu0 %vm556_vm1, %v1075_v38  ;;  %v3326_v23 = vunpack.i.h.bf16 %v3324_v60  ;;  %v3325_v24 = vunpack.i.l.bf16 %v3324_v60 }
 0x2ad   : > { %v3354_v0 = vpop.permute.xlu2 %3353  ;;  %v3331_v19 = vunpack.i.h.bf16 %v3329_v59  ;;  %v3330_v22 = vunpack.i.l.bf16 %v3329_v59 }
 0x2ae   : > { %v3356_v4 = vunpack.i.h.bf16 %v3354_v0  ;;  %v3355_v8 = vunpack.i.l.bf16 %v3354_v0 }
 0x2b1   : > { %1376 = vrot.lane.b32.xlu1 %v4163_v27, %s3869_s26 }
 0x2b3   : > { %v3339_v62 = vpop.permute.xlu0 %3338 }
 0x2b4   : > { %v3344_v61 = vpop.permute.xlu1 %3343  ;;  %3155 = vmatmul.msk.f32.gmra.mxu0 %vm556_vm1, %v1077_v39  ;;  %v3341_v15 = vunpack.i.h.bf16 %v3339_v62  ;;  %v3340_v17 = vunpack.i.l.bf16 %v3339_v62 }
 0x2b5   : > { %v3346_v13 = vunpack.i.h.bf16 %v3344_v61  ;;  %v3345_v14 = vunpack.i.l.bf16 %v3344_v61  ;;  %v1375_v61 = vld [vmem:[#allocation3 + $0x10] sm:$0xff] }
 0x2b6   : > { %1423 = vmatpush.msrb.mxu1 %v1375_v61 }
 0x2b9   : > { %1382 = vrot.lane.b32.xlu1 %v4190_v34, %s3869_s26 }
 0x2bb   : > { %v3349_v5 = vpop.permute.xlu0 %3348 }
 0x2bc   : > { %v3359_v63 = vpop.permute.xlu1 %3358  ;;  %3156 = vmatmul.msk.f32.gmra.mxu0 %vm556_vm1, %v1079_v57  ;;  %v3351_v9 = vunpack.i.h.bf16 %v3349_v5  ;;  %v3350_v10 = vunpack.i.l.bf16 %v3349_v5 }
 0x2bd   : > { %v3361_v1 = vunpack.i.h.bf16 %v3359_v63  ;;  %v3360_v3 = vunpack.i.l.bf16 %v3359_v63 }
 0x2bf   : > { %1277 = vmatpush.msra.mxu2 %v3361_v1 }
 0x2c1   : > { %1278 = vmatpush.msra.mxu2 %v3360_v3 }
 0x2c3   : > { %1279 = vmatpush.msra.mxu2 %v3356_v4 }
 0x2c4   : > { %3157 = vmatmul.msk.f32.gmra.mxu0 %vm556_vm1, %v1081_v48 }
 0x2c5   : > { %1280 = vmatpush.msra.mxu2 %v3355_v8 }
 0x2c7   : > { %1281 = vmatpush.msra.mxu2 %v3351_v9 }
 0x2c9   : > { %1282 = vmatpush.msra.mxu2 %v3350_v10 }
 0x2cb   : > { %1283 = vmatpush.msra.mxu2 %v3346_v13 }
 0x2cc   : > { %3158 = vmatmul.msk.f32.gmra.mxu0 %vm556_vm1, %v1083_v49 }
 0x2cd   : > { %1284 = vmatpush.msra.mxu2 %v3345_v14 }
 0x2cf   : > { %1285 = vmatpush.msra.mxu2 %v3341_v15 }
 0x2d1   : > { %1286 = vmatpush.msra.mxu2 %v3340_v17 }
 0x2d3   : > { %1287 = vmatpush.msra.mxu2 %v3336_v18 }
 0x2d5   : > { %1288 = vmatpush.msra.mxu2 %v3335_v21 }
 0x2d7   : > { %1289 = vmatpush.msra.mxu2 %v3331_v19 }
 0x2d9   : > { %1290 = vmatpush.msra.mxu2 %v3330_v22 }
 0x2db   : > { %1291 = vmatpush.msra.mxu2 %v3326_v23 }
 0x2dd   : > { %1292 = vmatpush.msra.mxu2 %v3325_v24 }
 0x2eb   : > { %v623_v30 = vpop.xlane.xlu0 %622 }
 0x2ec   : > { %v638_v32 = vsub.f32 %v4262_v2, %v623_v30 }
 0x2ee   : > { %v646_v33 = vmul.f32 1.442695, %v638_v32 }
 0x2f0   : > { %3562 = vpow2.f32 %v646_v33  ;;  %v4320_v38 = vpop.f32.mrf.mxu2  ;;  %v631_v2 = vpop.xlane.xlu2 %630 }
 0x2f1   : > { %833 = vmax.xlane.f32.xlu0 %v4320_v38 }
 0x2f3   : > { %v625_v39 = vpop.xlane.xlu0 %624 }
 0x2f4   : > { %v639_v40 = vsub.f32 %v4273_v7, %v625_v39  ;;  %v642_v7 = vsub.f32 %v4269_v6, %v631_v2 }
 0x2f6   : > { %v3563_v41 = vpop.eup %3562  ;;  %v648_v42 = vmul.f32 1.442695, %v639_v40  ;;  %v654_v58 = vmul.f32 1.442695, %v642_v7 }
 0x2f7   : > { %710 = vmatmul.f32.vlgmr.msra.gmra.mxu1 %v3563_v41 }
 0x2f8   : > { %3564 = vpow2.f32 %v648_v42  ;;  %v633_v59 = vpop.xlane.xlu2 %632 }
 0x2fb   : > { %v627_v43 = vpop.xlane.xlu1 %626 }
 0x2fc   : > { %v640_v47 = vsub.f32 %v4280_v12, %v627_v43  ;;  %v643_v12 = vsub.f32 %v4276_v11, %v633_v59 }
 0x2fe   : > { %v3565_v48 = vpop.eup %3564  ;;  %v650_v49 = vmul.f32 1.442695, %v640_v47  ;;  %v656_v62 = vmul.f32 1.442695, %v643_v12 }
 0x2ff   : > { %713 = vmatmul.f32.gmra.mxu1 %v3565_v48 }
 0x300   : > { %3566 = vpow2.f32 %v650_v49  ;;  %v635_v63 = vpop.xlane.xlu0 %634  ;;  %v1381_v24 = vpop.permute.xlu2 %1380 }
 0x301   : > { %v644_v6 = vsub.f32 %v4283_v16, %v635_v63 }
 0x303   : > { %v629_v50 = vpop.xlane.xlu1 %628  ;;  %v658_v11 = vmul.f32 1.442695, %v644_v6 }
 0x304   : > { %v641_v51 = vsub.f32 %v4287_v20, %v629_v50  ;;  %v4331_v20 = vpop.f32.mrf.mxu2 }
 0x306   : > { %v3567_v52 = vpop.eup %3566  ;;  %v652_v57 = vmul.f32 1.442695, %v641_v51 }
 0x307   : > { %716 = vmatmul.f32.gmra.mxu1 %v3567_v52 }
 0x308   : > { %3568 = vpow2.f32 %v652_v57 }
 0x309   : > { %3570 = vpow2.f32 %v654_v58 }
 0x30a   : > { %3572 = vpow2.f32 %v656_v62 }
 0x30b   : > { %v637_v3 = vpop.xlane.xlu1 %636  ;;  %3574 = vpow2.f32 %v658_v11 }
 0x30c   : > { %v4337_v5 = vpop.f32.mrf.mxu2  ;;  %v645_v8 = vsub.f32 %v4292_v29, %v637_v3 }
 0x30e   : > { %v3569_v60 = vpop.eup %3568  ;;  %v660_v16 = vmul.f32 1.442695, %v645_v8 }
 0x30f   : > { %719 = vmatmul.f32.gmra.mxu1 %v3569_v60  ;;  %v3571_v0 = vpop.eup %3570 }
 0x310   : > { %v3573_v4 = vpop.eup %3572  ;;  %3576 = vpow2.f32 %v660_v16 }
 0x311   : > { %v4328_v31 = vpop.f32.mrf.mxu0  ;;  %v3575_v10 = vpop.eup %3574 }
 0x312   : > { %1141 = vmax.xlane.f32.xlu2 %v4328_v31 }
 0x313   : > { %v1379_v21 = vpop.permute.xlu0 %1378 }
 0x314   : > { %v4344_v13 = vpop.f32.mrf.mxu2 }
 0x316   : > { %v3577_v29 = vpop.eup %3576 }
 0x317   : > { %722 = vmatmul.f32.gmra.mxu1 %v3571_v0 }
 0x319   : > { %v4334_v1 = vpop.f32.mrf.mxu0 }
 0x31a   : > { %662 = vadd.xlane.f32.xlu2 %v3563_v41  ;;  %1143 = vmax.xlane.f32.xlu0 %v4334_v1  ;;  %v1387_v41 = vpop.permute.xlu2 %1386 }
 0x31b   : > { %v1385_v40 = vpop.permute.xlu0 %1384 }
 0x31c   : > { %v4353_v17 = vpop.f32.mrf.mxu2 }
 0x31f   : > { %725 = vmatmul.f32.gmra.mxu1 %v3573_v4 }
 0x321   : > { %v4340_v9 = vpop.f32.mrf.mxu0 }
 0x322   : > { %835 = vmax.xlane.f32.xlu2 %v4331_v20  ;;  %670 = vadd.xlane.f32.xlu0 %v3571_v0 }
 0x323   : > { %1145 = vmax.xlane.f32.xlu1 %v4340_v9  ;;  %v1377_v18 = vpop.permute.xlu1 %1376 }
 0x324   : > { %v4359_v22 = vpop.f32.mrf.mxu2 }
 0x327   : > { %728 = vmatmul.f32.gmra.mxu1 %v3575_v10 }
 0x329   : > { %v4346_v14 = vpop.f32.mrf.mxu0 }
 0x32a   : > { %664 = vadd.xlane.f32.xlu0 %v3565_v48  ;;  %1147 = vmax.xlane.f32.xlu2 %v4346_v14 }
 0x32b   : > { %837 = vmax.xlane.f32.xlu1 %v4337_v5  ;;  %v1383_v32 = vpop.permute.xlu1 %1382 }
 0x32c   : > { %v4366_v30 = vpop.f32.mrf.mxu2 }
 0x32f   : > { %731 = vmatmul.f32.gmra.mxu1 %v3577_v29 }
 0x331   : > { %v4350_v15 = vpop.f32.mrf.mxu0 }
 0x332   : > { %839 = vmax.xlane.f32.xlu0 %v4344_v13  ;;  %674 = vadd.xlane.f32.xlu2 %v3575_v10 }
 0x333   : > { %672 = vadd.xlane.f32.xlu1 %v3573_v4 }
 0x334   : > { %v4375_v39 = vpop.f32.mrf.mxu2 }
 0x337   : > { %3159 = vmatmul.msk.f32.vlgmr.msrb.gmra.mxu1 %vm556_vm1, %v1377_v18 }
 0x339   : > { %v4357_v19 = vpop.f32.mrf.mxu0 }
 0x33a   : > { %668 = vadd.xlane.f32.xlu2 %v3569_v60  ;;  %1149 = vmax.xlane.f32.xlu0 %v4350_v15 }
 0x33b   : > { %666 = vadd.xlane.f32.xlu1 %v3567_v52 }
 0x33f   : > { %3160 = vmatmul.msk.f32.gmra.mxu1 %vm556_vm1, %v1379_v21 }
 0x341   : > { %v4364_v23 = vpop.f32.mrf.mxu0 }
 0x342   : > { %841 = vmax.xlane.f32.xlu2 %v4353_v17  ;;  %676 = vadd.xlane.f32.xlu0 %v3577_v29 }
 0x343   : > { %1151 = vmax.xlane.f32.xlu1 %v4357_v19 }
 0x347   : > { %3161 = vmatmul.msk.f32.gmra.mxu1 %vm556_vm1, %v1381_v24 }
 0x349   : > { %v4373_v33 = vpop.f32.mrf.mxu0 }
 0x34a   : > { %845 = vmax.xlane.f32.xlu0 %v4366_v30  ;;  %1153 = vmax.xlane.f32.xlu2 %v4364_v23 }
 0x34b   : > { %843 = vmax.xlane.f32.xlu1 %v4359_v22 }
 0x34f   : > { %3162 = vmatmul.msk.f32.gmra.mxu1 %vm556_vm1, %v1383_v32 }
 0x352   : > { %847 = vmax.xlane.f32.xlu2 %v4375_v39  ;;  %1155 = vmax.xlane.f32.xlu0 %v4373_v33 }
 0x357   : > { %3163 = vmatmul.msk.f32.gmra.mxu1 %vm556_vm1, %v1385_v40 }
 0x35f   : > { %3164 = vmatmul.msk.f32.gmra.mxu1 %vm556_vm1, %v1387_v41 }
 0x364   : > { %v834_v42 = vpop.xlane.xlu0 %833  ;;  %1388 = vrot.lane.b32.xlu1 %v4197_v36, %s3869_s26 }
 0x365   : > { %v849_v43 = vsub.f32 %v4320_v38, %v834_v42 }
 0x366   : > { %1390 = vrot.lane.b32.xlu0 %v4200_v37, %s3869_s26 }
 0x367   : > { %v857_v47 = vmul.f32 1.442695, %v849_v43 }
 0x369   : > { %3578 = vpow2.f32 %v857_v47 }
 0x36a   : > { %3373 = vrot.lane.b32.xlu2 %v4194_v35, %s3869_s26 }
 0x36c   : > { %3363 = vrot.lane.b32.xlu1 %v4216_v46, %s3869_s26 }
 0x36e   : > { %3368 = vrot.lane.b32.xlu0 %v4214_v45, %s3869_s26 }
 0x36f   : > { %v4392_v48 = vpop.eup %3578 }
 0x370   : > { %985 = vmatmul.f32.vlgmr.msra.gmra.mxu3 %v4392_v48 }
 0x372   : > { %3388 = vrot.lane.b32.xlu2 %v4230_v54, %s3869_s26 }
 0x374   : > { %v711_v36 = vpop.f32.mrf.mxu1  ;;  %3383 = vrot.lane.b32.xlu1 %v4212_v44, %s3869_s26 }
 0x376   : > { %3378 = vrot.lane.b32.xlu0 %v4232_v55, %s3869_s26 }
 0x37a   : > { %1684 = vrot.lane.b32.xlu2 %v4163_v27, %s3870_s24 }
 0x37c   : > { %v4403_v35 = vpop.f32.mrf.mxu1  ;;  %3398 = vrot.lane.b32.xlu1 %v4228_v53, %s3869_s26 }
 0x37e   : > { %3393 = vrot.lane.b32.xlu0 %v4240_v56, %s3869_s26 }
 0x382   : > { %1994 = vrot.lane.b32.xlu2 %v4174_v28, %s3871_s27 }
 0x384   : > { %v4411_v37 = vpop.f32.mrf.mxu1  ;;  %1686 = vrot.lane.b32.xlu1 %v4174_v28, %s3870_s24 }
 0x385   : > { %v1142_v44 = vpop.xlane.xlu2 %1141 }
 0x386   : > { %v1157_v45 = vsub.f32 %v4328_v31, %v1142_v44  ;;  %1992 = vrot.lane.b32.xlu0 %v4163_v27, %s3871_s27 }
 0x388   : > { %v1165_v46 = vmul.f32 1.442695, %v1157_v45 }
 0x38a   : > { %3580 = vpow2.f32 %v1165_v46  ;;  %1996 = vrot.lane.b32.xlu2 %v4160_v26, %s3871_s27 }
 0x38c   : > { %1688 = vrot.lane.b32.xlu1 %v4160_v26, %s3870_s24  ;;  %v4422_v55 = vpop.f32.mrf.mxu1 }
 0x38d   : > { %v663_v53 = vpop.xlane.xlu2 %662  ;;  %v1144_v54 = vpop.xlane.xlu0 %1143 }
 0x38e   : > { %3582 = vrcp.f32 %v663_v53  ;;  %v1158_v28 = vsub.f32 %v4334_v1, %v1144_v54  ;;  %1692 = vrot.lane.b32.xlu0 %v4157_v25, %s3870_s24 }
 0x390   : > { %v4427_v56 = vpop.eup %3580  ;;  %v1167_v27 = vmul.f32 1.442695, %v1158_v28 }
 0x391   : > { %1293 = vmatmul.f32.vlgmr.msra.gmra.mxu2 %v4427_v56 }
 0x392   : > { %3584 = vpow2.f32 %v1167_v27  ;;  %1998 = vrot.lane.b32.xlu2 %v4190_v34, %s3871_s27 }
 0x394   : > { %v3583_v26 = vpop.eup %3582  ;;  %1690 = vrot.lane.b32.xlu1 %v4190_v34, %s3870_s24  ;;  %v723_v57 = vpop.f32.mrf.mxu1 }
 0x395   : > { %v836_v38 = vpop.xlane.xlu2 %835  ;;  %v671_v49 = vpop.xlane.xlu0 %670  ;;  %v743_v2 = vmul.f32 %v3583_v26, %v711_v36 }
 0x396   : > { %v850_v50 = vsub.f32 %v4331_v20, %v836_v38  ;;  %3586 = vrcp.f32 %v671_v49  ;;  %v1146_v25 = vpop.xlane.xlu1 %1145  ;;  %v1683_v49 = vld [vmem:[#allocation3 + $0x8] sm:$0xff] }
 0x397   : > { %v1159_v51 = vsub.f32 %v4340_v9, %v1146_v25  ;;  %751 = vst.msk [vmem:[#allocation5] sm:$0xff] %vm556_vm1, %v743_v2  ;;  %1731 = vmatpush.msra.mxu0 %v1683_v49 }
 0x398   : > { %v4437_v52 = vpop.eup %3584  ;;  %v859_v7 = vmul.f32 1.442695, %v850_v50 }
 0x399   : > { %v1169_v58 = vmul.f32 1.442695, %v1159_v51  ;;  %1296 = vmatmul.f32.gmra.mxu2 %v4437_v52 }
 0x39a   : > { %3588 = vpow2.f32 %v859_v7 }
 0x39b   : > { %3590 = vpow2.f32 %v1169_v58 }
 0x39c   : > { %v3587_v34 = vpop.eup %3586  ;;  %v726_v1 = vpop.f32.mrf.mxu1 }
 0x39d   : > { %v665_v59 = vpop.xlane.xlu0 %664  ;;  %v1148_v60 = vpop.xlane.xlu2 %1147  ;;  %v747_v12 = vmul.f32 %v3587_v34, %v723_v57 }
 0x39e   : > { %3592 = vrcp.f32 %v665_v59  ;;  %v838_v31 = vpop.xlane.xlu1 %837  ;;  %v1160_v61 = vsub.f32 %v4346_v14, %v1148_v60 }
 0x39f   : > { %v851_v62 = vsub.f32 %v4337_v5, %v838_v31  ;;  %755 = vst.msk [vmem:[#allocation5 + $0x20] sm:$0xff] %vm556_vm1, %v747_v12 }
 0x3a0   : > { %v3589_v20 = vpop.eup %3588  ;;  %v1171_v63 = vmul.f32 1.442695, %v1160_v61 }
 0x3a1   : > { %v4443_v0 = vpop.eup %3590  ;;  %v861_v6 = vmul.f32 1.442695, %v851_v62  ;;  %988 = vmatmul.f32.gmra.mxu3 %v3589_v20 }
 0x3a2   : > { %3594 = vpow2.f32 %v1171_v63  ;;  %1299 = vmatmul.f32.gmra.mxu2 %v4443_v0 }
 0x3a3   : > { %3596 = vpow2.f32 %v861_v6 }
 0x3a4   : > { %v3593_v11 = vpop.eup %3592  ;;  %v729_v18 = vpop.f32.mrf.mxu1 }
 0x3a5   : > { %v840_v3 = vpop.xlane.xlu0 %839  ;;  %v675_v4 = vpop.xlane.xlu2 %674  ;;  %v744_v8 = vmul.f32 %v3593_v11, %v4403_v35 }
 0x3a6   : > { %v852_v5 = vsub.f32 %v4344_v13, %v840_v3  ;;  %v673_v9 = vpop.xlane.xlu1 %672  ;;  %3598 = vrcp.f32 %v675_v4 }
 0x3a7   : > { %3600 = vrcp.f32 %v673_v9  ;;  %752 = vst.msk [vmem:[#allocation5 + $0x8] sm:$0xff] %vm556_vm1, %v744_v8  ;;  %v4487_v9 = vld [vmem:[%s4154_s23 + $0x28] sm:$0xff] }
 0x3a8   : > { %v4449_v16 = vpop.eup %3594  ;;  %v863_v10 = vmul.f32 1.442695, %v852_v5 }
 0x3a9   : > { %v3597_v14 = vpop.eup %3596 }
 0x3aa   : > { %3602 = vpow2.f32 %v863_v10  ;;  %991 = vmatmul.f32.gmra.mxu3 %v3597_v14  ;;  %1302 = vmatmul.f32.gmra.mxu2 %v4449_v16 }
 0x3ac   : > { %v3599_v29 = vpop.eup %3598 }
 0x3ad   : > { %v3601_v21 = vpop.eup %3600  ;;  %v669_v24 = vpop.xlane.xlu2 %668  ;;  %v749_v40 = vmul.f32 %v3599_v29, %v729_v18 }
 0x3ae   : > { %v1150_v32 = vpop.xlane.xlu0 %1149  ;;  %v667_v13 = vpop.xlane.xlu1 %666  ;;  %3604 = vrcp.f32 %v669_v24  ;;  %v748_v42 = vmul.f32 %v3601_v21, %v726_v1  ;;  %v4495_v24 = vld [vmem:[%s4154_s23 + $0x30] sm:$0xff] }
 0x3af   : > { %v1161_v41 = vsub.f32 %v4350_v15, %v1150_v32  ;;  %3606 = vrcp.f32 %v667_v13  ;;  %757 = vst.msk [vmem:[#allocation5 + $0x30] sm:$0xff] %vm556_vm1, %v749_v40 }
 0x3b0   : > { %v4454_v43 = vpop.eup %3602  ;;  %756 = vst.msk [vmem:[#allocation5 + $0x28] sm:$0xff] %vm556_vm1, %v748_v42 }
 0x3b1   : > { %v1173_v47 = vmul.f32 1.442695, %v1161_v41 }
 0x3b2   : > { %994 = vmatmul.f32.gmra.mxu3 %v4454_v43 }
 0x3b3   : > { %3608 = vpow2.f32 %v1173_v47 }
 0x3b4   : > { %v3605_v36 = vpop.eup %3604 }
 0x3b5   : > { %v3607_v35 = vpop.eup %3606  ;;  %v842_v44 = vpop.xlane.xlu2 %841  ;;  %v746_v46 = vmul.f32 %v3605_v36, %v4422_v55 }
 0x3b6   : > { %v677_v45 = vpop.xlane.xlu0 %676  ;;  %v853_v15 = vsub.f32 %v4353_v17, %v842_v44  ;;  %v1152_v53 = vpop.xlane.xlu1 %1151  ;;  %v745_v54 = vmul.f32 %v3607_v35, %v4411_v37 }
 0x3b7   : > { %3610 = vrcp.f32 %v677_v45  ;;  %v1162_v28 = vsub.f32 %v4357_v19, %v1152_v53  ;;  %754 = vst.msk [vmem:[#allocation5 + $0x18] sm:$0xff] %vm556_vm1, %v746_v46  ;;  %v732_v55 = vpop.f32.mrf.mxu1  ;;  %v4506_v46 = vld [vmem:[%s4154_s23 + $0x38] sm:$0xff] }
 0x3b8   : > { %v865_v26 = vmul.f32 1.442695, %v853_v15  ;;  %875 = vadd.xlane.f32.xlu0 %v3589_v20  ;;  %753 = vst.msk [vmem:[#allocation5 + $0x10] sm:$0xff] %vm556_vm1, %v745_v54 }
 0x3b9   : > { %v3609_v27 = vpop.eup %3608  ;;  %v1175_v38 = vmul.f32 1.442695, %v1162_v28 }
 0x3ba   : > { %1305 = vmatmul.f32.gmra.mxu2 %v3609_v27  ;;  %3612 = vpow2.f32 %v865_v26  ;;  %v4515_v26 = vld [vmem:[%s4154_s23 + $0x20] sm:$0xff] }
 0x3bb   : > { %3614 = vpow2.f32 %v1175_v38  ;;  %1183 = vadd.xlane.f32.xlu2 %v4437_v52 }
 0x3bd   : > { %v3611_v17 = vpop.eup %3610  ;;  %v1154_v37 = vpop.xlane.xlu2 %1153 }
 0x3be   : > { %v846_v2 = vpop.xlane.xlu0 %845  ;;  %v750_v19 = vmul.f32 %v3611_v17, %v732_v55  ;;  %1181 = vadd.xlane.f32.xlu1 %v4427_v56  ;;  %v844_v50 = vpop.xlane.xlu1 %843  ;;  %v1163_v25 = vsub.f32 %v4364_v23, %v1154_v37 }
 0x3bf   : > { %v854_v51 = vsub.f32 %v4359_v22, %v844_v50  ;;  %v855_v34 = vsub.f32 %v4366_v30, %v846_v2  ;;  %v4483_v4 = vpop.f32.mrf.mxu1 }
 0x3c0   : > { %758 = vst.msk [vmem:[#allocation5 + $0x38] sm:$0xff] %vm556_vm1, %v750_v19  ;;  %v3613_v57 = vpop.eup %3612  ;;  %v1177_v7 = vmul.f32 1.442695, %v1163_v25  ;;  %1185 = vadd.xlane.f32.xlu0 %v4443_v0  ;;  %v1991_v0 = vld [vmem:[#allocation3 + $0x20] sm:$0xff] }
 0x3c1   : > { %v3615_v52 = vpop.eup %3614  ;;  %v867_v58 = vmul.f32 1.442695, %v854_v51  ;;  %997 = vmatmul.f32.gmra.mxu3 %v3613_v57  ;;  %v869_v23 = vmul.f32 1.442695, %v855_v34  ;;  %2039 = vmatpush.msra.mxu1 %v1991_v0 }
 0x3c2   : > { %1308 = vmatmul.f32.gmra.mxu2 %v3615_v52 }
 0x3c3   : > { %3616 = vpow2.f32 %v867_v58  ;;  %877 = vadd.xlane.f32.xlu2 %v3597_v14 }
 0x3c4   : > { %3618 = vpow2.f32 %v1177_v7 }
 0x3c5   : > { %v848_v56 = vpop.xlane.xlu2 %847  ;;  %3620 = vpow2.f32 %v869_v23 }
 0x3c6   : > { %v1156_v59 = vpop.xlane.xlu0 %1155  ;;  %873 = vadd.xlane.f32.xlu1 %v4392_v48  ;;  %v856_v31 = vsub.f32 %v4375_v39, %v848_v56 }
 0x3c7   : > { %v1164_v22 = vsub.f32 %v4373_v33, %v1156_v59 }
 0x3c8   : > { %881 = vadd.xlane.f32.xlu0 %v3613_v57  ;;  %v871_v30 = vmul.f32 1.442695, %v856_v31 }
 0x3c9   : > { %v1179_v60 = vmul.f32 1.442695, %v1164_v22  ;;  %v3617_v12 = vpop.eup %3616 }
 0x3ca   : > { %v3619_v61 = vpop.eup %3618  ;;  %1000 = vmatmul.f32.gmra.mxu3 %v3617_v12 }
 0x3cb   : > { %3622 = vpow2.f32 %v1179_v60  ;;  %1311 = vmatmul.f32.gmra.mxu2 %v3619_v61  ;;  %1189 = vadd.xlane.f32.xlu2 %v3609_v27  ;;  %v3621_v20 = vpop.eup %3620 }
 0x3cc   : > { %3624 = vpow2.f32 %v871_v30 }
 0x3cd   : > { %v4474_v62 = vpop.permute.xlu2 %3373 }
 0x3ce   : > { %1187 = vadd.xlane.f32.xlu1 %v4449_v16  ;;  %v4491_v16 = vpop.f32.mrf.mxu1  ;;  %v3376_v15 = vunpack.i.h.bf16 %v4474_v62  ;;  %v3375_v53 = vunpack.i.l.bf16 %v4474_v62 }
 0x3d0   : > { %1191 = vadd.xlane.f32.xlu0 %v3615_v52 }
 0x3d1   : > { %v3623_v48 = vpop.eup %3622 }
 0x3d2   : > { %1003 = vmatmul.f32.gmra.mxu3 %v3621_v20  ;;  %v3625_v63 = vpop.eup %3624 }
 0x3d3   : > { %1314 = vmatmul.f32.gmra.mxu2 %v3623_v48  ;;  %883 = vadd.xlane.f32.xlu2 %v3617_v12 }
 0x3d5   : > { %v3389_v33 = vpop.permute.xlu2 %3388 }
 0x3d6   : > { %879 = vadd.xlane.f32.xlu1 %v4454_v43  ;;  %v1389_v39 = vpop.permute.xlu1 %1388  ;;  %v3391_v13 = vunpack.i.h.bf16 %v3389_v33  ;;  %v3390_v42 = vunpack.i.l.bf16 %v3389_v33  ;;  %v4512_v27 = vpop.f32.mrf.mxu1 }
 0x3d7   : > { %3165 = vmatmul.msk.f32.gmra.mxu1 %vm556_vm1, %v1389_v39 }
 0x3d8   : > { %887 = vadd.xlane.f32.xlu0 %v3625_v63  ;;  %v1391_v6 = vpop.permute.xlu0 %1390 }
 0x3da   : > { %1006 = vmatmul.f32.gmra.mxu3 %v3625_v63 }
 0x3db   : > { %1195 = vadd.xlane.f32.xlu2 %v3623_v48 }
 0x3dd   : > { %v1685_v1 = vpop.permute.xlu2 %1684 }
 0x3de   : > { %v4479_v11 = vpop.permute.xlu1 %3363  ;;  %1193 = vadd.xlane.f32.xlu1 %v3619_v61  ;;  %3167 = vmatmul.msk.f32.vlgmr.msra.gmra.mxu0 %vm556_vm1, %v1685_v1  ;;  %v4526_v19 = vpop.f32.mrf.mxu1 }
 0x3df   : > { %3166 = vmatmul.msk.f32.gmra.mxu1 %vm556_vm1, %v1391_v6  ;;  %v3366_v55 = vunpack.i.h.bf16 %v4479_v11  ;;  %v3365_v49 = vunpack.i.l.bf16 %v4479_v11 }
 0x3e0   : > { %v3369_v3 = vpop.permute.xlu0 %3368 }
 0x3e1   : > { %v3371_v38 = vunpack.i.h.bf16 %v3369_v3  ;;  %v3370_v17 = vunpack.i.l.bf16 %v3369_v3 }
 0x3e3   : > { %1449 = vmax.xlane.f32.xlu2 %v4483_v4 }
 0x3e5   : > { %v1995_v47 = vpop.permute.xlu2 %1994 }
 0x3e6   : > { %v3384_v8 = vpop.permute.xlu1 %3383  ;;  %885 = vadd.xlane.f32.xlu1 %v3621_v20  ;;  %v4529_v50 = vpop.f32.mrf.mxu1 }
 0x3e7   : > { %v3386_v43 = vunpack.i.h.bf16 %v3384_v8  ;;  %v3385_v36 = vunpack.i.l.bf16 %v3384_v8 }
 0x3e8   : > { %v3379_v5 = vpop.permute.xlu0 %3378 }
 0x3e9   : > { %v3381_v44 = vunpack.i.h.bf16 %v3379_v5  ;;  %v3380_v45 = vunpack.i.l.bf16 %v3379_v5 }
 0x3ec   : > { %2002 = vrot.lane.b32.xlu0 %v4487_v9, %s3871_s27 }
 0x3ed   : > { %v1997_v54 = vpop.permute.xlu2 %1996 }
 0x3ee   : > { %v3399_v10 = vpop.permute.xlu1 %3398  ;;  %1451 = vmax.xlane.f32.xlu1 %v4491_v16  ;;  %v4534_v57 = vpop.f32.mrf.mxu1 }
 0x3ef   : > { %v3401_v14 = vunpack.i.h.bf16 %v3399_v10  ;;  %v3400_v18 = vunpack.i.l.bf16 %v3399_v10 }
 0x3f0   : > { %v3394_v29 = vpop.permute.xlu0 %3393 }
 0x3f1   : > { %1585 = vmatpush.msrb.mxu3 %v3401_v14  ;;  %v3396_v21 = vunpack.i.h.bf16 %v3394_v29  ;;  %v3395_v32 = vunpack.i.l.bf16 %v3394_v29 }
 0x3f3   : > { %1586 = vmatpush.msrb.mxu3 %v3400_v18  ;;  %v4532_v51 = vpop.f32.mrf.mxu3 }
 0x3f4   : > { %2004 = vrot.lane.b32.xlu0 %v4495_v24, %s3871_s27 }
 0x3f5   : > { %1587 = vmatpush.msrb.mxu3 %v3396_v21  ;;  %v1999_v37 = vpop.permute.xlu2 %1998 }
 0x3f6   : > { %v1687_v40 = vpop.permute.xlu1 %1686 }
 0x3f7   : > { %1588 = vmatpush.msrb.mxu3 %v3395_v32  ;;  %3168 = vmatmul.msk.f32.gmra.mxu0 %vm556_vm1, %v1687_v40 }
 0x3f8   : > { %v1993_v41 = vpop.permute.xlu0 %1992 }
 0x3f9   : > { %1589 = vmatpush.msrb.mxu3 %v3391_v13  ;;  %3175 = vmatmul.msk.f32.vlgmr.msra.gmra.mxu1 %vm556_vm1, %v1993_v41 }
 0x3fb   : > { %1590 = vmatpush.msrb.mxu3 %v3390_v42  ;;  %1694 = vrot.lane.b32.xlu2 %v4487_v9, %s3870_s24 }
 0x3fd   : > { %1591 = vmatpush.msrb.mxu3 %v3386_v43 }
 0x3fe   : > { %v1689_v35 = vpop.permute.xlu1 %1688 }
 0x3ff   : > { %1592 = vmatpush.msrb.mxu3 %v3385_v36  ;;  %3169 = vmatmul.msk.f32.gmra.mxu0 %vm556_vm1, %v1689_v35 }
 0x400   : > { %v1693_v2 = vpop.permute.xlu0 %1692 }
 0x401   : > { %1593 = vmatpush.msrb.mxu3 %v3381_v44  ;;  %3176 = vmatmul.msk.f32.gmra.mxu1 %vm556_vm1, %v1995_v47 }
 0x403   : > { %1594 = vmatpush.msrb.mxu3 %v3380_v45  ;;  %1698 = vrot.lane.b32.xlu2 %v4506_v46, %s3870_s24 }
 0x405   : > { %1595 = vmatpush.msrb.mxu3 %v3376_v15  ;;  %v4576_v15 = vld [vmem:[%s4154_s23] sm:$0xff] }
 0x406   : > { %v1691_v28 = vpop.permute.xlu1 %1690 }
 0x407   : > { %2000 = vrot.lane.b32.xlu1 %v4515_v26, %s3871_s27  ;;  %1596 = vmatpush.msrb.mxu3 %v3375_v53 }
 0x408   : > { %3170 = vmatmul.msk.f32.gmra.mxu0 %vm556_vm1, %v1691_v28  ;;  %v4581_v28 = vld [vmem:[%s4154_s23 + $0x8] sm:$0xff] }
 0x409   : > { %1597 = vmatpush.msrb.mxu3 %v3371_v38  ;;  %3177 = vmatmul.msk.f32.gmra.mxu1 %vm556_vm1, %v1997_v54 }
 0x40b   : > { %1598 = vmatpush.msrb.mxu3 %v3370_v17 }
 0x40d   : > { %1599 = vmatpush.msrb.mxu3 %v3366_v55 }
 0x40f   : > { %1696 = vrot.lane.b32.xlu1 %v4495_v24, %s3870_s24  ;;  %1600 = vmatpush.msrb.mxu3 %v3365_v49 }
 0x410   : > { %3171 = vmatmul.msk.f32.gmra.mxu0 %vm556_vm1, %v1693_v2 }
 0x411   : > { %3178 = vmatmul.msk.f32.gmra.mxu1 %vm556_vm1, %v1999_v37  ;;  %v3824_v37 = vld [vmem:[%s4154_s23 + $0x10] sm:$0xff] }
 0x414   : > { %v1294_v25 = vpop.f32.mrf.mxu2 }
 0x41c   : > { %v4537_v7 = vpop.f32.mrf.mxu2 }
 0x41e   : > { %1453 = vmax.xlane.f32.xlu0 %v4512_v27 }
 0x424   : > { %v4539_v52 = vpop.f32.mrf.mxu3 }
 0x425   : > { %v4542_v34 = vpop.f32.mrf.mxu2 }
 0x426   : > { %1459 = vmax.xlane.f32.xlu0 %v4534_v57 }
 0x42b   : > { %v876_v10 = vpop.xlane.xlu0 %875 }
 0x42c   : > { %1455 = vmax.xlane.f32.xlu2 %v4526_v19 }
 0x42d   : > { %v992_v59 = vpop.f32.mrf.mxu3  ;;  %v1303_v31 = vpop.f32.mrf.mxu2 }
 0x42e   : > { %v1184_v58 = vpop.xlane.xlu2 %1183 }
 0x431   : > { %v1182_v56 = vpop.xlane.xlu1 %1181 }
 0x432   : > { %3626 = vrcp.f32 %v1182_v56 }
 0x433   : > { %v1186_v41 = vpop.xlane.xlu0 %1185 }
 0x435   : > { %v4546_v61 = vpop.f32.mrf.mxu3 }
 0x436   : > { %v878_v23 = vpop.xlane.xlu2 %877 }
 0x437   : > { %3628 = vrcp.f32 %v878_v23 }
 0x438   : > { %v3627_v22 = vpop.eup %3626 }
 0x439   : > { %v874_v60 = vpop.xlane.xlu1 %873  ;;  %1457 = vmax.xlane.f32.xlu1 %v4529_v50  ;;  %v1326_v12 = vmul.f32 %v3627_v22, %v1294_v25  ;;  %v3825_v22 = vld [vmem:[%s4154_s23 + $0x18] sm:$0xff] }
 0x43b   : > { %1342 = vrot.lane.b32.xlu0 %v1326_v12, %s3872_s28  ;;  %v882_v45 = vpop.xlane.xlu0 %881 }
 0x43d   : > { %v3629_v30 = vpop.eup %3628  ;;  %v4548_v33 = vpop.f32.mrf.mxu2 }
 0x43e   : > { %v1190_v62 = vpop.xlane.xlu2 %1189  ;;  %v1020_v48 = vmul.f32 %v3629_v30, %v992_v59 }
 0x441   : > { %v1188_v20 = vpop.xlane.xlu1 %1187 }
 0x442   : > { %3630 = vrcp.f32 %v1188_v20 }
 0x443   : > { %1038 = vrot.lane.b32.xlu0 %v1020_v48, %s3873_s30  ;;  %v1192_v17 = vpop.xlane.xlu0 %1191 }
 0x444   : > { %v4551_v39 = vpop.f32.mrf.mxu3 }
 0x445   : > { %v4556_v11 = vpop.f32.mrf.mxu2 }
 0x446   : > { %v884_v63 = vpop.xlane.xlu2 %883 }
 0x447   : > { %3632 = vrcp.f32 %v884_v63 }
 0x448   : > { %v3631_v0 = vpop.eup %3630 }
 0x449   : > { %v4553_v6 = vpop.xlane.xlu1 %879  ;;  %v1329_v1 = vmul.f32 %v3631_v0, %v1303_v31 }
 0x44b   : > { %1348 = vrot.lane.b32.xlu0 %v1329_v1, %s3872_s28 }
 0x44d   : > { %v3633_v3 = vpop.eup %3632  ;;  %v1001_v8 = vpop.f32.mrf.mxu3 }
 0x44e   : > { %v4558_v5 = vpop.xlane.xlu2 %1195  ;;  %v1023_v14 = vmul.f32 %v3633_v3, %v1001_v8  ;;  %v1312_v13 = vpop.f32.mrf.mxu2 }
 0x451   : > { %v1194_v29 = vpop.xlane.xlu1 %1193 }
 0x452   : > { %3634 = vrcp.f32 %v1194_v29 }
 0x453   : > { %1044 = vrot.lane.b32.xlu0 %v1023_v14, %s3873_s30 }
 0x454   : > { %v4561_v18 = vpop.f32.mrf.mxu1 }
 0x455   : > { %1461 = vmax.xlane.f32.xlu2 %v4561_v18 }
 0x456   : > { %v1450_v21 = vpop.xlane.xlu2 %1449 }
 0x457   : > { %v1465_v32 = vsub.f32 %v4483_v4, %v1450_v21 }
 0x458   : > { %v3635_v40 = vpop.eup %3634 }
 0x459   : > { %v1473_v42 = vmul.f32 1.442695, %v1465_v32  ;;  %v4565_v43 = vpop.xlane.xlu1 %885  ;;  %v1332_v47 = vmul.f32 %v3635_v40, %v1312_v13 }
 0x45b   : > { %3636 = vpow2.f32 %v1473_v42  ;;  %1354 = vrot.lane.b32.xlu0 %v1332_v47, %s3872_s28 }
 0x45c   : > { %v4568_v36 = vpop.f32.mrf.mxu1  ;;  %3638 = vrcp.f32 %v1184_v58  ;;  %v4597_v58 = vpop.xlane.xlu0 %887 }
 0x45d   : > { %1463 = vmax.xlane.f32.xlu1 %v4568_v36 }
 0x45e   : > { %v1695_v55 = vpop.permute.xlu2 %1694 }
 0x45f   : > { %3172 = vmatmul.msk.f32.gmra.mxu0 %vm556_vm1, %v1695_v55 }
 0x461   : > { %v4571_v35 = vpop.eup %3636  ;;  %v1452_v44 = vpop.xlane.xlu1 %1451 }
 0x462   : > { %v1466_v4 = vsub.f32 %v4491_v16, %v1452_v44  ;;  %1601 = vmatmul.f32.vlgmr.msrb.gmra.mxu3 %v4571_v35  ;;  %v3639_v54 = vpop.eup %3638  ;;  %v4652_v44 = vpop.f32.mrf.mxu0 }
 0x463   : > { %2300 = vrot.lane.b32.xlu0 %v4576_v15, %s3874_s4  ;;  %v1327_v16 = vmul.f32 %v3639_v54, %v4537_v7 }
 0x464   : > { %v1475_v53 = vmul.f32 1.442695, %v1466_v4 }
 0x466   : > { %3640 = vpow2.f32 %v1475_v53 }
 0x467   : > { %3642 = vrcp.f32 %v876_v10 }
 0x468   : > { %3644 = vrcp.f32 %v874_v60  ;;  %v2003_v60 = vpop.permute.xlu0 %2002 }
 0x469   : > { %3646 = vrcp.f32 %v1190_v62 }
 0x46a   : > { %3648 = vrcp.f32 %v1186_v41 }
 0x46b   : > { %2302 = vrot.lane.b32.xlu0 %v4581_v28, %s3874_s4  ;;  %3650 = vrcp.f32 %v4553_v6  ;;  %v1004_v6 = vpop.f32.mrf.mxu3 }
 0x46c   : > { %v4586_v38 = vpop.eup %3640  ;;  %3652 = vrcp.f32 %v882_v45 }
 0x46d   : > { %1344 = vrot.lane.b32.xlu2 %v1327_v16, %s3872_s28  ;;  %1604 = vmatmul.f32.gmra.mxu3 %v4586_v38  ;;  %v3643_v49 = vpop.eup %3642  ;;  %3654 = vrcp.f32 %v1192_v17 }
 0x46e   : > { %v3645_v2 = vpop.eup %3644  ;;  %v1019_v25 = vmul.f32 %v3643_v49, %v4539_v52  ;;  %3656 = vrcp.f32 %v4565_v43  ;;  %v2299_v43 = vld [vmem:[#allocation3 + $0x28] sm:$0xff] }
 0x46f   : > { %v1018_v7 = vmul.f32 %v3645_v2, %v4532_v51  ;;  %v3647_v56 = vpop.eup %3646  ;;  %2347 = vmatpush.msrb.mxu0 %v2299_v43  ;;  %v2123_v43 = vld [vmem:[#allocation4 + $0x10] sm:$0xff] }
 0x470   : > { %v3649_v59 = vpop.eup %3648  ;;  %v1330_v52 = vmul.f32 %v3647_v56, %v4548_v33  ;;  %v2005_v48 = vpop.permute.xlu0 %2004 }
 0x471   : > { %v1328_v51 = vmul.f32 %v3649_v59, %v4542_v34  ;;  %v3651_v12 = vpop.eup %3650  ;;  %v1699_v33 = vpop.permute.xlu2 %1698 }
 0x472   : > { %v3653_v30 = vpop.eup %3652  ;;  %v1021_v34 = vmul.f32 %v3651_v12, %v4546_v61 }
 0x473   : > { %2304 = vrot.lane.b32.xlu0 %v3824_v37, %s3874_s4  ;;  %v1022_v62 = vmul.f32 %v3653_v30, %v4551_v39  ;;  %v3655_v20 = vpop.eup %3654  ;;  %v1007_v4 = vpop.f32.mrf.mxu3 }
 0x474   : > { %v1331_v39 = vmul.f32 %v3655_v20, %v4556_v11  ;;  %v3657_v61 = vpop.eup %3656 }
 0x475   : > { %1036 = vrot.lane.b32.xlu2 %v1019_v25, %s3873_s30  ;;  %v1024_v3 = vmul.f32 %v3657_v61, %v1004_v6  ;;  %v1828_v61 = vld [vmem:[#allocation4 + $0x78] sm:$0xff] }
 0x476   : > { %1034 = vrot.lane.b32.xlu1 %v1018_v7, %s3873_s30 }
 0x479   : > { %v2001_v23 = vpop.permute.xlu1 %2000 }
 0x47a   : > { %3179 = vmatmul.msk.f32.gmra.mxu1 %vm556_vm1, %v2001_v23 }
 0x47b   : > { %2306 = vrot.lane.b32.xlu0 %v3825_v22, %s3874_s4 }
 0x47d   : > { %1350 = vrot.lane.b32.xlu2 %v1330_v52, %s3872_s28  ;;  %v2607_v52 = vld [vmem:[#allocation3 + $0x38] sm:$0xff] }
 0x47e   : > { %1346 = vrot.lane.b32.xlu1 %v1328_v51, %s3872_s28  ;;  %2655 = vmatpush.msrb.mxu1 %v2607_v52 }
 0x481   : > { %v1697_v31 = vpop.permute.xlu1 %1696 }
 0x482   : > { %3180 = vmatmul.msk.f32.gmra.mxu1 %vm556_vm1, %v2003_v60  ;;  %3173 = vmatmul.msk.f32.gmra.mxu0 %vm556_vm1, %v1697_v31 }
 0x483   : > { %2308 = vrot.lane.b32.xlu0 %v4515_v26, %s3874_s4 }
 0x485   : > { %1042 = vrot.lane.b32.xlu2 %v1022_v62, %s3873_s30 }
 0x486   : > { %1040 = vrot.lane.b32.xlu1 %v1021_v34, %s3873_s30 }
 0x48a   : > { %3181 = vmatmul.msk.f32.gmra.mxu1 %vm556_vm1, %v2005_v48  ;;  %3174 = vmatmul.msk.f32.gmra.mxu0 %vm556_vm1, %v1699_v33 }
 0x48d   : > { %2006 = vrot.lane.b32.xlu2 %v4506_v46, %s3871_s27 }
 0x48e   : > { %1352 = vrot.lane.b32.xlu1 %v1331_v39, %s3872_s28  ;;  %v1827_v39 = vld [vmem:[#allocation4 + $0x70] sm:$0xff] }
 0x491   : > { %v1454_v63 = vpop.xlane.xlu0 %1453 }
 0x492   : > { %v1467_v0 = vsub.f32 %v4512_v27, %v1454_v63  ;;  %v4706_v63 = vpack.i.bf16 %v1827_v39, %v1828_v61  ;;  %v1813_v61 = vld [vmem:[#allocation4] sm:$0xff] }
 0x494   : > { %v1477_v1 = vmul.f32 1.442695, %v1467_v0  ;;  %v1826_v0 = vld [vmem:[#allocation4 + $0x68] sm:$0xff] }
 0x495   : > { %2608 = vrot.lane.b32.xlu2 %v4576_v15, %s3875_s5 }
 0x496   : > { %3658 = vpow2.f32 %v1477_v1  ;;  %1046 = vrot.lane.b32.xlu1 %v1024_v3, %s3873_s30  ;;  %v1821_v3 = vld [vmem:[#allocation4 + $0x40] sm:$0xff] }
 0x499   : > { %v1460_v27 = vpop.xlane.xlu0 %1459 }
 0x49c   : > { %v3659_v11 = vpop.eup %3658 }
 0x49d   : > { %2610 = vrot.lane.b32.xlu2 %v4581_v28, %s3875_s5  ;;  %1607 = vmatmul.f32.gmra.mxu3 %v3659_v11 }
 0x49f   : > { %v1456_v8 = vpop.xlane.xlu2 %1455 }
 0x4a0   : > { %v1468_v10 = vsub.f32 %v4526_v19, %v1456_v8  ;;  %v1470_v19 = vsub.f32 %v4534_v57, %v1460_v27  ;;  %v2128_v27 = vld [vmem:[#allocation4 + $0x38] sm:$0xff] }
 0x4a2   : > { %v1479_v14 = vmul.f32 1.442695, %v1468_v10  ;;  %v1483_v41 = vmul.f32 1.442695, %v1470_v19 }
 0x4a4   : > { %3660 = vpow2.f32 %v1479_v14  ;;  %v2127_v14 = vld [vmem:[#allocation4 + $0x30] sm:$0xff] }
 0x4a5   : > { %2612 = vrot.lane.b32.xlu2 %v3824_v37, %s3875_s5 }
 0x4aa   : > { %v4630_v29 = vpop.eup %3660 }
 0x4ab   : > { %1610 = vmatmul.f32.gmra.mxu3 %v4630_v29 }
 0x4ac   : > { %v1458_v21 = vpop.xlane.xlu1 %1457 }
 0x4ad   : > { %v1469_v32 = vsub.f32 %v4529_v50, %v1458_v21  ;;  %1489 = vadd.xlane.f32.xlu0 %v4571_v35  ;;  %2614 = vrot.lane.b32.xlu2 %v3825_v22, %s3875_s5  ;;  %v4636_v40 = vpop.permute.xlu0 %1342  ;;  %v1315_v35 = vpop.f32.mrf.mxu2 }
 0x4af   : > { %v1481_v13 = vmul.f32 1.442695, %v1469_v32  ;;  %v4726_v32 = vpack.i.bf16 %v2127_v14, %v2128_v27 }
 0x4b1   : > { %3662 = vpow2.f32 %v1481_v13 }
 0x4b2   : > { %3664 = vrcp.f32 %v4558_v5 }
 0x4b3   : > { %3666 = vpow2.f32 %v1483_v41 }
 0x4b4   : > { %3668 = vrcp.f32 %v4597_v58 }
 0x4b5   : > { %2616 = vrot.lane.b32.xlu2 %v4515_v26, %s3875_s5  ;;  %v1039_v42 = vpop.permute.xlu0 %1038 }
 0x4b6   : > { %1061 = vst.msk [vmem:[#allocation5 + $0x10] sm:$0xff] %vm1058_vm2, %v1039_v42 }
 0x4b7   : > { %v4643_v50 = vpop.eup %3662 }
 0x4b8   : > { %v3665_v47 = vpop.eup %3664  ;;  %1613 = vmatmul.f32.gmra.mxu3 %v4643_v50 }
 0x4b9   : > { %v1333_v57 = vmul.f32 %v3665_v47, %v1315_v35  ;;  %v4650_v26 = vpop.eup %3666 }
 0x4ba   : > { %v3669_v45 = vpop.eup %3668 }
 0x4bb   : > { %v1025_v15 = vmul.f32 %v3669_v45, %v1007_v4 }
 0x4bd   : > { %1356 = vrot.lane.b32.xlu2 %v1333_v57, %s3872_s28  ;;  %v4648_v5 = vpop.permute.xlu0 %1348 }
 0x4c0   : > { %1616 = vmatmul.f32.gmra.mxu3 %v4650_v26  ;;  %1757 = vmax.xlane.f32.xlu1 %v4652_v44 }
 0x4c1   : > { %2618 = vrot.lane.b32.xlu0 %v4487_v9, %s3875_s5 }
 0x4c5   : > { %1048 = vrot.lane.b32.xlu2 %v1025_v15, %s3873_s30  ;;  %v1045_v53 = vpop.permute.xlu0 %1044  ;;  %v4747_v15 = vpop.f32.mrf.mxu1 }
 0x4c6   : > { %1064 = vst.msk [vmem:[#allocation5 + $0x28] sm:$0xff] %vm1058_vm2, %v1045_v53  ;;  %v1823_v53 = vld [vmem:[#allocation4 + $0x50] sm:$0xff] }
 0x4c8   : > { %v1462_v54 = vpop.xlane.xlu2 %1461  ;;  %1493 = vadd.xlane.f32.xlu1 %v3659_v11  ;;  %v1822_v11 = vld [vmem:[#allocation4 + $0x48] sm:$0xff] }
 0x4c9   : > { %v1471_v28 = vsub.f32 %v4561_v18, %v1462_v54  ;;  %v4720_v10 = vpack.i.bf16 %v1821_v3, %v1822_v11  ;;  %v1824_v54 = vld [vmem:[#allocation4 + $0x58] sm:$0xff] }
 0x4cb   : > { %v1485_v16 = vmul.f32 1.442695, %v1471_v28 }
 0x4cd   : > { %3670 = vpow2.f32 %v1485_v16  ;;  %v1355_v17 = vpop.permute.xlu0 %1354  ;;  %v4750_v16 = vpack.i.bf16 %v1823_v53, %v1824_v54 }
 0x4d0   : > { %v1345_v55 = vpop.permute.xlu2 %1344  ;;  %v1464_v49 = vpop.xlane.xlu1 %1463 }
 0x4d1   : > { %v1472_v2 = vsub.f32 %v4568_v36, %v1464_v49  ;;  %v4758_v49 = vpop.f32.mrf.mxu1 }
 0x4d3   : > { %v4662_v37 = vpop.eup %3670  ;;  %v1487_v25 = vmul.f32 1.442695, %v1472_v2 }
 0x4d4   : > { %1619 = vmatmul.f32.gmra.mxu3 %v4662_v37 }
 0x4d5   : > { %3672 = vpow2.f32 %v1487_v25  ;;  %v2301_v7 = vpop.permute.xlu0 %2300 }
 0x4d6   : > { %3183 = vmatmul.msk.f32.vlgmr.msrb.gmra.mxu0 %vm556_vm1, %v2301_v7 }
 0x4d8   : > { %v1037_v58 = vpop.permute.xlu2 %1036 }
 0x4d9   : > { %1060 = vst.msk [vmem:[#allocation5 + $0x8] sm:$0xff] %vm1058_vm2, %v1037_v58 }
 0x4da   : > { %1368 = vst.msk [vmem:[#allocation5 + $0x8] sm:$0xff] %vm1366_vm3, %v1345_v55 }
 0x4db   : > { %v3673_v18 = vpop.eup %3672 }
 0x4dc   : > { %1622 = vmatmul.f32.gmra.mxu3 %v3673_v18 }
 0x4dd   : > { %v2303_v56 = vpop.permute.xlu0 %2302 }
 0x4de   : > { %3184 = vmatmul.msk.f32.gmra.mxu0 %vm556_vm1, %v2303_v56  ;;  %v1818_v56 = vld [vmem:[#allocation4 + $0x28] sm:$0xff] }
 0x4e0   : > { %v1351_v36 = vpop.permute.xlu2 %1350 }
 0x4e1   : > { %2310 = vrot.lane.b32.xlu1 %v4487_v9, %s3874_s4 }
 0x4e5   : > { %v2305_v59 = vpop.permute.xlu0 %2304  ;;  %v1602_v13 = vpop.f32.mrf.mxu3 }
 0x4e6   : > { %3185 = vmatmul.msk.f32.gmra.mxu0 %vm556_vm1, %v2305_v59 }
 0x4e8   : > { %v1035_v23 = vpop.permute.xlu1 %1034  ;;  %v1043_v22 = vpop.permute.xlu2 %1042 }
 0x4e9   : > { %1059 = vst.msk [vmem:[#allocation5] sm:$0xff] %vm1058_vm2, %v1035_v23  ;;  %2314 = vrot.lane.b32.xlu1 %v4506_v46, %s3874_s4 }
 0x4ea   : > { %1063 = vst.msk [vmem:[#allocation5 + $0x20] sm:$0xff] %vm1058_vm2, %v1043_v22 }
 0x4eb   : > { %1495 = vadd.xlane.f32.xlu0 %v4630_v29  ;;  %1367 = vst.msk [vmem:[#allocation5] sm:$0xff] %vm1366_vm3, %v4636_v40 }
 0x4ec   : > { %1371 = vst.msk [vmem:[#allocation5 + $0x20] sm:$0xff] %vm1366_vm3, %v1351_v36 }
 0x4ed   : > { %v2307_v9 = vpop.permute.xlu0 %2306 }
 0x4ee   : > { %1491 = vadd.xlane.f32.xlu2 %v4586_v38  ;;  %3186 = vmatmul.msk.f32.gmra.mxu0 %vm556_vm1, %v2307_v9  ;;  %v4690_v38 = vpop.f32.mrf.mxu0 }
 0x4f0   : > { %v1347_v51 = vpop.permute.xlu1 %1346  ;;  %v2007_v60 = vpop.permute.xlu2 %2006 }
 0x4f1   : > { %1369 = vst.msk [vmem:[#allocation5 + $0x10] sm:$0xff] %vm1366_vm3, %v1347_v51  ;;  %3182 = vmatmul.msk.f32.gmra.mxu1 %vm556_vm1, %v2007_v60  ;;  %v4738_v35 = vpop.f32.mrf.mxu3 }
 0x4f5   : > { %v2309_v12 = vpop.permute.xlu0 %2308 }
 0x4f6   : > { %1497 = vadd.xlane.f32.xlu2 %v4643_v50  ;;  %3187 = vmatmul.msk.f32.gmra.mxu0 %vm556_vm1, %v2309_v12  ;;  %v4711_v1 = vpop.f32.mrf.mxu0  ;;  %v2124_v50 = vld [vmem:[#allocation4 + $0x18] sm:$0xff] }
 0x4f7   : > { %v4736_v47 = vpack.i.bf16 %v2123_v43, %v2124_v50 }
 0x4f8   : > { %v1041_v31 = vpop.permute.xlu1 %1040  ;;  %v2609_v30 = vpop.permute.xlu2 %2608 }
 0x4f9   : > { %1062 = vst.msk [vmem:[#allocation5 + $0x18] sm:$0xff] %vm1058_vm2, %v1041_v31  ;;  %3191 = vmatmul.msk.f32.vlgmr.msrb.gmra.mxu1 %vm556_vm1, %v2609_v30 }
 0x4fa   : > { %1370 = vst.msk [vmem:[#allocation5 + $0x18] sm:$0xff] %vm1366_vm3, %v4648_v5 }
 0x4fe   : > { %1759 = vmax.xlane.f32.xlu2 %v4690_v38 }
 0x4ff   : > { %2312 = vrot.lane.b32.xlu0 %v4495_v24, %s3874_s4 }
 0x500   : > { %v2611_v62 = vpop.permute.xlu2 %2610  ;;  %v1353_v34 = vpop.permute.xlu1 %1352 }
 0x501   : > { %1372 = vst.msk [vmem:[#allocation5 + $0x28] sm:$0xff] %vm1366_vm3, %v1353_v34  ;;  %3192 = vmatmul.msk.f32.gmra.mxu1 %vm556_vm1, %v2611_v62 }
 0x506   : > { %1503 = vadd.xlane.f32.xlu2 %v3673_v18  ;;  %v1817_v18 = vld [vmem:[#allocation4 + $0x20] sm:$0xff] }
 0x507   : > { %2620 = vrot.lane.b32.xlu0 %v4495_v24, %s3875_s5  ;;  %v1825_v24 = vld [vmem:[#allocation4 + $0x60] sm:$0xff]  ;;  %v4769_v22 = vpack.i.bf16 %v1817_v18, %v1818_v56 }
 0x508   : > { %v2613_v20 = vpop.permute.xlu2 %2612  ;;  %v1047_v48 = vpop.permute.xlu1 %1046 }
 0x509   : > { %1065 = vst.msk [vmem:[#allocation5 + $0x30] sm:$0xff] %vm1058_vm2, %v1047_v48  ;;  %3193 = vmatmul.msk.f32.gmra.mxu1 %vm556_vm1, %v2613_v20 }
 0x50a   : > { %1373 = vst.msk [vmem:[#allocation5 + $0x30] sm:$0xff] %vm1366_vm3, %v1355_v17 }
 0x50f   : > { %2622 = vrot.lane.b32.xlu0 %v4506_v46, %s3875_s5  ;;  %v4713_v46 = vpack.i.bf16 %v1825_v24, %v1826_v0  ;;  %v1814_v24 = vld [vmem:[#allocation4 + $0x8] sm:$0xff] }
 0x510   : > { %v2615_v33 = vpop.permute.xlu2 %2614  ;;  %v4785_v3 = vpack.i.bf16 %v1813_v61, %v1814_v24 }
 0x511   : > { %3194 = vmatmul.msk.f32.gmra.mxu1 %vm556_vm1, %v2615_v33 }
 0x513   : > { %1499 = vadd.xlane.f32.xlu1 %v4650_v26 }
 0x517   : > { %3403 = vrot.lane.b32.xlu0 %v4706_v63, %s3870_s24 }
 0x518   : > { %v2617_v6 = vpop.permute.xlu2 %2616 }
 0x519   : > { %3195 = vmatmul.msk.f32.gmra.mxu1 %vm556_vm1, %v2617_v6 }
 0x51b   : > { %1761 = vmax.xlane.f32.xlu1 %v4711_v1 }
 0x51e   : > { %3413 = vrot.lane.b32.xlu2 %v4713_v46, %s3870_s24 }
 0x51f   : > { %3408 = vrot.lane.b32.xlu0 %v4706_v63, %s3871_s27 }
 0x520   : > { %v1357_v8 = vpop.permute.xlu2 %1356  ;;  %v1490_v29 = vpop.xlane.xlu0 %1489 }
 0x521   : > { %3674 = vrcp.f32 %v1490_v29  ;;  %v1608_v26 = vpop.f32.mrf.mxu3 }
 0x526   : > { %3433 = vrot.lane.b32.xlu2 %v4720_v10, %s3870_s24 }
 0x527   : > { %v3675_v40 = vpop.eup %3674 }
 0x528   : > { %v1049_v21 = vpop.permute.xlu2 %1048  ;;  %v1634_v42 = vmul.f32 %v3675_v40, %v1602_v13  ;;  %v4796_v13 = vpop.f32.mrf.mxu0 }
 0x529   : > { %1066 = vst.msk [vmem:[#allocation5 + $0x38] sm:$0xff] %vm1058_vm2, %v1049_v21  ;;  %v4791_v21 = vpop.f32.mrf.mxu1 }
 0x52a   : > { %1374 = vst.msk [vmem:[#allocation5 + $0x38] sm:$0xff] %vm1366_vm3, %v1357_v8 }
 0x52e   : > { %3448 = vrot.lane.b32.xlu2 %v4726_v32, %s3871_s27  ;;  %v1611_v7 = vpop.f32.mrf.mxu3 }
 0x533   : > { %v2619_v19 = vpop.permute.xlu0 %2618  ;;  %v4730_v41 = vpop.xlane.xlu1 %1757 }
 0x534   : > { %3196 = vmatmul.msk.f32.gmra.mxu1 %vm556_vm1, %v2619_v19  ;;  %3443 = vrot.lane.b32.xlu1 %v4726_v32, %s3870_s24 }
 0x536   : > { %1650 = vrot.lane.b32.xlu2 %v1634_v42, %s3876_s6  ;;  %v4802_v42 = vpop.f32.mrf.mxu1 }
 0x53b   : > { %v1494_v57 = vpop.xlane.xlu1 %1493  ;;  %v1614_v51 = vpop.f32.mrf.mxu3 }
 0x53c   : > { %3676 = vrcp.f32 %v1494_v57  ;;  %3468 = vrot.lane.b32.xlu1 %v4736_v47, %s3871_s27 }
 0x542   : > { %v3677_v5 = vpop.eup %3676 }
 0x543   : > { %v1636_v4 = vmul.f32 %v3677_v5, %v1608_v26  ;;  %v1617_v48 = vpop.f32.mrf.mxu3  ;;  %v4813_v26 = vpop.f32.mrf.mxu1 }
 0x545   : > { %1654 = vrot.lane.b32.xlu1 %v1636_v4, %s3876_s6 }
 0x549   : > { %1501 = vadd.xlane.f32.xlu0 %v4662_v37 }
 0x553   : > { %v2311_v45 = vpop.permute.xlu1 %2310 }
 0x554   : > { %3188 = vmatmul.msk.f32.gmra.mxu0 %vm556_vm1, %v2311_v45  ;;  %v4818_v45 = vpop.f32.mrf.mxu1 }
 0x55b   : > { %v2315_v36 = vpop.permute.xlu1 %2314 }
 0x55d   : > { %3418 = vrot.lane.b32.xlu0 %v4713_v46, %s3871_s27 }
 0x55e   : > { %v1496_v17 = vpop.xlane.xlu0 %1495 }
 0x55f   : > { %2065 = vmax.xlane.f32.xlu2 %v4747_v15  ;;  %3678 = vrcp.f32 %v1496_v17 }
 0x561   : > { %v1492_v28 = vpop.xlane.xlu2 %1491 }
 0x565   : > { %3423 = vrot.lane.b32.xlu0 %v4750_v16, %s3870_s24  ;;  %v3679_v25 = vpop.eup %3678 }
 0x566   : > { %v1637_v58 = vmul.f32 %v3679_v25, %v1611_v7 }
 0x569   : > { %v4754_v55 = vpop.xlane.xlu2 %1497 }
 0x56d   : > { %3428 = vrot.lane.b32.xlu0 %v4750_v16, %s3871_s27 }
 0x56f   : > { %2067 = vmax.xlane.f32.xlu1 %v4758_v49 }
 0x571   : > { %v2313_v2 = vpop.permute.xlu0 %2312  ;;  %v4761_v37 = vpop.xlane.xlu2 %1759 }
 0x572   : > { %3189 = vmatmul.msk.f32.gmra.mxu0 %vm556_vm1, %v2313_v2 }
 0x575   : > { %3438 = vrot.lane.b32.xlu0 %v4720_v10, %s3871_s27 }
 0x577   : > { %1656 = vrot.lane.b32.xlu2 %v1637_v58, %s3876_s6 }
 0x579   : > { %v2621_v59 = vpop.permute.xlu0 %2620  ;;  %v4767_v23 = vpop.xlane.xlu2 %1503 }
 0x57a   : > { %3197 = vmatmul.msk.f32.gmra.mxu1 %vm556_vm1, %v2621_v59  ;;  %3190 = vmatmul.msk.f32.gmra.mxu0 %vm556_vm1, %v2315_v36 }
 0x57d   : > { %3453 = vrot.lane.b32.xlu0 %v4769_v22, %s3870_s24 }
 0x581   : > { %v2623_v52 = vpop.permute.xlu0 %2622  ;;  %v3414_v9 = vpop.permute.xlu2 %3413 }
 0x582   : > { %3198 = vmatmul.msk.f32.gmra.mxu1 %vm556_vm1, %v2623_v52  ;;  %v3415_v62 = vunpack.i.l.bf16 %v3414_v9  ;;  %v3416_v33 = vunpack.i.h.bf16 %v3414_v9 }
 0x585   : > { %3458 = vrot.lane.b32.xlu0 %v4769_v22, %s3871_s27 }
 0x586   : > { %v1500_v60 = vpop.xlane.xlu1 %1499 }
 0x587   : > { %3680 = vrcp.f32 %v1500_v60 }
 0x588   : > { %3682 = vrcp.f32 %v1492_v28 }
 0x589   : > { %v3404_v12 = vpop.permute.xlu0 %3403  ;;  %v4778_v31 = vpop.permute.xlu2 %3433  ;;  %3684 = vrcp.f32 %v4754_v55 }
 0x58a   : > { %v3405_v30 = vunpack.i.l.bf16 %v3404_v12  ;;  %v3406_v34 = vunpack.i.h.bf16 %v3404_v12  ;;  %v4826_v55 = vpop.f32.mrf.mxu1  ;;  %v3435_v36 = vunpack.i.l.bf16 %v4778_v31  ;;  %v3436_v59 = vunpack.i.h.bf16 %v4778_v31 }
 0x58c   : > { %1893 = vmatpush.msrb.mxu2 %v3405_v30 }
 0x58d   : > { %v3681_v20 = vpop.eup %3680  ;;  %3463 = vrot.lane.b32.xlu0 %v4736_v47, %s3870_s24 }
 0x58e   : > { %1894 = vmatpush.msrb.mxu2 %v3406_v34  ;;  %v1639_v39 = vmul.f32 %v3681_v20, %v1617_v48  ;;  %v3683_v14 = vpop.eup %3682  ;;  %v4794_v40 = vpop.xlane.xlu1 %1761 }
 0x58f   : > { %v1635_v29 = vmul.f32 %v3683_v14, %v4738_v35  ;;  %v3685_v43 = vpop.eup %3684  ;;  %v4806_v35 = vpop.f32.mrf.mxu0 }
 0x590   : > { %1660 = vrot.lane.b32.xlu1 %v1639_v39, %s3876_s6  ;;  %1895 = vmatpush.msrb.mxu2 %v3415_v62  ;;  %v1638_v50 = vmul.f32 %v3685_v43, %v1614_v51  ;;  %v1620_v62 = vpop.f32.mrf.mxu3  ;;  %v1773_v43 = vsub.f32 %v4652_v44, %v4730_v41  ;;  %v1774_v44 = vsub.f32 %v4690_v38, %v4761_v37 }
 0x591   : > { %v3409_v0 = vpop.permute.xlu0 %3408  ;;  %v4783_v6 = vpop.permute.xlu2 %3448  ;;  %v1775_v38 = vsub.f32 %v4711_v1, %v4794_v40 }
 0x592   : > { %v3410_v11 = vunpack.i.l.bf16 %v3409_v0  ;;  %1896 = vmatpush.msrb.mxu2 %v3416_v33  ;;  %v3411_v8 = vunpack.i.h.bf16 %v3409_v0  ;;  %v3450_v33 = vunpack.i.l.bf16 %v4783_v6  ;;  %v3451_v61 = vunpack.i.h.bf16 %v4783_v6 }
 0x594   : > { %2201 = vmatpush.msra.mxu3 %v3410_v11 }
 0x595   : > { %3473 = vrot.lane.b32.xlu0 %v4785_v3, %s3870_s24 }
 0x596   : > { %2202 = vmatpush.msra.mxu3 %v3411_v8 }
 0x597   : > { %v4811_v5 = vpop.f32.mrf.mxu0 }
 0x598   : > { %v1623_v0 = vpop.f32.mrf.mxu3 }
 0x599   : > { %v1651_v27 = vpop.permute.xlu2 %1650 }
 0x59a   : > { %1675 = vst.msk [vmem:[#allocation5] sm:$0xff] %vm1674_vm4, %v1651_v27 }
 0x59d   : > { %1652 = vrot.lane.b32.xlu0 %v1635_v29, %s3876_s6 }
 0x59f   : > { %v4821_v54 = vpop.f32.mrf.mxu0 }
 0x5a0   : > { %1763 = vmax.xlane.f32.xlu2 %v4796_v13 }
 0x5a5   : > { %3478 = vrot.lane.b32.xlu0 %v4785_v3, %s3871_s27 }
 0x5a6   : > { %v3444_v19 = vpop.permute.xlu1 %3443 }
 0x5a7   : > { %v3445_v52 = vunpack.i.l.bf16 %v3444_v19  ;;  %v3446_v51 = vunpack.i.h.bf16 %v3444_v19 }
 0x5a8   : > { %2071 = vmax.xlane.f32.xlu2 %v4802_v42 }
 0x5ad   : > { %1658 = vrot.lane.b32.xlu0 %v1638_v50, %s3876_s6 }
 0x5ae   : > { %v4808_v57 = vpop.permute.xlu1 %3468 }
 0x5af   : > { %v3470_v6 = vunpack.i.l.bf16 %v4808_v57  ;;  %v3471_v50 = vunpack.i.h.bf16 %v4808_v57 }
 0x5b0   : > { %1765 = vmax.xlane.f32.xlu2 %v4806_v35 }
 0x5b7   : > { %v1655_v4 = vpop.permute.xlu1 %1654 }
 0x5b8   : > { %1677 = vst.msk [vmem:[#allocation5 + $0x10] sm:$0xff] %vm1674_vm4, %v1655_v4  ;;  %1767 = vmax.xlane.f32.xlu2 %v4811_v5 }
 0x5ba   : > { %2073 = vmax.xlane.f32.xlu1 %v4813_v26 }
 0x5bc   : > { %v1502_v53 = vpop.xlane.xlu0 %1501 }
 0x5bd   : > { %3686 = vrcp.f32 %v1502_v53  ;;  %v4854_v53 = vpop.f32.mrf.mxu0 }
 0x5be   : > { %3688 = vrcp.f32 %v4767_v23 }
 0x5c2   : > { %2075 = vmax.xlane.f32.xlu1 %v4818_v45 }
 0x5c3   : > { %v3687_v30 = vpop.eup %3686 }
 0x5c4   : > { %v1640_v48 = vmul.f32 %v3687_v30, %v1620_v62  ;;  %v3689_v39 = vpop.eup %3688 }
 0x5c5   : > { %v1641_v23 = vmul.f32 %v3689_v39, %v1623_v0  ;;  %v4864_v41 = vpop.f32.mrf.mxu0 }
 0x5ca   : > { %1769 = vmax.xlane.f32.xlu1 %v4821_v54 }
 0x5cf   : > { %v3419_v28 = vpop.permute.xlu0 %3418 }
 0x5d0   : > { %v3420_v17 = vunpack.i.l.bf16 %v3419_v28  ;;  %3483 = vrot.lane.b32.xlu2 %v4706_v63, %s3874_s4  ;;  %v3421_v2 = vunpack.i.h.bf16 %v3419_v28 }
 0x5d2   : > { %2203 = vmatpush.msra.mxu3 %v3420_v17  ;;  %v4828_v25 = vpop.xlane.xlu2 %2065  ;;  %2077 = vmax.xlane.f32.xlu1 %v4826_v55 }
 0x5d3   : > { %v2081_v37 = vsub.f32 %v4747_v15, %v4828_v25 }
 0x5d4   : > { %2204 = vmatpush.msra.mxu3 %v3421_v2 }
 0x5d7   : > { %v3424_v7 = vpop.permute.xlu0 %3423  ;;  %2069 = vmax.xlane.f32.xlu0 %v4791_v21 }
 0x5d8   : > { %v3425_v58 = vunpack.i.l.bf16 %v3424_v7  ;;  %3503 = vrot.lane.b32.xlu2 %v4750_v16, %s3874_s4  ;;  %v3426_v18 = vunpack.i.h.bf16 %v3424_v7  ;;  %v1783_v7 = vmul.f32 1.442695, %v1774_v44 }
 0x5da   : > { %v1657_v56 = vpop.permute.xlu2 %1656  ;;  %1897 = vmatpush.msrb.mxu2 %v3425_v58 }
 0x5db   : > { %1678 = vst.msk [vmem:[#allocation5 + $0x18] sm:$0xff] %vm1674_vm4, %v1657_v56  ;;  %v1785_v56 = vmul.f32 1.442695, %v1775_v38 }
 0x5dc   : > { %1898 = vmatpush.msrb.mxu2 %v3426_v18 }
 0x5de   : > { %1899 = vmatpush.msrb.mxu2 %v3435_v36 }
 0x5df   : > { %v3429_v9 = vpop.permute.xlu0 %3428 }
 0x5e0   : > { %v3430_v60 = vunpack.i.l.bf16 %v3429_v9  ;;  %1900 = vmatpush.msrb.mxu2 %v3436_v59  ;;  %v3431_v12 = vunpack.i.h.bf16 %v3429_v9 }
 0x5e2   : > { %2205 = vmatpush.msra.mxu3 %v3430_v60  ;;  %1901 = vmatpush.msrb.mxu2 %v3445_v52  ;;  %v2068_v29 = vpop.xlane.xlu1 %2067 }
 0x5e3   : > { %v2082_v1 = vsub.f32 %v4758_v49, %v2068_v29 }
 0x5e4   : > { %2206 = vmatpush.msra.mxu3 %v3431_v12  ;;  %1902 = vmatpush.msrb.mxu2 %v3446_v51 }
 0x5e5   : > { %v2091_v59 = vmul.f32 1.442695, %v2082_v1 }
 0x5e7   : > { %v3439_v34 = vpop.permute.xlu0 %3438 }
 0x5e8   : > { %v3440_v20 = vunpack.i.l.bf16 %v3439_v34  ;;  %v3441_v31 = vunpack.i.h.bf16 %v3439_v34 }
 0x5ea   : > { %2207 = vmatpush.msra.mxu3 %v3440_v20  ;;  %v4902_v20 = vpop.f32.mrf.mxu1 }
 0x5eb   : > { %1662 = vrot.lane.b32.xlu0 %v1640_v48, %s3876_s6  ;;  %3493 = vrot.lane.b32.xlu1 %v4713_v46, %s3874_s4 }
 0x5ec   : > { %2208 = vmatpush.msra.mxu3 %v3441_v31 }
 0x5ee   : > { %2209 = vmatpush.msra.mxu3 %v3450_v33 }
 0x5ef   : > { %v3454_v24 = vpop.permute.xlu0 %3453 }
 0x5f0   : > { %v3455_v11 = vunpack.i.l.bf16 %v3454_v24  ;;  %2210 = vmatpush.msra.mxu3 %v3451_v61  ;;  %v3456_v8 = vunpack.i.h.bf16 %v3454_v24 }
 0x5f2   : > { %1903 = vmatpush.msrb.mxu2 %v3455_v11  ;;  %v4911_v24 = vpop.f32.mrf.mxu1 }
 0x5f3   : > { %1664 = vrot.lane.b32.xlu0 %v1641_v23, %s3876_s6  ;;  %3513 = vrot.lane.b32.xlu1 %v4720_v10, %s3874_s4 }
 0x5f4   : > { %1904 = vmatpush.msrb.mxu2 %v3456_v8 }
 0x5f7   : > { %v3459_v14 = vpop.permute.xlu0 %3458 }
 0x5f8   : > { %v3460_v27 = vunpack.i.l.bf16 %v3459_v14  ;;  %v3461_v19 = vunpack.i.h.bf16 %v3459_v14 }
 0x5fa   : > { %2211 = vmatpush.msra.mxu3 %v3460_v27  ;;  %v4922_v14 = vpop.f32.mrf.mxu1 }
 0x5fb   : > { %3488 = vrot.lane.b32.xlu0 %v4706_v63, %s3875_s5  ;;  %3518 = vrot.lane.b32.xlu1 %v4720_v10, %s3875_s5  ;;  %v1781_v63 = vmul.f32 1.442695, %v1773_v43 }
 0x5fc   : > { %2212 = vmatpush.msra.mxu3 %v3461_v19 }
 0x5fd   : > { %3690 = vpow2.f32 %v1781_v63 }
 0x5fe   : > { %2213 = vmatpush.msra.mxu3 %v3470_v6  ;;  %3692 = vpow2.f32 %v1783_v7 }
 0x5ff   : > { %v3464_v4 = vpop.permute.xlu0 %3463  ;;  %3694 = vpow2.f32 %v1785_v56 }
 0x600   : > { %v3465_v28 = vunpack.i.l.bf16 %v3464_v4  ;;  %2214 = vmatpush.msra.mxu3 %v3471_v50  ;;  %v3466_v17 = vunpack.i.h.bf16 %v3464_v4 }
 0x601   : > { %1771 = vmax.xlane.f32.xlu2 %v4854_v53 }
 0x602   : > { %v1661_v2 = vpop.permute.xlu1 %1660  ;;  %1905 = vmatpush.msrb.mxu2 %v3465_v28  ;;  %v4928_v6 = vpop.f32.mrf.mxu1 }
 0x603   : > { %1680 = vst.msk [vmem:[#allocation5 + $0x28] sm:$0xff] %vm1674_vm4, %v1661_v2  ;;  %3498 = vrot.lane.b32.xlu0 %v4713_v46, %s3875_s5  ;;  %3523 = vrot.lane.b32.xlu1 %v4726_v32, %s3874_s4  ;;  %v4871_v46 = vpop.eup %3690 }
 0x604   : > { %1906 = vmatpush.msrb.mxu2 %v3466_v17 }
 0x607   : > { %v3474_v10 = vpop.permute.xlu0 %3473 }
 0x608   : > { %v3475_v57 = vunpack.i.l.bf16 %v3474_v10  ;;  %v3476_v58 = vunpack.i.h.bf16 %v3474_v10 }
 0x609   : > { %2373 = vmax.xlane.f32.xlu2 %v4864_v41 }
 0x60a   : > { %1907 = vmatpush.msrb.mxu2 %v3475_v57  ;;  %v4937_v63 = vpop.f32.mrf.mxu1 }
 0x60b   : > { %3508 = vrot.lane.b32.xlu0 %v4750_v16, %s3875_s5  ;;  %3528 = vrot.lane.b32.xlu1 %v4726_v32, %s3875_s5  ;;  %v2089_v16 = vmul.f32 1.442695, %v2081_v37  ;;  %v4881_v32 = vpop.eup %3692 }
 0x60c   : > { %1908 = vmatpush.msrb.mxu2 %v3476_v58  ;;  %v4886_v51 = vpop.eup %3694 }
 0x60d   : > { %1909 = vmatmul.f32.vlgmr.msrb.gmra.mxu2 %v4871_v46  ;;  %3696 = vpow2.f32 %v2089_v16 }
 0x60e   : > { %3698 = vpow2.f32 %v2091_v59 }
 0x60f   : > { %v1653_v18 = vpop.permute.xlu0 %1652 }
 0x610   : > { %1676 = vst.msk [vmem:[#allocation5 + $0x8] sm:$0xff] %vm1674_vm4, %v1653_v18 }
 0x613   : > { %v1764_v36 = vpop.xlane.xlu2 %1763  ;;  %3533 = vrot.lane.b32.xlu1 %v4769_v22, %s3874_s4  ;;  %v4890_v12 = vpop.eup %3696 }
 0x614   : > { %v1776_v40 = vsub.f32 %v4796_v13, %v1764_v36  ;;  %v4897_v13 = vpop.eup %3698 }
 0x615   : > { %1912 = vmatmul.f32.gmra.mxu2 %v4881_v32 }
 0x616   : > { %v1787_v52 = vmul.f32 1.442695, %v1776_v40 }
 0x617   : > { %v3479_v15 = vpop.permute.xlu0 %3478 }
 0x618   : > { %v3480_v25 = vunpack.i.l.bf16 %v3479_v15  ;;  %v3481_v9 = vunpack.i.h.bf16 %v3479_v15  ;;  %3700 = vpow2.f32 %v1787_v52 }
 0x61a   : > { %2215 = vmatpush.msra.mxu3 %v3480_v25 }
 0x61b   : > { %v2072_v60 = vpop.xlane.xlu2 %2071  ;;  %3543 = vrot.lane.b32.xlu1 %v4736_v47, %s3874_s4 }
 0x61c   : > { %2216 = vmatpush.msra.mxu3 %v3481_v9  ;;  %v2084_v2 = vsub.f32 %v4802_v42, %v2072_v60 }
 0x61d   : > { %1915 = vmatmul.f32.gmra.mxu2 %v4886_v51  ;;  %2217 = vmatmul.f32.vlgmr.msra.gmra.mxu3 %v4890_v12 }
 0x61e   : > { %v4899_v62 = vpop.eup %3700  ;;  %v2095_v44 = vmul.f32 1.442695, %v2084_v2 }
 0x61f   : > { %v1659_v49 = vpop.permute.xlu0 %1658 }
 0x620   : > { %1679 = vst.msk [vmem:[#allocation5 + $0x20] sm:$0xff] %vm1674_vm4, %v1659_v49 }
 0x621   : > { %3538 = vrot.lane.b32.xlu2 %v4769_v22, %s3875_s5 }
 0x623   : > { %v1766_v30 = vpop.xlane.xlu2 %1765 }
 0x624   : > { %v1777_v34 = vsub.f32 %v4806_v35, %v1766_v30  ;;  %v4914_v35 = vpop.f32.mrf.mxu0 }
 0x625   : > { %1918 = vmatmul.f32.gmra.mxu2 %v4899_v62  ;;  %2220 = vmatmul.f32.gmra.mxu3 %v4897_v13 }
 0x626   : > { %v1789_v48 = vmul.f32 1.442695, %v1777_v34 }
 0x628   : > { %3702 = vpow2.f32 %v1789_v48 }
 0x629   : > { %3553 = vrot.lane.b32.xlu2 %v4785_v3, %s3874_s4 }
 0x62b   : > { %v1768_v31 = vpop.xlane.xlu2 %1767 }
 0x62c   : > { %v1778_v22 = vsub.f32 %v4811_v5, %v1768_v31  ;;  %v4924_v27 = vpop.f32.mrf.mxu0 }
 0x62d   : > { %v2074_v33 = vpop.xlane.xlu1 %2073 }
 0x62e   : > { %v4909_v39 = vpop.eup %3702  ;;  %v1791_v61 = vmul.f32 1.442695, %v1778_v22  ;;  %v2085_v58 = vsub.f32 %v4813_v26, %v2074_v33 }
 0x62f   : > { %1921 = vmatmul.f32.gmra.mxu2 %v4909_v39 }
 0x630   : > { %3704 = vpow2.f32 %v1791_v61  ;;  %v2097_v42 = vmul.f32 1.442695, %v2085_v58 }
 0x631   : > { %3558 = vrot.lane.b32.xlu2 %v4785_v3, %s3875_s5 }
 0x633   : > { %v3484_v0 = vpop.permute.xlu2 %3483 }
 0x634   : > { %v3486_v11 = vunpack.i.h.bf16 %v3484_v0  ;;  %v3485_v23 = vunpack.i.l.bf16 %v3484_v0  ;;  %v4930_v43 = vpop.f32.mrf.mxu0 }
 0x635   : > { %2079 = vmax.xlane.f32.xlu0 %v4902_v20  ;;  %v2076_v5 = vpop.xlane.xlu1 %2075 }
 0x636   : > { %v4919_v8 = vpop.eup %3704  ;;  %2509 = vmatpush.msra.mxu2 %v3485_v23  ;;  %v2086_v16 = vsub.f32 %v4818_v45, %v2076_v5 }
 0x637   : > { %1924 = vmatmul.f32.gmra.mxu2 %v4919_v8 }
 0x638   : > { %2510 = vmatpush.msra.mxu2 %v3486_v11  ;;  %v2099_v15 = vmul.f32 1.442695, %v2086_v16 }
 0x63b   : > { %v3504_v36 = vpop.permute.xlu2 %3503 }
 0x63c   : > { %v3505_v40 = vunpack.i.l.bf16 %v3504_v36  ;;  %v3506_v25 = vunpack.i.h.bf16 %v3504_v36 }
 0x63d   : > { %2681 = vmax.xlane.f32.xlu0 %v4911_v24  ;;  %v1770_v29 = vpop.xlane.xlu1 %1769 }
 0x63e   : > { %v1779_v3 = vsub.f32 %v4821_v54, %v1770_v29  ;;  %v4940_v54 = vpop.f32.mrf.mxu0 }
 0x640   : > { %v1793_v19 = vmul.f32 1.442695, %v1779_v3 }
 0x642   : > { %3706 = vpow2.f32 %v1793_v19 }
 0x645   : > { %2375 = vmax.xlane.f32.xlu1 %v4914_v35  ;;  %v2078_v57 = vpop.xlane.xlu1 %2077 }
 0x646   : > { %v4951_v7 = vpop.f32.mrf.mxu0  ;;  %v2087_v49 = vsub.f32 %v4826_v55, %v2078_v57 }
 0x648   : > { %v4933_v50 = vpop.eup %3706  ;;  %v2101_v34 = vmul.f32 1.442695, %v2087_v49 }
 0x649   : > { %1927 = vmatmul.f32.gmra.mxu2 %v4933_v50 }
 0x64a   : > { %v2070_v4 = vpop.xlane.xlu0 %2069 }
 0x64b   : > { %v2083_v28 = vsub.f32 %v4791_v21, %v2070_v4  ;;  %v4949_v21 = vpop.f32.mrf.mxu1 }
 0x64d   : > { %v2093_v17 = vmul.f32 1.442695, %v2083_v28  ;;  %2685 = vmax.xlane.f32.xlu1 %v4928_v6 }
 0x64e   : > { %v4963_v1 = vpop.f32.mrf.mxu0 }
 0x64f   : > { %3708 = vpow2.f32 %v2093_v17 }
 0x650   : > { %3710 = vpow2.f32 %v2095_v44 }
 0x651   : > { %3548 = vrot.lane.b32.xlu0 %v4736_v47, %s3875_s5  ;;  %3712 = vpow2.f32 %v2097_v42 }
 0x652   : > { %3714 = vpow2.f32 %v2099_v15 }
 0x653   : > { %v4961_v26 = vpop.f32.mrf.mxu1  ;;  %3716 = vpow2.f32 %v2101_v34 }
 0x655   : > { %v4945_v10 = vpop.eup %3708  ;;  %2379 = vmax.xlane.f32.xlu1 %v4930_v43 }
 0x656   : > { %2223 = vmatmul.f32.gmra.mxu3 %v4945_v10  ;;  %v4955_v38 = vpop.eup %3710  ;;  %v4972_v30 = vpop.f32.mrf.mxu0 }
 0x657   : > { %v4966_v59 = vpop.eup %3712 }
 0x658   : > { %v4977_v31 = vpop.eup %3714 }
 0x659   : > { %v4982_v11 = vpop.eup %3716 }
 0x65a   : > { %2377 = vmax.xlane.f32.xlu2 %v4924_v27 }
 0x65b   : > { %v4975_v48 = vpop.f32.mrf.mxu1 }
 0x65d   : > { %v1663_v47 = vpop.permute.xlu0 %1662  ;;  %v3494_v37 = vpop.permute.xlu1 %3493  ;;  %2381 = vmax.xlane.f32.xlu1 %v4940_v54 }
 0x65e   : > { %1681 = vst.msk [vmem:[#allocation5 + $0x30] sm:$0xff] %vm1674_vm4, %v1663_v47  ;;  %v3496_v18 = vunpack.i.h.bf16 %v3494_v37  ;;  %v3495_v56 = vunpack.i.l.bf16 %v3494_v37  ;;  %2226 = vmatmul.f32.gmra.mxu3 %v4955_v38 }
 0x660   : > { %2511 = vmatpush.msra.mxu2 %v3495_v56 }
 0x662   : > { %2512 = vmatpush.msra.mxu2 %v3496_v18  ;;  %2691 = vmax.xlane.f32.xlu2 %v4961_v26 }
 0x664   : > { %2513 = vmatpush.msra.mxu2 %v3505_v40 }
 0x665   : > { %v1665_v52 = vpop.permute.xlu0 %1664  ;;  %v3514_v9 = vpop.permute.xlu1 %3513  ;;  %2383 = vmax.xlane.f32.xlu1 %v4951_v7 }
 0x666   : > { %1682 = vst.msk [vmem:[#allocation5 + $0x38] sm:$0xff] %vm1674_vm4, %v1665_v52  ;;  %v3516_v45 = vunpack.i.h.bf16 %v3514_v9  ;;  %v3515_v60 = vunpack.i.l.bf16 %v3514_v9  ;;  %2229 = vmatmul.f32.gmra.mxu3 %v4966_v59  ;;  %2514 = vmatpush.msra.mxu2 %v3506_v25 }
 0x668   : > { %2515 = vmatpush.msra.mxu2 %v3515_v60 }
 0x66a   : > { %2387 = vmax.xlane.f32.xlu2 %v4972_v30  ;;  %2516 = vmatpush.msra.mxu2 %v3516_v45 }
 0x66d   : > { %v3489_v22 = vpop.permute.xlu0 %3488  ;;  %v3519_v33 = vpop.permute.xlu1 %3518  ;;  %2693 = vmax.xlane.f32.xlu1 %v4975_v48 }
 0x66e   : > { %v3490_v61 = vunpack.i.l.bf16 %v3489_v22  ;;  %2232 = vmatmul.f32.gmra.mxu3 %v4977_v31  ;;  %v3491_v55 = vunpack.i.h.bf16 %v3489_v22  ;;  %v3520_v57 = vunpack.i.l.bf16 %v3519_v33  ;;  %v3521_v42 = vunpack.i.h.bf16 %v3519_v33  ;;  %v4996_v22 = vpop.f32.mrf.mxu1 }
 0x670   : > { %2817 = vmatpush.msrb.mxu3 %v3490_v61 }
 0x672   : > { %2818 = vmatpush.msrb.mxu3 %v3491_v55  ;;  %2105 = vadd.xlane.f32.xlu2 %v4890_v12 }
 0x674   : > { %v1772_v0 = vpop.xlane.xlu2 %1771 }
 0x675   : > { %v1780_v23 = vsub.f32 %v4854_v53, %v1772_v0  ;;  %v3499_v5 = vpop.permute.xlu0 %3498  ;;  %v3524_v29 = vpop.permute.xlu1 %3523  ;;  %1797 = vadd.xlane.f32.xlu1 %v4871_v46 }
 0x676   : > { %v3500_v3 = vunpack.i.l.bf16 %v3499_v5  ;;  %v3525_v19 = vunpack.i.l.bf16 %v3524_v29  ;;  %2235 = vmatmul.f32.gmra.mxu3 %v4982_v11  ;;  %v3526_v28 = vunpack.i.h.bf16 %v3524_v29  ;;  %v3501_v17 = vunpack.i.h.bf16 %v3499_v5 }
 0x677   : > { %v1795_v4 = vmul.f32 1.442695, %v1780_v23 }
 0x678   : > { %2819 = vmatpush.msrb.mxu3 %v3500_v3  ;;  %2517 = vmatpush.msra.mxu2 %v3525_v19 }
 0x679   : > { %3718 = vpow2.f32 %v1795_v4 }
 0x67a   : > { %2820 = vmatpush.msrb.mxu3 %v3501_v17  ;;  %1799 = vadd.xlane.f32.xlu2 %v4881_v32 }
 0x67b   : > { %2683 = vmax.xlane.f32.xlu0 %v4922_v14  ;;  %2518 = vmatpush.msra.mxu2 %v3526_v28 }
 0x67c   : > { %v2374_v53 = vpop.xlane.xlu2 %2373 }
 0x67d   : > { %v3509_v12 = vpop.permute.xlu0 %3508  ;;  %v3529_v2 = vpop.permute.xlu1 %3528  ;;  %v2389_v36 = vsub.f32 %v4864_v41, %v2374_v53 }
 0x67e   : > { %v3510_v46 = vunpack.i.l.bf16 %v3509_v12  ;;  %v3511_v58 = vunpack.i.h.bf16 %v3509_v12  ;;  %v3530_v47 = vunpack.i.l.bf16 %v3529_v2  ;;  %v3531_v18 = vunpack.i.h.bf16 %v3529_v2 }
 0x67f   : > { %v4989_v44 = vpop.eup %3718  ;;  %v2397_v25 = vmul.f32 1.442695, %v2389_v36 }
 0x680   : > { %1930 = vmatmul.f32.gmra.mxu2 %v4989_v44  ;;  %2821 = vmatpush.msrb.mxu3 %v3510_v46 }
 0x681   : > { %3720 = vpow2.f32 %v2397_v25 }
 0x682   : > { %2822 = vmatpush.msrb.mxu3 %v3511_v58 }
 0x683   : > { %2687 = vmax.xlane.f32.xlu0 %v4937_v63 }
 0x684   : > { %v3539_v32 = vpop.permute.xlu2 %3538  ;;  %2823 = vmatpush.msrb.mxu3 %v3520_v57 }
 0x685   : > { %v3534_v37 = vpop.permute.xlu1 %3533  ;;  %v3540_v40 = vunpack.i.l.bf16 %v3539_v32  ;;  %v3541_v15 = vunpack.i.h.bf16 %v3539_v32 }
 0x686   : > { %v3536_v56 = vunpack.i.h.bf16 %v3534_v37  ;;  %v3535_v16 = vunpack.i.l.bf16 %v3534_v37  ;;  %2824 = vmatpush.msrb.mxu3 %v3521_v42 }
 0x687   : > { %v3721_v41 = vpop.eup %3720 }
 0x688   : > { %2519 = vmatpush.msra.mxu2 %v3535_v16  ;;  %2825 = vmatpush.msrb.mxu3 %v3530_v47 }
 0x68a   : > { %2520 = vmatpush.msra.mxu2 %v3536_v56  ;;  %2826 = vmatpush.msrb.mxu3 %v3531_v18 }
 0x68b   : > { %2689 = vmax.xlane.f32.xlu0 %v4949_v21 }
 0x68c   : > { %2827 = vmatpush.msrb.mxu3 %v3540_v40  ;;  %v3554_v9 = vpop.permute.xlu2 %3553 }
 0x68d   : > { %v3544_v52 = vpop.permute.xlu1 %3543  ;;  %v3555_v49 = vunpack.i.l.bf16 %v3554_v9  ;;  %v3556_v34 = vunpack.i.h.bf16 %v3554_v9 }
 0x68e   : > { %v3546_v45 = vunpack.i.h.bf16 %v3544_v52  ;;  %v3545_v60 = vunpack.i.l.bf16 %v3544_v52  ;;  %2828 = vmatpush.msrb.mxu3 %v3541_v15 }
 0x690   : > { %2521 = vmatpush.msra.mxu2 %v3545_v60  ;;  %v5013_v40 = vpop.f32.mrf.mxu2 }
 0x692   : > { %2522 = vmatpush.msra.mxu2 %v3546_v45 }
 0x693   : > { %2385 = vmax.xlane.f32.xlu0 %v4963_v1 }
 0x694   : > { %2523 = vmatpush.msra.mxu2 %v3555_v49 }
 0x696   : > { %2524 = vmatpush.msra.mxu2 %v3556_v34 }
 0x697   : > { %2525 = vmatmul.f32.vlgmr.msra.gmra.mxu2 %v3721_v41 }
 0x698   : > { %v5019_v52 = vpop.f32.mrf.mxu2 }
 0x69b   : > { %2695 = vmax.xlane.f32.xlu0 %v4996_v22 }
 0x6a0   : > { %v5024_v49 = vpop.f32.mrf.mxu2 }
 0x6a3   : > { %2413 = vadd.xlane.f32.xlu0 %v3721_v41 }
 0x6a8   : > { %v2080_v33 = vpop.xlane.xlu0 %2079 }
 0x6a9   : > { %v2088_v61 = vsub.f32 %v4902_v20, %v2080_v33 }
 0x6ab   : > { %v2103_v55 = vmul.f32 1.442695, %v2088_v61  ;;  %2107 = vadd.xlane.f32.xlu0 %v4897_v13  ;;  %v5029_v61 = vpop.f32.mrf.mxu2 }
 0x6ad   : > { %3722 = vpow2.f32 %v2103_v55 }
 0x6b0   : > { %v2682_v0 = vpop.xlane.xlu0 %2681 }
 0x6b1   : > { %v2697_v23 = vsub.f32 %v4911_v24, %v2682_v0 }
 0x6b3   : > { %v5002_v5 = vpop.eup %3722  ;;  %v2705_v29 = vmul.f32 1.442695, %v2697_v23  ;;  %1801 = vadd.xlane.f32.xlu0 %v4886_v51  ;;  %v3559_v51 = vpop.permute.xlu2 %3558 }
 0x6b4   : > { %2238 = vmatmul.f32.gmra.mxu3 %v5002_v5  ;;  %v3560_v46 = vunpack.i.l.bf16 %v3559_v51  ;;  %v3561_v58 = vunpack.i.h.bf16 %v3559_v51  ;;  %v5031_v0 = vpop.f32.mrf.mxu2 }
 0x6b5   : > { %3724 = vpow2.f32 %v2705_v29 }
 0x6b8   : > { %v2376_v3 = vpop.xlane.xlu1 %2375 }
 0x6b9   : > { %v2390_v19 = vsub.f32 %v4914_v35, %v2376_v3 }
 0x6bb   : > { %v3725_v4 = vpop.eup %3724  ;;  %v2399_v20 = vmul.f32 1.442695, %v2390_v19 }
 0x6bc   : > { %2721 = vadd.xlane.f32.xlu1 %v3725_v4 }
 0x6bd   : > { %3726 = vpow2.f32 %v2399_v20  ;;  %v5038_v20 = vpop.f32.mrf.mxu2 }
 0x6c0   : > { %v2686_v13 = vpop.xlane.xlu1 %2685 }
 0x6c1   : > { %v2699_v28 = vsub.f32 %v4928_v6, %v2686_v13 }
 0x6c3   : > { %v3727_v17 = vpop.eup %3726  ;;  %v2709_v24 = vmul.f32 1.442695, %v2699_v28  ;;  %v3549_v53 = vpop.permute.xlu0 %3548 }
 0x6c4   : > { %v3550_v12 = vunpack.i.l.bf16 %v3549_v53  ;;  %2528 = vmatmul.f32.gmra.mxu2 %v3727_v17  ;;  %2415 = vadd.xlane.f32.xlu1 %v3727_v17  ;;  %v3551_v2 = vunpack.i.h.bf16 %v3549_v53 }
 0x6c5   : > { %3728 = vpow2.f32 %v2709_v24 }
 0x6c6   : > { %2829 = vmatpush.msrb.mxu3 %v3550_v12 }
 0x6c8   : > { %2830 = vmatpush.msrb.mxu3 %v3551_v2  ;;  %v2380_v35 = vpop.xlane.xlu1 %2379 }
 0x6c9   : > { %v2392_v57 = vsub.f32 %v4930_v43, %v2380_v35 }
 0x6ca   : > { %2831 = vmatpush.msrb.mxu3 %v3560_v46 }
 0x6cb   : > { %v3729_v42 = vpop.eup %3728  ;;  %v2403_v47 = vmul.f32 1.442695, %v2392_v57 }
 0x6cc   : > { %2832 = vmatpush.msrb.mxu3 %v3561_v58  ;;  %2109 = vadd.xlane.f32.xlu1 %v4945_v10  ;;  %v5045_v51 = vpop.f32.mrf.mxu2 }
 0x6cd   : > { %3730 = vpow2.f32 %v2403_v47  ;;  %2725 = vadd.xlane.f32.xlu0 %v3729_v42  ;;  %2833 = vmatmul.f32.vlgmr.msrb.gmra.mxu3 %v3725_v4  ;;  %v2378_v6 = vpop.xlane.xlu2 %2377 }
 0x6ce   : > { %v2391_v32 = vsub.f32 %v4924_v27, %v2378_v6 }
 0x6d0   : > { %v2401_v37 = vmul.f32 1.442695, %v2391_v32  ;;  %v2382_v56 = vpop.xlane.xlu1 %2381 }
 0x6d1   : > { %v2393_v16 = vsub.f32 %v4940_v54, %v2382_v56 }
 0x6d2   : > { %3732 = vpow2.f32 %v2401_v37 }
 0x6d3   : > { %v3731_v18 = vpop.eup %3730  ;;  %v2405_v10 = vmul.f32 1.442695, %v2393_v16 }
 0x6d4   : > { %1803 = vadd.xlane.f32.xlu1 %v4899_v62 }
 0x6d5   : > { %2419 = vadd.xlane.f32.xlu0 %v3731_v18  ;;  %v2692_v36 = vpop.xlane.xlu2 %2691  ;;  %3734 = vpow2.f32 %v2405_v10 }
 0x6d6   : > { %v2702_v15 = vsub.f32 %v4961_v26, %v2692_v36 }
 0x6d8   : > { %v3733_v43 = vpop.eup %3732  ;;  %v2384_v27 = vpop.xlane.xlu1 %2383  ;;  %v2715_v25 = vmul.f32 1.442695, %v2702_v15 }
 0x6d9   : > { %2531 = vmatmul.f32.gmra.mxu2 %v3733_v43  ;;  %v2394_v62 = vsub.f32 %v4951_v7, %v2384_v27 }
 0x6da   : > { %3736 = vpow2.f32 %v2715_v25 }
 0x6db   : > { %v2407_v54 = vmul.f32 1.442695, %v2394_v62  ;;  %v3735_v9 = vpop.eup %3734 }
 0x6dd   : > { %2113 = vadd.xlane.f32.xlu0 %v4966_v59  ;;  %3738 = vpow2.f32 %v2407_v54  ;;  %v2388_v19 = vpop.xlane.xlu2 %2387 }
 0x6e0   : > { %v3737_v45 = vpop.eup %3736  ;;  %v2694_v53 = vpop.xlane.xlu1 %2693 }
 0x6e1   : > { %2534 = vmatmul.f32.gmra.mxu2 %v3731_v18 }
 0x6e3   : > { %v5022_v60 = vpop.eup %3738 }
 0x6e5   : > { %1807 = vadd.xlane.f32.xlu0 %v4919_v8 }
 0x6e9   : > { %2537 = vmatmul.f32.gmra.mxu2 %v3735_v9 }
 0x6ed   : > { %2731 = vadd.xlane.f32.xlu0 %v3737_v45 }
 0x6ee   : > { %v2684_v59 = vpop.xlane.xlu0 %2683 }
 0x6ef   : > { %v2698_v26 = vsub.f32 %v4922_v14, %v2684_v59 }
 0x6f1   : > { %v2707_v34 = vmul.f32 1.442695, %v2698_v26  ;;  %2540 = vmatmul.f32.gmra.mxu2 %v5022_v60 }
 0x6f3   : > { %3740 = vpow2.f32 %v2707_v34 }
 0x6f5   : > { %2117 = vadd.xlane.f32.xlu0 %v4982_v11  ;;  %v5034_v11 = vpop.f32.mrf.mxu3 }
 0x6f6   : > { %v2688_v8 = vpop.xlane.xlu0 %2687 }
 0x6f7   : > { %v2700_v7 = vsub.f32 %v4937_v63, %v2688_v8 }
 0x6f9   : > { %v3741_v41 = vpop.eup %3740  ;;  %v2711_v33 = vmul.f32 1.442695, %v2700_v7 }
 0x6fa   : > { %2836 = vmatmul.f32.gmra.mxu3 %v3741_v41  ;;  %2723 = vadd.xlane.f32.xlu2 %v3741_v41 }
 0x6fb   : > { %3742 = vpow2.f32 %v2711_v33 }
 0x6fd   : > { %v5041_v17 = vpop.f32.mrf.mxu3 }
 0x6fe   : > { %v2690_v14 = vpop.xlane.xlu0 %2689 }
 0x6ff   : > { %v2701_v23 = vsub.f32 %v4949_v21, %v2690_v14  ;;  %v2396_v21 = vsub.f32 %v4972_v30, %v2388_v19  ;;  %v2106_v30 = vpop.xlane.xlu2 %2105 }
 0x701   : > { %v3743_v55 = vpop.eup %3742  ;;  %v2713_v29 = vmul.f32 1.442695, %v2701_v23  ;;  %v2411_v24 = vmul.f32 1.442695, %v2396_v21 }
 0x702   : > { %2839 = vmatmul.f32.gmra.mxu3 %v3729_v42  ;;  %2727 = vadd.xlane.f32.xlu1 %v3743_v55 }
 0x703   : > { %2417 = vadd.xlane.f32.xlu2 %v3733_v43  ;;  %3744 = vpow2.f32 %v2713_v29  ;;  %v1798_v43 = vpop.xlane.xlu1 %1797 }
 0x705   : > { %v5048_v2 = vpop.f32.mrf.mxu3 }
 0x706   : > { %v2386_v63 = vpop.xlane.xlu0 %2385 }
 0x707   : > { %v2395_v3 = vsub.f32 %v4963_v1, %v2386_v63  ;;  %v2703_v1 = vsub.f32 %v4975_v48, %v2694_v53  ;;  %v1800_v58 = vpop.xlane.xlu2 %1799 }
 0x709   : > { %v2409_v4 = vmul.f32 1.442695, %v2395_v3  ;;  %v3745_v28 = vpop.eup %3744 }
 0x70a   : > { %2842 = vmatmul.f32.gmra.mxu3 %v3743_v55  ;;  %2421 = vadd.xlane.f32.xlu1 %v3735_v9 }
 0x70b   : > { %3746 = vpow2.f32 %v2409_v4  ;;  %2111 = vadd.xlane.f32.xlu2 %v4955_v38  ;;  %v2717_v38 = vmul.f32 1.442695, %v2703_v1 }
 0x70c   : > { %3748 = vpow2.f32 %v2411_v24 }
 0x70d   : > { %3750 = vpow2.f32 %v2717_v38  ;;  %v5057_v47 = vpop.f32.mrf.mxu3 }
 0x70e   : > { %v2696_v13 = vpop.xlane.xlu0 %2695 }
 0x70f   : > { %v2704_v48 = vsub.f32 %v4996_v22, %v2696_v13 }
 0x711   : > { %v3747_v12 = vpop.eup %3746 }
 0x712   : > { %2845 = vmatmul.f32.gmra.mxu3 %v3745_v28  ;;  %2115 = vadd.xlane.f32.xlu1 %v4977_v31  ;;  %v5050_v35 = vpop.eup %3748  ;;  %v5055_v31 = vpop.f32.mrf.mxu2 }
 0x713   : > { %2425 = vadd.xlane.f32.xlu0 %v3747_v12  ;;  %2543 = vmatmul.f32.gmra.mxu2 %v3747_v12  ;;  %v3751_v57 = vpop.eup %3750 }
 0x714   : > { %1805 = vadd.xlane.f32.xlu2 %v4909_v39  ;;  %v2719_v39 = vmul.f32 1.442695, %v2704_v48 }
 0x715   : > { %v5064_v37 = vpop.f32.mrf.mxu3 }
 0x716   : > { %v2414_v46 = vpop.xlane.xlu0 %2413 }
 0x717   : > { %3752 = vrcp.f32 %v2414_v46 }
 0x718   : > { %3754 = vpow2.f32 %v2719_v39 }
 0x719   : > { %3756 = vrcp.f32 %v1800_v58 }
 0x71a   : > { %2848 = vmatmul.f32.gmra.mxu3 %v3737_v45  ;;  %1809 = vadd.xlane.f32.xlu1 %v4933_v50  ;;  %v2526_v6 = vpop.f32.mrf.mxu2  ;;  %3758 = vrcp.f32 %v2106_v30 }
 0x71b   : > { %2546 = vmatmul.f32.gmra.mxu2 %v5050_v35  ;;  %3760 = vrcp.f32 %v1798_v43  ;;  %v2928_v43 = vld [vmem:[%s5253_s2 + $0x28] sm:$0xff] }
 0x71c   : > { %2729 = vadd.xlane.f32.xlu2 %v3745_v28 }
 0x71d   : > { %v3753_v42 = vpop.eup %3752  ;;  %v5070_v36 = vpop.f32.mrf.mxu3 }
 0x71e   : > { %v2558_v50 = vmul.f32 %v3753_v42, %v2526_v6  ;;  %v5061_v22 = vpop.eup %3754  ;;  %v2108_v25 = vpop.xlane.xlu0 %2107 }
 0x71f   : > { %v3757_v32 = vpop.eup %3756 }
 0x720   : > { %v1943_v18 = vmul.f32 %v3757_v32, %v5019_v52  ;;  %v3759_v56 = vpop.eup %3758 }
 0x721   : > { %v2250_v16 = vmul.f32 %v3759_v56, %v5034_v11  ;;  %v3761_v10 = vpop.eup %3760  ;;  %v2929_v56 = vld [vmem:[%s5253_s2 + $0x30] sm:$0xff] }
 0x722   : > { %2851 = vmatmul.f32.gmra.mxu3 %v3751_v57  ;;  %v1942_v15 = vmul.f32 %v3761_v10, %v5013_v40 }
 0x724   : > { %2423 = vadd.xlane.f32.xlu2 %v5022_v60 }
 0x725   : > { %v5074_v27 = vpop.f32.mrf.mxu3 }
 0x726   : > { %v1802_v54 = vpop.xlane.xlu0 %1801 }
 0x727   : > { %2574 = vrot.lane.b32.xlu0 %v2558_v50, %s3877_s7 }
 0x72a   : > { %2854 = vmatmul.f32.gmra.mxu3 %v5061_v22 }
 0x72f   : > { %1960 = vrot.lane.b32.xlu0 %v1943_v18, %s3878_s8  ;;  %v2722_v62 = vpop.xlane.xlu1 %2721 }
 0x730   : > { %3762 = vrcp.f32 %v2722_v62 }
 0x731   : > { %3764 = vrcp.f32 %v2108_v25 }
 0x733   : > { %2266 = vrot.lane.b32.xlu1 %v2250_v16, %s3879_s9 }
 0x736   : > { %v3763_v9 = vpop.eup %3762 }
 0x737   : > { %v5076_v52 = vpop.f32.mrf.mxu3  ;;  %v2416_v60 = vpop.xlane.xlu1 %2415 }
 0x738   : > { %v3765_v55 = vpop.eup %3764 }
 0x739   : > { %v2251_v23 = vmul.f32 %v3765_v55, %v5041_v17 }
 0x73c   : > { %1958 = vrot.lane.b32.xlu2 %v1942_v15, %s3878_s8 }
 0x73f   : > { %v2110_v8 = vpop.xlane.xlu1 %2109 }
 0x740   : > { %v5079_v26 = vpop.xlane.xlu0 %2725 }
 0x747   : > { %v1804_v14 = vpop.xlane.xlu1 %1803  ;;  %v2529_v21 = vpop.f32.mrf.mxu2 }
 0x748   : > { %v5082_v40 = vpop.xlane.xlu0 %2419 }
 0x750   : > { %v2834_v45 = vpop.f32.mrf.mxu3  ;;  %v2114_v34 = vpop.xlane.xlu0 %2113 }
 0x751   : > { %v2866_v59 = vmul.f32 %v3763_v9, %v2834_v45  ;;  %v2927_v45 = vld [vmem:[%s5253_s2 + $0x20] sm:$0xff] }
 0x753   : > { %2882 = vrot.lane.b32.xlu1 %v2866_v59, %s3880_s10  ;;  %v2926_v59 = vld [vmem:[%s5253_s2 + $0x18] sm:$0xff] }
 0x758   : > { %v5084_v41 = vpop.xlane.xlu0 %1807 }
 0x759   : > { %2119 = vadd.xlane.f32.xlu0 %v5002_v5 }
 0x75c   : > { %v2532_v53 = vpop.f32.mrf.mxu2 }
 0x760   : > { %v5091_v3 = vpop.xlane.xlu0 %2731 }
 0x764   : > { %v2535_v10 = vpop.f32.mrf.mxu2 }
 0x765   : > { %2733 = vadd.xlane.f32.xlu2 %v3751_v57 }
 0x76d   : > { %v2724_v7 = vpop.xlane.xlu2 %2723 }
 0x76e   : > { %3766 = vrcp.f32 %v2724_v7 }
 0x76f   : > { %3768 = vrcp.f32 %v1802_v54 }
 0x774   : > { %v3767_v11 = vpop.eup %3766 }
 0x775   : > { %v2728_v19 = vpop.xlane.xlu1 %2727  ;;  %v3769_v4 = vpop.eup %3768 }
 0x776   : > { %v2418_v33 = vpop.xlane.xlu2 %2417  ;;  %v1944_v13 = vmul.f32 %v3769_v4, %v5024_v49 }
 0x777   : > { %3770 = vrcp.f32 %v2418_v33  ;;  %v2923_v33 = vld [vmem:[%s5253_s2] sm:$0xff] }
 0x778   : > { %3772 = vrcp.f32 %v1804_v14 }
 0x779   : > { %3774 = vrcp.f32 %v2416_v60  ;;  %v2538_v60 = vpop.f32.mrf.mxu2 }
 0x77a   : > { %3776 = vrcp.f32 %v2728_v19 }
 0x77b   : > { %3778 = vrcp.f32 %v2110_v8 }
 0x77c   : > { %3780 = vrcp.f32 %v2114_v34 }
 0x77d   : > { %2268 = vrot.lane.b32.xlu2 %v2251_v23, %s3879_s9  ;;  %v2837_v5 = vpop.f32.mrf.mxu3  ;;  %1811 = vadd.xlane.f32.xlu1 %v4989_v44  ;;  %v5099_v44 = vpop.xlane.xlu0 %2117  ;;  %3782 = vrcp.f32 %v5079_v26 }
 0x77e   : > { %v2867_v29 = vmul.f32 %v3767_v11, %v2837_v5  ;;  %v5089_v63 = vpop.xlane.xlu2 %2111  ;;  %v5101_v17 = vpop.xlane.xlu1 %2421 }
 0x77f   : > { %v3771_v24 = vpop.eup %3770 }
 0x780   : > { %2884 = vrot.lane.b32.xlu0 %v2867_v29, %s3880_s10  ;;  %v2560_v12 = vmul.f32 %v3771_v24, %v2532_v53  ;;  %v3773_v46 = vpop.eup %3772 }
 0x781   : > { %v3775_v57 = vpop.eup %3774  ;;  %v2541_v11 = vpop.f32.mrf.mxu2 }
 0x782   : > { %v2559_v42 = vmul.f32 %v3775_v57, %v2529_v21  ;;  %v3777_v6 = vpop.eup %3776 }
 0x783   : > { %v3779_v16 = vpop.eup %3778 }
 0x784   : > { %v3781_v25 = vpop.eup %3780  ;;  %v2252_v62 = vmul.f32 %v3779_v16, %v5048_v2  ;;  %v2925_v2 = vld [vmem:[%s5253_s2 + $0x10] sm:$0xff] }
 0x785   : > { %2427 = vadd.xlane.f32.xlu1 %v5050_v35  ;;  %v2840_v38 = vpop.f32.mrf.mxu3  ;;  %v1945_v35 = vmul.f32 %v3773_v46, %v5029_v61  ;;  %v2930_v61 = vld [vmem:[%s5253_s2 + $0x38] sm:$0xff]  ;;  %v2254_v9 = vmul.f32 %v3781_v25, %v5064_v37  ;;  %v2924_v37 = vld [vmem:[%s5253_s2 + $0x8] sm:$0xff] }
 0x786   : > { %v5104_v30 = vpop.xlane.xlu0 %2425  ;;  %v5106_v49 = vpop.xlane.xlu1 %2115  ;;  %2964 = vmatpush.msra.mxu0 %v2930_v61 }
 0x787   : > { %v5096_v28 = vpop.xlane.xlu2 %1805 }
 0x788   : > { %1962 = vrot.lane.b32.xlu0 %v1944_v13, %s3878_s8  ;;  %2965 = vmatpush.msra.mxu0 %v2929_v56 }
 0x78a   : > { %2966 = vmatpush.msra.mxu0 %v2928_v43 }
 0x78c   : > { %2967 = vmatpush.msra.mxu0 %v2927_v45 }
 0x78d   : > { %v2843_v58 = vpop.f32.mrf.mxu3 }
 0x78e   : > { %v5110_v50 = vpop.xlane.xlu1 %1809  ;;  %v2869_v32 = vmul.f32 %v3777_v6, %v2843_v58  ;;  %2968 = vmatpush.msra.mxu0 %v2926_v59 }
 0x78f   : > { %v2730_v1 = vpop.xlane.xlu2 %2729 }
 0x790   : > { %2578 = vrot.lane.b32.xlu0 %v2560_v12, %s3877_s7  ;;  %3784 = vrcp.f32 %v2730_v1  ;;  %2969 = vmatpush.msra.mxu0 %v2925_v2 }
 0x791   : > { %3786 = vrcp.f32 %v5089_v63 }
 0x792   : > { %2970 = vmatpush.msra.mxu0 %v2924_v37 }
 0x794   : > { %2971 = vmatpush.msra.mxu0 %v2923_v33 }
 0x795   : > { %v2846_v34 = vpop.f32.mrf.mxu3 }
 0x797   : > { %v2424_v48 = vpop.xlane.xlu2 %2423 }
 0x798   : > { %1964 = vrot.lane.b32.xlu0 %v1945_v35, %s3878_s8  ;;  %3788 = vrcp.f32 %v2424_v48 }
 0x799   : > { %v2575_v39 = vpop.permute.xlu0 %2574  ;;  %3790 = vrcp.f32 %v5096_v28 }
 0x79a   : > { %3792 = vrcp.f32 %v5082_v40 }
 0x79b   : > { %3794 = vrcp.f32 %v5099_v44 }
 0x79c   : > { %3796 = vrcp.f32 %v5101_v17 }
 0x79d   : > { %3798 = vrcp.f32 %v5106_v49 }
 0x79e   : > { %2576 = vrot.lane.b32.xlu1 %v2559_v42, %s3877_s7  ;;  %3800 = vrcp.f32 %v5084_v41 }
 0x79f   : > { %v1959_v18 = vpop.permute.xlu2 %1958  ;;  %3802 = vrcp.f32 %v5110_v50 }
 0x7a0   : > { %1983 = vst.msk [vmem:[#allocation5] sm:$0xff] %vm1982_vm5, %v1959_v18  ;;  %2888 = vrot.lane.b32.xlu0 %v2869_v32, %s3880_s10  ;;  %3804 = vrcp.f32 %v5091_v3 }
 0x7a1   : > { %v1961_v15 = vpop.permute.xlu0 %1960  ;;  %3806 = vrcp.f32 %v5104_v30 }
 0x7a2   : > { %1984 = vst.msk [vmem:[#allocation5 + $0x8] sm:$0xff] %vm1982_vm5, %v1961_v15 }
 0x7a5   : > { %v2267_v54 = vpop.permute.xlu1 %2266 }
 0x7a6   : > { %2735 = vadd.xlane.f32.xlu2 %v5061_v22  ;;  %2291 = vst.msk [vmem:[#allocation5] sm:$0xff] %vm2290_vm6, %v2267_v54  ;;  %2270 = vrot.lane.b32.xlu1 %v2252_v62, %s3879_s9  ;;  %v3783_v22 = vpop.eup %3782 }
 0x7a7   : > { %2599 = vst.msk [vmem:[#allocation5] sm:$0xff] %vm2598_vm7, %v2575_v39  ;;  %v3785_v26 = vpop.eup %3784  ;;  %v2868_v8 = vmul.f32 %v3783_v22, %v2840_v38 }
 0x7a8   : > { %2274 = vrot.lane.b32.xlu0 %v2254_v9, %s3879_s9  ;;  %v2870_v7 = vmul.f32 %v3785_v26, %v2846_v34  ;;  %v3787_v14 = vpop.eup %3786 }
 0x7a9   : > { %v3789_v55 = vpop.eup %3788  ;;  %v2253_v23 = vmul.f32 %v3787_v14, %v5057_v47 }
 0x7aa   : > { %v2563_v5 = vmul.f32 %v3789_v55, %v2541_v11  ;;  %v3791_v29 = vpop.eup %3790 }
 0x7ab   : > { %v3793_v63 = vpop.eup %3792  ;;  %v1946_v40 = vmul.f32 %v3791_v29, %v5031_v0 }
 0x7ac   : > { %v3795_v19 = vpop.eup %3794  ;;  %v2561_v4 = vmul.f32 %v3793_v63, %v2535_v10 }
 0x7ad   : > { %v2256_v47 = vmul.f32 %v3795_v19, %v5074_v27  ;;  %v3797_v21 = vpop.eup %3796 }
 0x7ae   : > { %2886 = vrot.lane.b32.xlu1 %v2868_v8, %s3880_s10  ;;  %v3799_v13 = vpop.eup %3798  ;;  %v2562_v44 = vmul.f32 %v3797_v21, %v2538_v60 }
 0x7af   : > { %v2255_v28 = vmul.f32 %v3799_v13, %v5070_v36  ;;  %v3801_v0 = vpop.eup %3800  ;;  %v2849_v36 = vpop.f32.mrf.mxu3 }
 0x7b0   : > { %2890 = vrot.lane.b32.xlu0 %v2870_v7, %s3880_s10  ;;  %v3803_v27 = vpop.eup %3802  ;;  %v1947_v53 = vmul.f32 %v3801_v0, %v5038_v20  ;;  %v2544_v20 = vpop.f32.mrf.mxu2 }
 0x7b1   : > { %v1948_v24 = vmul.f32 %v3803_v27, %v5045_v51  ;;  %v3805_v12 = vpop.eup %3804 }
 0x7b2   : > { %v2871_v1 = vmul.f32 %v3805_v12, %v2849_v36  ;;  %v3807_v46 = vpop.eup %3806 }
 0x7b3   : > { %v2564_v3 = vmul.f32 %v3807_v46, %v2544_v20 }
 0x7b6   : > { %2272 = vrot.lane.b32.xlu1 %v2253_v23, %s3879_s9 }
 0x7b7   : > { %v2852_v35 = vpop.f32.mrf.mxu3 }
 0x7b8   : > { %2584 = vrot.lane.b32.xlu0 %v2563_v5, %s3877_s7  ;;  %v2547_v56 = vpop.f32.mrf.mxu2 }
 0x7be   : > { %2580 = vrot.lane.b32.xlu2 %v2561_v4, %s3877_s7  ;;  %1966 = vrot.lane.b32.xlu1 %v1946_v40, %s3878_s8 }
 0x7bf   : > { %v2855_v45 = vpop.f32.mrf.mxu3 }
 0x7c0   : > { %2278 = vrot.lane.b32.xlu0 %v2256_v47, %s3879_s9 }
 0x7c5   : > { %v2883_v17 = vpop.permute.xlu1 %2882 }
 0x7c6   : > { %2276 = vrot.lane.b32.xlu2 %v2255_v28, %s3879_s9  ;;  %2907 = vst.msk [vmem:[#allocation5] sm:$0xff] %vm2906_vm8, %v2883_v17  ;;  %2582 = vrot.lane.b32.xlu1 %v2562_v44, %s3877_s7 }
 0x7cc   : > { %v2120_v51 = vpop.xlane.xlu0 %2119 }
 0x7cd   : > { %v2915_v41 = vld [vmem:[#allocation5] sm:$0xff] }
 0x7ce   : > { %1970 = vrot.lane.b32.xlu2 %v1948_v24, %s3878_s8  ;;  %1968 = vrot.lane.b32.xlu1 %v1947_v53, %s3878_s8 }
 0x7cf   : > { %3199 = vmatmul.msk.f32.vlgmr.msra.gmra.mxu0 %vm2931_vm9, %v2915_v41 }
 0x7d6   : > { %2892 = vrot.lane.b32.xlu1 %v2871_v1, %s3880_s10 }
 0x7d8   : > { %v2734_v38 = vpop.xlane.xlu2 %2733 }
 0x7d9   : > { %3808 = vrcp.f32 %v2734_v38 }
 0x7da   : > { %3810 = vrcp.f32 %v2120_v51 }
 0x7de   : > { %2586 = vrot.lane.b32.xlu1 %v2564_v3, %s3877_s7 }
 0x7df   : > { %v3809_v49 = vpop.eup %3808 }
 0x7e0   : > { %v2269_v48 = vpop.permute.xlu2 %2268  ;;  %v2872_v39 = vmul.f32 %v3809_v49, %v2852_v35  ;;  %v3811_v57 = vpop.eup %3810 }
 0x7e1   : > { %2292 = vst.msk [vmem:[#allocation5 + $0x8] sm:$0xff] %vm2290_vm6, %v2269_v48  ;;  %v2257_v30 = vmul.f32 %v3811_v57, %v5076_v52 }
 0x7e2   : > { %2894 = vrot.lane.b32.xlu2 %v2872_v39, %s3880_s10 }
 0x7e6   : > { %2280 = vrot.lane.b32.xlu1 %v2257_v30, %s3879_s9 }
 0x7f0   : > { %v1812_v58 = vpop.xlane.xlu1 %1811 }
 0x7f1   : > { %3812 = vrcp.f32 %v1812_v58 }
 0x7f2   : > { %v2885_v42 = vpop.permute.xlu0 %2884 }
 0x7f7   : > { %v3813_v6 = vpop.eup %3812 }
 0x7f8   : > { %v2428_v50 = vpop.xlane.xlu1 %2427  ;;  %v1949_v32 = vmul.f32 %v3813_v6, %v5055_v31 }
 0x7f9   : > { %3814 = vrcp.f32 %v2428_v50 }
 0x7fa   : > { %v1963_v61 = vpop.permute.xlu0 %1962  ;;  %1972 = vrot.lane.b32.xlu0 %v1949_v32, %s3878_s8 }
 0x7fb   : > { %1985 = vst.msk [vmem:[#allocation5 + $0x10] sm:$0xff] %vm1982_vm5, %v1963_v61 }
 0x7ff   : > { %v3815_v18 = vpop.eup %3814 }
 0x800   : > { %v2565_v43 = vmul.f32 %v3815_v18, %v2547_v56 }
 0x802   : > { %v2579_v16 = vpop.permute.xlu0 %2578  ;;  %2588 = vrot.lane.b32.xlu2 %v2565_v43, %s3877_s7 }
 0x80a   : > { %v1965_v52 = vpop.permute.xlu0 %1964 }
 0x80b   : > { %1986 = vst.msk [vmem:[#allocation5 + $0x18] sm:$0xff] %vm1982_vm5, %v1965_v52 }
 0x810   : > { %v2577_v10 = vpop.permute.xlu1 %2576 }
 0x811   : > { %2600 = vst.msk [vmem:[#allocation5 + $0x8] sm:$0xff] %vm2598_vm7, %v2577_v10 }
 0x812   : > { %2908 = vst.msk [vmem:[#allocation5 + $0x8] sm:$0xff] %vm2906_vm8, %v2885_v42  ;;  %v2889_v31 = vpop.permute.xlu0 %2888 }
 0x818   : > { %v2271_v15 = vpop.permute.xlu1 %2270 }
 0x819   : > { %v2736_v25 = vpop.xlane.xlu2 %2735  ;;  %2293 = vst.msk [vmem:[#allocation5 + $0x10] sm:$0xff] %vm2290_vm6, %v2271_v15  ;;  %v2916_v62 = vld [vmem:[#allocation5 + $0x8] sm:$0xff] }
 0x81a   : > { %3816 = vrcp.f32 %v2736_v25  ;;  %2601 = vst.msk [vmem:[#allocation5 + $0x10] sm:$0xff] %vm2598_vm7, %v2579_v16  ;;  %v2275_v54 = vpop.permute.xlu0 %2274  ;;  %3200 = vmatmul.msk.f32.gmra.mxu0 %vm2931_vm9, %v2916_v62 }
 0x820   : > { %v3817_v9 = vpop.eup %3816  ;;  %v2887_v59 = vpop.permute.xlu1 %2886 }
 0x821   : > { %v2581_v2 = vpop.permute.xlu2 %2580  ;;  %2909 = vst.msk [vmem:[#allocation5 + $0x10] sm:$0xff] %vm2906_vm8, %v2887_v59  ;;  %v2873_v22 = vmul.f32 %v3817_v9, %v2855_v45 }
 0x822   : > { %v2891_v37 = vpop.permute.xlu0 %2890 }
 0x823   : > { %2896 = vrot.lane.b32.xlu0 %v2873_v22, %s3880_s10 }
 0x828   : > { %v2273_v26 = vpop.permute.xlu1 %2272  ;;  %v2917_v60 = vld [vmem:[#allocation5 + $0x10] sm:$0xff] }
 0x829   : > { %v2277_v34 = vpop.permute.xlu2 %2276  ;;  %2294 = vst.msk [vmem:[#allocation5 + $0x18] sm:$0xff] %vm2290_vm6, %v2273_v26  ;;  %3201 = vmatmul.msk.f32.gmra.mxu0 %vm2931_vm9, %v2917_v60 }
 0x82a   : > { %2602 = vst.msk [vmem:[#allocation5 + $0x18] sm:$0xff] %vm2598_vm7, %v2581_v2  ;;  %v2585_v8 = vpop.permute.xlu0 %2584 }
 0x82b   : > { %2910 = vst.msk [vmem:[#allocation5 + $0x18] sm:$0xff] %vm2906_vm8, %v2889_v31 }
 0x830   : > { %v1967_v7 = vpop.permute.xlu1 %1966 }
 0x831   : > { %v1971_v33 = vpop.permute.xlu2 %1970  ;;  %1987 = vst.msk [vmem:[#allocation5 + $0x20] sm:$0xff] %vm1982_vm5, %v1967_v7 }
 0x832   : > { %1989 = vst.msk [vmem:[#allocation5 + $0x30] sm:$0xff] %vm1982_vm5, %v1971_v33  ;;  %v2279_v14 = vpop.permute.xlu0 %2278  ;;  %v2918_v55 = vld [vmem:[#allocation5 + $0x18] sm:$0xff] }
 0x833   : > { %2295 = vst.msk [vmem:[#allocation5 + $0x20] sm:$0xff] %vm2290_vm6, %v2275_v54  ;;  %3202 = vmatmul.msk.f32.gmra.mxu0 %vm2931_vm9, %v2918_v55 }
 0x834   : > { %2297 = vst.msk [vmem:[#allocation5 + $0x30] sm:$0xff] %vm2290_vm6, %v2279_v14 }
 0x838   : > { %v2583_v23 = vpop.permute.xlu1 %2582 }
 0x839   : > { %2603 = vst.msk [vmem:[#allocation5 + $0x20] sm:$0xff] %vm2598_vm7, %v2583_v23 }
 0x83a   : > { %2911 = vst.msk [vmem:[#allocation5 + $0x20] sm:$0xff] %vm2906_vm8, %v2891_v37 }
 0x83c   : > { %v2895_v40 = vpop.permute.xlu2 %2894 }
 0x840   : > { %v1969_v11 = vpop.permute.xlu1 %1968 }
 0x841   : > { %1988 = vst.msk [vmem:[#allocation5 + $0x28] sm:$0xff] %vm1982_vm5, %v1969_v11  ;;  %v2919_v5 = vld [vmem:[#allocation5 + $0x20] sm:$0xff] }
 0x842   : > { %2296 = vst.msk [vmem:[#allocation5 + $0x28] sm:$0xff] %vm2290_vm6, %v2277_v34  ;;  %3203 = vmatmul.msk.f32.gmra.mxu0 %vm2931_vm9, %v2919_v5 }
 0x843   : > { %2604 = vst.msk [vmem:[#allocation5 + $0x28] sm:$0xff] %vm2598_vm7, %v2585_v8 }
 0x848   : > { %v2893_v29 = vpop.permute.xlu1 %2892 }
 0x849   : > { %2912 = vst.msk [vmem:[#allocation5 + $0x28] sm:$0xff] %vm2906_vm8, %v2893_v29 }
 0x84c   : > { %v2973_v63 = vpop.f32.mrf.mxu0 }
 0x84d   : > { %2997 = vst.msk [vmem:[%s3942_s29] sm:$0xff] %vm2931_vm9, %v2973_v63 }
 0x850   : > { %v2587_v19 = vpop.permute.xlu1 %2586  ;;  %v2920_v4 = vld [vmem:[#allocation5 + $0x28] sm:$0xff] }
 0x851   : > { %2605 = vst.msk [vmem:[#allocation5 + $0x30] sm:$0xff] %vm2598_vm7, %v2587_v19  ;;  %3204 = vmatmul.msk.f32.gmra.mxu0 %vm2931_vm9, %v2920_v4 }
 0x852   : > { %2913 = vst.msk [vmem:[#allocation5 + $0x30] sm:$0xff] %vm2906_vm8, %v2895_v40 }
 0x858   : > { %v2281_v13 = vpop.permute.xlu1 %2280 }
 0x859   : > { %v2921_v47 = vld [vmem:[#allocation5 + $0x30] sm:$0xff] }
 0x85a   : > { %3205 = vmatmul.msk.f32.gmra.mxu0 %vm2931_vm9, %v2921_v47 }
 0x85c   : > { %v2589_v28 = vpop.permute.xlu2 %2588 }
 0x86c   : > { %v1973_v21 = vpop.permute.xlu0 %1972 }
 0x86d   : > { %1990 = vst.msk [vmem:[#allocation5 + $0x38] sm:$0xff] %vm1982_vm5, %v1973_v21 }
 0x86e   : > { %2298 = vst.msk [vmem:[#allocation5 + $0x38] sm:$0xff] %vm2290_vm6, %v2281_v13 }
 0x86f   : > { %2606 = vst.msk [vmem:[#allocation5 + $0x38] sm:$0xff] %vm2598_vm7, %v2589_v28 }
 0x895   : > { %v2897_v44 = vpop.permute.xlu0 %2896 }
 0x896   : > { %2914 = vst.msk [vmem:[#allocation5 + $0x38] sm:$0xff] %vm2906_vm8, %v2897_v44 }
 0x897   : > { %v2976_v17 = vpop.f32.mrf.mxu0 }
 0x898   : > { %2998 = vst.msk [vmem:[%s3942_s29 + $0x8] sm:$0xff] %vm2931_vm9, %v2976_v17 }
 0x89d   : > { %v2922_v0 = vld [vmem:[#allocation5 + $0x38] sm:$0xff] }
 0x89e   : > { %3206 = vmatmul.msk.f32.gmra.mxu0 %vm2931_vm9, %v2922_v0 }
 0x8a6   : > { %v2979_v27 = vpop.f32.mrf.mxu0 }
 0x8a7   : > { %2999 = vst.msk [vmem:[%s3942_s29 + $0x10] sm:$0xff] %vm2931_vm9, %v2979_v27 }
 0x8b0   : > { %v2982_v24 = vpop.f32.mrf.mxu0 }
 0x8b1   : > { %3000 = vst.msk [vmem:[%s3942_s29 + $0x18] sm:$0xff] %vm2931_vm9, %v2982_v24 }
 0x8bf   : > { %v2985_v53 = vpop.f32.mrf.mxu0 }
 0x8c0   : > { %3001 = vst.msk [vmem:[%s3942_s29 + $0x20] sm:$0xff] %vm2931_vm9, %v2985_v53 }
 0x8ce   : > { %v2988_v41 = vpop.f32.mrf.mxu0 }
 0x8cf   : > { %3002 = vst.msk [vmem:[%s3942_s29 + $0x28] sm:$0xff] %vm2931_vm9, %v2988_v41 }
 0x8d7   : > { %v2991_v36 = vpop.f32.mrf.mxu0 }
 0x8d8   : > { %3003 = vst.msk [vmem:[%s3942_s29 + $0x30] sm:$0xff] %vm2931_vm9, %v2991_v36 }
 0x91b   : > { %v2994_v12 = vpop.f32.mrf.mxu0 }
 0x91c   : > { %3004 = vst.msk [vmem:[%s3942_s29 + $0x38] sm:$0xff] %vm2931_vm9, %v2994_v12 }
 0x91d PF: > { %s13_s16 = sadd.s32 1, %s3864_s16   ;;  %s5255_s12 = smov %s3856_s14 }
 0x91e   : > { %p10_p8 = scmp.ge.s32.totalorder %s13_s16, 6   ;;  %s5256_s13 = smov %s3860_s15 }
 0x91f   : > { %s5257_s14 = smov %s5260_s17  ;;  %s5258_s15 = smov %s5264_s18 }
 0x920   :  { %12 = sbr.rel (!%p10_p8) target bundleno = 3 (0x3), region = 67 }

</bundles_post_ra>
